<compile_context>
chip_gen: v7x
topology: tpu7x:2x2x1
jax: 0.10.0
libtpu: 0.0.40
codegen_flags: <defaults>
</compile_context>

<pallas_src>
import jax
import jax.numpy as jnp
from jax import lax
from jax.experimental import pallas as pl
from jax.experimental.pallas import tpu as pltpu


def _decoder_rnn_kernel(x_ref, h0_ref, c0_ref, *rest):
    """Fused multi-layer LSTM + time flip.

    x_ref   : (B, T, I)   batch-first input
    h0_ref  : (L, B, H)   initial hidden states
    c0_ref  : (L, B, H)   initial cell states
    rest    : L x [w_ih_T (I_l, 4H), w_hh_T (H, 4H), bias (1, 4H)], then
              out_ref (B, T, H),
              xin_sc (T*B, I), act_sc (T*B, H)   (time-major VMEM scratch rows)
    Gate order is PyTorch's (i, f, g, o).
    """
    nlayers = (len(rest) - 3) // 3
    wih_refs = rest[0:3 * nlayers:3]
    whh_refs = rest[1:3 * nlayers:3]
    b_refs = rest[2:3 * nlayers:3]
    out_ref = rest[3 * nlayers]
    xin_sc, act_sc = rest[3 * nlayers + 1:]

    B, T, _ = x_ref.shape
    H = h0_ref.shape[-1]

    # Stage batch-first x into time-major rows (row block t = all B rows of step
    # t) with purely static slices.  Replaces any host-side transpose.
    for t in range(T):
        xin_sc[t * B:(t + 1) * B, :] = x_ref[:, t, :].astype(xin_sc.dtype)

    for l in range(nlayers):
        in_sc = xin_sc if l == 0 else act_sc
        last = (l == nlayers - 1)

        # Hoisted, time-batched input projection: ONE MXU matmul per layer with
        # both biases folded in.  (T*B, I_l) @ (I_l, 4H) + (1, 4H) -> (T*B, 4H).
        # Read in_sc fully BEFORE the recurrent loop overwrites act_sc (l >= 1).
        xg = jnp.dot(in_sc[...], wih_refs[l][...],
                     preferred_element_type=jnp.float32,
                     precision=lax.Precision.HIGHEST) + b_refs[l][...]

        w_hh = whh_refs[l][...]                       # (H, 4H), loaded once
        h_prev = h0_ref[l].astype(jnp.float32)        # (B, H)
        c_prev = c0_ref[l].astype(jnp.float32)        # (B, H)

        # Serial recurrence: only the hidden projection + gate math remain on
        # the critical path.  T is static & small -> fully static unrolled loop.
        for t in range(T):
            gates = xg[t * B:(t + 1) * B, :] + jnp.dot(
                h_prev, w_hh,
                preferred_element_type=jnp.float32,
                precision=lax.Precision.HIGHEST)      # (B, 4H)
            sig = jax.nn.sigmoid(gates)   # one EUP pass over the whole tile
            i_g = sig[:, 0 * H:1 * H]
            f_g = sig[:, 1 * H:2 * H]
            o_g = sig[:, 3 * H:4 * H]
            g_g = jnp.tanh(gates[:, 2 * H:3 * H])
            c_prev = f_g * c_prev + i_g * g_g
            h_prev = o_g * jnp.tanh(c_prev)
            if last:
                # torch.flip(output, [1]) folded into the output store index.
                out_ref[:, T - 1 - t, :] = h_prev.astype(out_ref.dtype)
            else:
                act_sc[t * B:(t + 1) * B, :] = h_prev


def decoder_rnn_forward(x, h, params):
    """DecoderRNN.forward: output, _ = lstm(x, h); return torch.flip(output, [1]).

    x      : (B, T, input_size)   (batch_first=True, like PyTorch)
    h      : (h0, c0), each (nlayers, B, H)
    params : list of (w_ih, w_hh, b_ih, b_hh) per layer, PyTorch layout
             (w_ih: (4H, I_l), w_hh: (4H, H), gate order i, f, g, o).
    Returns (B, T, H).
    """
    h0, c0 = h
    nlayers = len(params)
    B, T, I = x.shape
    H = h0.shape[-1]

    flat_params = []
    for (w_ih, w_hh, b_ih, b_hh) in params:
        flat_params += [
            jnp.asarray(w_ih).T.astype(jnp.float32),                    # (I_l, 4H)
            jnp.asarray(w_hh).T.astype(jnp.float32),                    # (H, 4H)
            (jnp.asarray(b_ih) + jnp.asarray(b_hh))
            .reshape(1, 4 * H).astype(jnp.float32),                     # (1, 4H)
        ]

    n_inputs = 3 + 3 * nlayers
    vmem_spec = pl.BlockSpec(memory_space=pltpu.MemorySpace.VMEM)

    # TODO(synk): nn.LSTM inter-layer dropout is train-mode-only & stochastic;
    # inference semantics (no dropout) are implemented here.
    return pl.pallas_call(
        _decoder_rnn_kernel,
        out_shape=jax.ShapeDtypeStruct((B, T, H), x.dtype),
        in_specs=[vmem_spec] * n_inputs,
        out_specs=vmem_spec,
        scratch_shapes=[
            pltpu.VMEM((T * B, I), jnp.float32),   # time-major staging of x
            pltpu.VMEM((T * B, H), jnp.float32),   # inter-layer activations
        ],
    )(x, h0, c0, *flat_params)


# ----------------------------- pure-JAX reference -----------------------------
def _ref_lstm_flip(x, h, params):
    h0, c0 = h
    layer_in = x
    for l, (w_ih, w_hh, b_ih, b_hh) in enumerate(params):
        Hn = h0.shape[-1]
        hs, cs = h0[l], c0[l]
        outs = []
        for t in range(x.shape[1]):
            gates = (jnp.dot(layer_in[:, t, :], w_ih.T, precision=lax.Precision.HIGHEST)
                     + b_ih
                     + jnp.dot(hs, w_hh.T, precision=lax.Precision.HIGHEST)
                     + b_hh)
            i = jax.nn.sigmoid(gates[:, 0 * Hn:1 * Hn])
            f = jax.nn.sigmoid(gates[:, 1 * Hn:2 * Hn])
            g = jnp.tanh(gates[:, 2 * Hn:3 * Hn])
            o = jax.nn.sigmoid(gates[:, 3 * Hn:4 * Hn])
            cs = f * cs + i * g
            hs = o * jnp.tanh(cs)
            outs.append(hs)
        layer_in = jnp.stack(outs, axis=1)
    return jnp.flip(layer_in, axis=1)


if __name__ == "__main__":
    # Module hyperparameters (small, consistent with DecoderRNN.__init__)
    input_size = 4
    nhidden = 32
    nlayers = 2
    B, T = 2, 8

    key = jax.random.PRNGKey(0)

    # init_weights(): every LSTM parameter ~ Uniform(-0.1, 0.1), deterministic here.
    params = []
    for l in range(nlayers):
        in_sz = input_size if l == 0 else nhidden
        key, k1, k2, k3, k4 = jax.random.split(key, 5)
        w_ih = jax.random.uniform(k1, (4 * nhidden, in_sz), jnp.float32, -0.1, 0.1)
        w_hh = jax.random.uniform(k2, (4 * nhidden, nhidden), jnp.float32, -0.1, 0.1)
        b_ih = jax.random.uniform(k3, (4 * nhidden,), jnp.float32, -0.1, 0.1)
        b_hh = jax.random.uniform(k4, (4 * nhidden,), jnp.float32, -0.1, 0.1)
        params.append((w_ih, w_hh, b_ih, b_hh))

    key, kx, kh, kc = jax.random.split(key, 4)
    x = jax.random.normal(kx, (B, T, input_size), jnp.float32)
    h0 = jax.random.normal(kh, (nlayers, B, nhidden), jnp.float32)
    c0 = jax.random.normal(kc, (nlayers, B, nhidden), jnp.float32)

    fwd = jax.jit(decoder_rnn_forward)
    out = fwd(x, (h0, c0), params)
    out = jax.block_until_ready(out)

    ref = _ref_lstm_flip(x, (h0, c0), params)
    assert out.shape == (B, T, nhidden), out.shape
    assert jnp.allclose(out, ref, atol=1e-5, rtol=1e-5), \
        float(jnp.max(jnp.abs(out - ref)))

    print("KERNEL_OK")
</pallas_src>

<mosaic_0001>
module attributes {stable_mosaic.version = 11 : i64} {
  func.func @_decoder_rnn_kernel(%arg0: memref<2x8x4xf32, #tpu.memory_space<vmem>>, %arg1: memref<2x2x32xf32, #tpu.memory_space<vmem>>, %arg2: memref<2x2x32xf32, #tpu.memory_space<vmem>>, %arg3: memref<4x128xf32, #tpu.memory_space<vmem>>, %arg4: memref<32x128xf32, #tpu.memory_space<vmem>>, %arg5: memref<1x128xf32, #tpu.memory_space<vmem>>, %arg6: memref<32x128xf32, #tpu.memory_space<vmem>>, %arg7: memref<32x128xf32, #tpu.memory_space<vmem>>, %arg8: memref<1x128xf32, #tpu.memory_space<vmem>>, %arg9: memref<2x8x32xf32, #tpu.memory_space<vmem>>, %arg10: memref<16x4xf32, #tpu.memory_space<vmem>>, %arg11: memref<16x32xf32, #tpu.memory_space<vmem>>) attributes {dimension_semantics = [], scalar_prefetch = 0 : i64, scratch_operands = 2 : i64, tpu.core_type = #tpu.core_type<tc>} {
    %c0 = arith.constant 0 : index
    %c0_0 = arith.constant 0 : index
    %c0_1 = arith.constant 0 : index
    %0 = vector.load %arg0[%c0, %c0_0, %c0_1] : memref<2x8x4xf32, #tpu.memory_space<vmem>>, vector<2x1x4xf32>
    %1 = vector.shape_cast %0 : vector<2x1x4xf32> to vector<2x4xf32>
    %c0_2 = arith.constant 0 : index
    %c0_3 = arith.constant 0 : index
    %2 = vector.load %arg10[%c0_2, %c0_3] : memref<16x4xf32, #tpu.memory_space<vmem>>, vector<2x4xf32>
    tpu.vector_store %arg10[%c0_2, %c0_3], %1 {strides = array<i32>} : memref<16x4xf32, #tpu.memory_space<vmem>>, vector<2x4xf32>,
    %c0_4 = arith.constant 0 : index
    %c1 = arith.constant 1 : index
    %c0_5 = arith.constant 0 : index
    %3 = vector.load %arg0[%c0_4, %c1, %c0_5] : memref<2x8x4xf32, #tpu.memory_space<vmem>>, vector<2x1x4xf32>
    %4 = vector.shape_cast %3 : vector<2x1x4xf32> to vector<2x4xf32>
    %c2 = arith.constant 2 : index
    %c0_6 = arith.constant 0 : index
    %5 = vector.load %arg10[%c2, %c0_6] : memref<16x4xf32, #tpu.memory_space<vmem>>, vector<2x4xf32>
    tpu.vector_store %arg10[%c2, %c0_6], %4 {strides = array<i32>} : memref<16x4xf32, #tpu.memory_space<vmem>>, vector<2x4xf32>,
    %c0_7 = arith.constant 0 : index
    %c2_8 = arith.constant 2 : index
    %c0_9 = arith.constant 0 : index
    %6 = vector.load %arg0[%c0_7, %c2_8, %c0_9] : memref<2x8x4xf32, #tpu.memory_space<vmem>>, vector<2x1x4xf32>
    %7 = vector.shape_cast %6 : vector<2x1x4xf32> to vector<2x4xf32>
    %c4 = arith.constant 4 : index
    %c0_10 = arith.constant 0 : index
    %8 = vector.load %arg10[%c4, %c0_10] : memref<16x4xf32, #tpu.memory_space<vmem>>, vector<2x4xf32>
    tpu.vector_store %arg10[%c4, %c0_10], %7 {strides = array<i32>} : memref<16x4xf32, #tpu.memory_space<vmem>>, vector<2x4xf32>,
    %c0_11 = arith.constant 0 : index
    %c3 = arith.constant 3 : index
    %c0_12 = arith.constant 0 : index
    %9 = vector.load %arg0[%c0_11, %c3, %c0_12] : memref<2x8x4xf32, #tpu.memory_space<vmem>>, vector<2x1x4xf32>
    %10 = vector.shape_cast %9 : vector<2x1x4xf32> to vector<2x4xf32>
    %c6 = arith.constant 6 : index
    %c0_13 = arith.constant 0 : index
    %11 = vector.load %arg10[%c6, %c0_13] : memref<16x4xf32, #tpu.memory_space<vmem>>, vector<2x4xf32>
    tpu.vector_store %arg10[%c6, %c0_13], %10 {strides = array<i32>} : memref<16x4xf32, #tpu.memory_space<vmem>>, vector<2x4xf32>,
    %c0_14 = arith.constant 0 : index
    %c4_15 = arith.constant 4 : index
    %c0_16 = arith.constant 0 : index
    %12 = vector.load %arg0[%c0_14, %c4_15, %c0_16] : memref<2x8x4xf32, #tpu.memory_space<vmem>>, vector<2x1x4xf32>
    %13 = vector.shape_cast %12 : vector<2x1x4xf32> to vector<2x4xf32>
    %c8 = arith.constant 8 : index
    %c0_17 = arith.constant 0 : index
    %14 = vector.load %arg10[%c8, %c0_17] : memref<16x4xf32, #tpu.memory_space<vmem>>, vector<2x4xf32>
    tpu.vector_store %arg10[%c8, %c0_17], %13 {strides = array<i32>} : memref<16x4xf32, #tpu.memory_space<vmem>>, vector<2x4xf32>,
    %c0_18 = arith.constant 0 : index
    %c5 = arith.constant 5 : index
    %c0_19 = arith.constant 0 : index
    %15 = vector.load %arg0[%c0_18, %c5, %c0_19] : memref<2x8x4xf32, #tpu.memory_space<vmem>>, vector<2x1x4xf32>
    %16 = vector.shape_cast %15 : vector<2x1x4xf32> to vector<2x4xf32>
    %c10 = arith.constant 10 : index
    %c0_20 = arith.constant 0 : index
    %17 = vector.load %arg10[%c10, %c0_20] : memref<16x4xf32, #tpu.memory_space<vmem>>, vector<2x4xf32>
    tpu.vector_store %arg10[%c10, %c0_20], %16 {strides = array<i32>} : memref<16x4xf32, #tpu.memory_space<vmem>>, vector<2x4xf32>,
    %c0_21 = arith.constant 0 : index
    %c6_22 = arith.constant 6 : index
    %c0_23 = arith.constant 0 : index
    %18 = vector.load %arg0[%c0_21, %c6_22, %c0_23] : memref<2x8x4xf32, #tpu.memory_space<vmem>>, vector<2x1x4xf32>
    %19 = vector.shape_cast %18 : vector<2x1x4xf32> to vector<2x4xf32>
    %c12 = arith.constant 12 : index
    %c0_24 = arith.constant 0 : index
    %20 = vector.load %arg10[%c12, %c0_24] : memref<16x4xf32, #tpu.memory_space<vmem>>, vector<2x4xf32>
    tpu.vector_store %arg10[%c12, %c0_24], %19 {strides = array<i32>} : memref<16x4xf32, #tpu.memory_space<vmem>>, vector<2x4xf32>,
    %c0_25 = arith.constant 0 : index
    %c7 = arith.constant 7 : index
    %c0_26 = arith.constant 0 : index
    %21 = vector.load %arg0[%c0_25, %c7, %c0_26] : memref<2x8x4xf32, #tpu.memory_space<vmem>>, vector<2x1x4xf32>
    %22 = vector.shape_cast %21 : vector<2x1x4xf32> to vector<2x4xf32>
    %c14 = arith.constant 14 : index
    %c0_27 = arith.constant 0 : index
    %23 = vector.load %arg10[%c14, %c0_27] : memref<16x4xf32, #tpu.memory_space<vmem>>, vector<2x4xf32>
    tpu.vector_store %arg10[%c14, %c0_27], %22 {strides = array<i32>} : memref<16x4xf32, #tpu.memory_space<vmem>>, vector<2x4xf32>,
    %c0_28 = arith.constant 0 : index
    %c0_29 = arith.constant 0 : index
    %24 = vector.load %arg10[%c0_28, %c0_29] : memref<16x4xf32, #tpu.memory_space<vmem>>, vector<16x4xf32>
    %c0_30 = arith.constant 0 : index
    %c0_31 = arith.constant 0 : index
    %25 = vector.load %arg3[%c0_30, %c0_31] : memref<4x128xf32, #tpu.memory_space<vmem>>, vector<4x128xf32>
    %cst = arith.constant dense<0.000000e+00> : vector<16x128xf32>
    %26 = tpu.matmul %24, %25, %cst {dimension_numbers = #tpu.dot_dimension_numbers<[1], [0], [0], [1], [0, 0, 1, 1], [], []>, precision = #tpu.contract_precision<fp32>} : vector<16x4xf32>, vector<4x128xf32>, vector<16x128xf32> -> vector<16x128xf32>
    %c0_32 = arith.constant 0 : index
    %c0_33 = arith.constant 0 : index
    %27 = vector.load %arg5[%c0_32, %c0_33] : memref<1x128xf32, #tpu.memory_space<vmem>>, vector<1x128xf32>
    %28 = vector.broadcast %27 : vector<1x128xf32> to vector<16x128xf32>
    %29 = arith.addf %26, %28 : vector<16x128xf32>
    %c0_34 = arith.constant 0 : index
    %c0_35 = arith.constant 0 : index
    %30 = vector.load %arg4[%c0_34, %c0_35] : memref<32x128xf32, #tpu.memory_space<vmem>>, vector<32x128xf32>
    %c0_36 = arith.constant 0 : index
    %c0_37 = arith.constant 0 : index
    %c0_38 = arith.constant 0 : index
    %31 = vector.load %arg1[%c0_36, %c0_37, %c0_38] : memref<2x2x32xf32, #tpu.memory_space<vmem>>, vector<1x2x32xf32>
    %32 = vector.shape_cast %31 : vector<1x2x32xf32> to vector<2x32xf32>
    %c0_39 = arith.constant 0 : index
    %c0_40 = arith.constant 0 : index
    %c0_41 = arith.constant 0 : index
    %33 = vector.load %arg2[%c0_39, %c0_40, %c0_41] : memref<2x2x32xf32, #tpu.memory_space<vmem>>, vector<1x2x32xf32>
    %34 = vector.shape_cast %33 : vector<1x2x32xf32> to vector<2x32xf32>
    %35 = vector.extract_strided_slice %29 {offsets = [0, 0], sizes = [2, 128], strides = [1, 1]} : vector<16x128xf32> to vector<2x128xf32>
    %cst_42 = arith.constant dense<0.000000e+00> : vector<2x128xf32>
    %36 = tpu.matmul %32, %30, %cst_42 {dimension_numbers = #tpu.dot_dimension_numbers<[1], [0], [0], [1], [0, 0, 1, 1], [], []>, precision = #tpu.contract_precision<fp32>} : vector<2x32xf32>, vector<32x128xf32>, vector<2x128xf32> -> vector<2x128xf32>
    %37 = arith.addf %35, %36 : vector<2x128xf32>
    %38 = arith.negf %37 : vector<2x128xf32>
    %39 = math.exp %38 : vector<2x128xf32>
    %cst_43 = arith.constant 1.000000e+00 : f32
    %40 = vector.broadcast %cst_43 : f32 to vector<2x128xf32>
    %41 = arith.addf %40, %39 : vector<2x128xf32>
    %42 = arith.divf %40, %41 : vector<2x128xf32>
    %43 = vector.extract_strided_slice %42 {offsets = [0, 0], sizes = [2, 32], strides = [1, 1]} : vector<2x128xf32> to vector<2x32xf32>
    %44 = vector.extract_strided_slice %42 {offsets = [0, 32], sizes = [2, 32], strides = [1, 1]} : vector<2x128xf32> to vector<2x32xf32>
    %45 = vector.extract_strided_slice %42 {offsets = [0, 96], sizes = [2, 32], strides = [1, 1]} : vector<2x128xf32> to vector<2x32xf32>
    %46 = vector.extract_strided_slice %37 {offsets = [0, 64], sizes = [2, 32], strides = [1, 1]} : vector<2x128xf32> to vector<2x32xf32>
    %47 = math.tanh %46 : vector<2x32xf32>
    %48 = arith.mulf %44, %34 : vector<2x32xf32>
    %49 = arith.mulf %43, %47 : vector<2x32xf32>
    %50 = arith.addf %48, %49 : vector<2x32xf32>
    %51 = math.tanh %50 : vector<2x32xf32>
    %52 = arith.mulf %45, %51 : vector<2x32xf32>
    %c0_44 = arith.constant 0 : index
    %c0_45 = arith.constant 0 : index
    %53 = vector.load %arg11[%c0_44, %c0_45] : memref<16x32xf32, #tpu.memory_space<vmem>>, vector<2x32xf32>
    tpu.vector_store %arg11[%c0_44, %c0_45], %52 {strides = array<i32>} : memref<16x32xf32, #tpu.memory_space<vmem>>, vector<2x32xf32>,
    %54 = vector.extract_strided_slice %29 {offsets = [2, 0], sizes = [2, 128], strides = [1, 1]} : vector<16x128xf32> to vector<2x128xf32>
    %cst_46 = arith.constant dense<0.000000e+00> : vector<2x128xf32>
    %55 = tpu.matmul %52, %30, %cst_46 {dimension_numbers = #tpu.dot_dimension_numbers<[1], [0], [0], [1], [0, 0, 1, 1], [], []>, precision = #tpu.contract_precision<fp32>} : vector<2x32xf32>, vector<32x128xf32>, vector<2x128xf32> -> vector<2x128xf32>
    %56 = arith.addf %54, %55 : vector<2x128xf32>
    %57 = arith.negf %56 : vector<2x128xf32>
    %58 = math.exp %57 : vector<2x128xf32>
    %cst_47 = arith.constant 1.000000e+00 : f32
    %59 = vector.broadcast %cst_47 : f32 to vector<2x128xf32>
    %60 = arith.addf %59, %58 : vector<2x128xf32>
    %61 = arith.divf %59, %60 : vector<2x128xf32>
    %62 = vector.extract_strided_slice %61 {offsets = [0, 0], sizes = [2, 32], strides = [1, 1]} : vector<2x128xf32> to vector<2x32xf32>
    %63 = vector.extract_strided_slice %61 {offsets = [0, 32], sizes = [2, 32], strides = [1, 1]} : vector<2x128xf32> to vector<2x32xf32>
    %64 = vector.extract_strided_slice %61 {offsets = [0, 96], sizes = [2, 32], strides = [1, 1]} : vector<2x128xf32> to vector<2x32xf32>
    %65 = vector.extract_strided_slice %56 {offsets = [0, 64], sizes = [2, 32], strides = [1, 1]} : vector<2x128xf32> to vector<2x32xf32>
    %66 = math.tanh %65 : vector<2x32xf32>
    %67 = arith.mulf %63, %50 : vector<2x32xf32>
    %68 = arith.mulf %62, %66 : vector<2x32xf32>
    %69 = arith.addf %67, %68 : vector<2x32xf32>
    %70 = math.tanh %69 : vector<2x32xf32>
    %71 = arith.mulf %64, %70 : vector<2x32xf32>
    %c2_48 = arith.constant 2 : index
    %c0_49 = arith.constant 0 : index
    %72 = vector.load %arg11[%c2_48, %c0_49] : memref<16x32xf32, #tpu.memory_space<vmem>>, vector<2x32xf32>
    tpu.vector_store %arg11[%c2_48, %c0_49], %71 {strides = array<i32>} : memref<16x32xf32, #tpu.memory_space<vmem>>, vector<2x32xf32>,
    %73 = vector.extract_strided_slice %29 {offsets = [4, 0], sizes = [2, 128], strides = [1, 1]} : vector<16x128xf32> to vector<2x128xf32>
    %cst_50 = arith.constant dense<0.000000e+00> : vector<2x128xf32>
    %74 = tpu.matmul %71, %30, %cst_50 {dimension_numbers = #tpu.dot_dimension_numbers<[1], [0], [0], [1], [0, 0, 1, 1], [], []>, precision = #tpu.contract_precision<fp32>} : vector<2x32xf32>, vector<32x128xf32>, vector<2x128xf32> -> vector<2x128xf32>
    %75 = arith.addf %73, %74 : vector<2x128xf32>
    %76 = arith.negf %75 : vector<2x128xf32>
    %77 = math.exp %76 : vector<2x128xf32>
    %cst_51 = arith.constant 1.000000e+00 : f32
    %78 = vector.broadcast %cst_51 : f32 to vector<2x128xf32>
    %79 = arith.addf %78, %77 : vector<2x128xf32>
    %80 = arith.divf %78, %79 : vector<2x128xf32>
    %81 = vector.extract_strided_slice %80 {offsets = [0, 0], sizes = [2, 32], strides = [1, 1]} : vector<2x128xf32> to vector<2x32xf32>
    %82 = vector.extract_strided_slice %80 {offsets = [0, 32], sizes = [2, 32], strides = [1, 1]} : vector<2x128xf32> to vector<2x32xf32>
    %83 = vector.extract_strided_slice %80 {offsets = [0, 96], sizes = [2, 32], strides = [1, 1]} : vector<2x128xf32> to vector<2x32xf32>
    %84 = vector.extract_strided_slice %75 {offsets = [0, 64], sizes = [2, 32], strides = [1, 1]} : vector<2x128xf32> to vector<2x32xf32>
    %85 = math.tanh %84 : vector<2x32xf32>
    %86 = arith.mulf %82, %69 : vector<2x32xf32>
    %87 = arith.mulf %81, %85 : vector<2x32xf32>
    %88 = arith.addf %86, %87 : vector<2x32xf32>
    %89 = math.tanh %88 : vector<2x32xf32>
    %90 = arith.mulf %83, %89 : vector<2x32xf32>
    %c4_52 = arith.constant 4 : index
    %c0_53 = arith.constant 0 : index
    %91 = vector.load %arg11[%c4_52, %c0_53] : memref<16x32xf32, #tpu.memory_space<vmem>>, vector<2x32xf32>
    tpu.vector_store %arg11[%c4_52, %c0_53], %90 {strides = array<i32>} : memref<16x32xf32, #tpu.memory_space<vmem>>, vector<2x32xf32>,
    %92 = vector.extract_strided_slice %29 {offsets = [6, 0], sizes = [2, 128], strides = [1, 1]} : vector<16x128xf32> to vector<2x128xf32>
    %cst_54 = arith.constant dense<0.000000e+00> : vector<2x128xf32>
    %93 = tpu.matmul %90, %30, %cst_54 {dimension_numbers = #tpu.dot_dimension_numbers<[1], [0], [0], [1], [0, 0, 1, 1], [], []>, precision = #tpu.contract_precision<fp32>} : vector<2x32xf32>, vector<32x128xf32>, vector<2x128xf32> -> vector<2x128xf32>
    %94 = arith.addf %92, %93 : vector<2x128xf32>
    %95 = arith.negf %94 : vector<2x128xf32>
    %96 = math.exp %95 : vector<2x128xf32>
    %cst_55 = arith.constant 1.000000e+00 : f32
    %97 = vector.broadcast %cst_55 : f32 to vector<2x128xf32>
    %98 = arith.addf %97, %96 : vector<2x128xf32>
    %99 = arith.divf %97, %98 : vector<2x128xf32>
    %100 = vector.extract_strided_slice %99 {offsets = [0, 0], sizes = [2, 32], strides = [1, 1]} : vector<2x128xf32> to vector<2x32xf32>
    %101 = vector.extract_strided_slice %99 {offsets = [0, 32], sizes = [2, 32], strides = [1, 1]} : vector<2x128xf32> to vector<2x32xf32>
    %102 = vector.extract_strided_slice %99 {offsets = [0, 96], sizes = [2, 32], strides = [1, 1]} : vector<2x128xf32> to vector<2x32xf32>
    %103 = vector.extract_strided_slice %94 {offsets = [0, 64], sizes = [2, 32], strides = [1, 1]} : vector<2x128xf32> to vector<2x32xf32>
    %104 = math.tanh %103 : vector<2x32xf32>
    %105 = arith.mulf %101, %88 : vector<2x32xf32>
    %106 = arith.mulf %100, %104 : vector<2x32xf32>
    %107 = arith.addf %105, %106 : vector<2x32xf32>
    %108 = math.tanh %107 : vector<2x32xf32>
    %109 = arith.mulf %102, %108 : vector<2x32xf32>
    %c6_56 = arith.constant 6 : index
    %c0_57 = arith.constant 0 : index
    %110 = vector.load %arg11[%c6_56, %c0_57] : memref<16x32xf32, #tpu.memory_space<vmem>>, vector<2x32xf32>
    tpu.vector_store %arg11[%c6_56, %c0_57], %109 {strides = array<i32>} : memref<16x32xf32, #tpu.memory_space<vmem>>, vector<2x32xf32>,
    %111 = vector.extract_strided_slice %29 {offsets = [8, 0], sizes = [2, 128], strides = [1, 1]} : vector<16x128xf32> to vector<2x128xf32>
    %cst_58 = arith.constant dense<0.000000e+00> : vector<2x128xf32>
    %112 = tpu.matmul %109, %30, %cst_58 {dimension_numbers = #tpu.dot_dimension_numbers<[1], [0], [0], [1], [0, 0, 1, 1], [], []>, precision = #tpu.contract_precision<fp32>} : vector<2x32xf32>, vector<32x128xf32>, vector<2x128xf32> -> vector<2x128xf32>
    %113 = arith.addf %111, %112 : vector<2x128xf32>
    %114 = arith.negf %113 : vector<2x128xf32>
    %115 = math.exp %114 : vector<2x128xf32>
    %cst_59 = arith.constant 1.000000e+00 : f32
    %116 = vector.broadcast %cst_59 : f32 to vector<2x128xf32>
    %117 = arith.addf %116, %115 : vector<2x128xf32>
    %118 = arith.divf %116, %117 : vector<2x128xf32>
    %119 = vector.extract_strided_slice %118 {offsets = [0, 0], sizes = [2, 32], strides = [1, 1]} : vector<2x128xf32> to vector<2x32xf32>
    %120 = vector.extract_strided_slice %118 {offsets = [0, 32], sizes = [2, 32], strides = [1, 1]} : vector<2x128xf32> to vector<2x32xf32>
    %121 = vector.extract_strided_slice %118 {offsets = [0, 96], sizes = [2, 32], strides = [1, 1]} : vector<2x128xf32> to vector<2x32xf32>
    %122 = vector.extract_strided_slice %113 {offsets = [0, 64], sizes = [2, 32], strides = [1, 1]} : vector<2x128xf32> to vector<2x32xf32>
    %123 = math.tanh %122 : vector<2x32xf32>
    %124 = arith.mulf %120, %107 : vector<2x32xf32>
    %125 = arith.mulf %119, %123 : vector<2x32xf32>
    %126 = arith.addf %124, %125 : vector<2x32xf32>
    %127 = math.tanh %126 : vector<2x32xf32>
    %128 = arith.mulf %121, %127 : vector<2x32xf32>
    %c8_60 = arith.constant 8 : index
    %c0_61 = arith.constant 0 : index
    %129 = vector.load %arg11[%c8_60, %c0_61] : memref<16x32xf32, #tpu.memory_space<vmem>>, vector<2x32xf32>
    tpu.vector_store %arg11[%c8_60, %c0_61], %128 {strides = array<i32>} : memref<16x32xf32, #tpu.memory_space<vmem>>, vector<2x32xf32>,
    %130 = vector.extract_strided_slice %29 {offsets = [10, 0], sizes = [2, 128], strides = [1, 1]} : vector<16x128xf32> to vector<2x128xf32>
    %cst_62 = arith.constant dense<0.000000e+00> : vector<2x128xf32>
    %131 = tpu.matmul %128, %30, %cst_62 {dimension_numbers = #tpu.dot_dimension_numbers<[1], [0], [0], [1], [0, 0, 1, 1], [], []>, precision = #tpu.contract_precision<fp32>} : vector<2x32xf32>, vector<32x128xf32>, vector<2x128xf32> -> vector<2x128xf32>
    %132 = arith.addf %130, %131 : vector<2x128xf32>
    %133 = arith.negf %132 : vector<2x128xf32>
    %134 = math.exp %133 : vector<2x128xf32>
    %cst_63 = arith.constant 1.000000e+00 : f32
    %135 = vector.broadcast %cst_63 : f32 to vector<2x128xf32>
    %136 = arith.addf %135, %134 : vector<2x128xf32>
    %137 = arith.divf %135, %136 : vector<2x128xf32>
    %138 = vector.extract_strided_slice %137 {offsets = [0, 0], sizes = [2, 32], strides = [1, 1]} : vector<2x128xf32> to vector<2x32xf32>
    %139 = vector.extract_strided_slice %137 {offsets = [0, 32], sizes = [2, 32], strides = [1, 1]} : vector<2x128xf32> to vector<2x32xf32>
    %140 = vector.extract_strided_slice %137 {offsets = [0, 96], sizes = [2, 32], strides = [1, 1]} : vector<2x128xf32> to vector<2x32xf32>
    %141 = vector.extract_strided_slice %132 {offsets = [0, 64], sizes = [2, 32], strides = [1, 1]} : vector<2x128xf32> to vector<2x32xf32>
    %142 = math.tanh %141 : vector<2x32xf32>
    %143 = arith.mulf %139, %126 : vector<2x32xf32>
    %144 = arith.mulf %138, %142 : vector<2x32xf32>
    %145 = arith.addf %143, %144 : vector<2x32xf32>
    %146 = math.tanh %145 : vector<2x32xf32>
    %147 = arith.mulf %140, %146 : vector<2x32xf32>
    %c10_64 = arith.constant 10 : index
    %c0_65 = arith.constant 0 : index
    %148 = vector.load %arg11[%c10_64, %c0_65] : memref<16x32xf32, #tpu.memory_space<vmem>>, vector<2x32xf32>
    tpu.vector_store %arg11[%c10_64, %c0_65], %147 {strides = array<i32>} : memref<16x32xf32, #tpu.memory_space<vmem>>, vector<2x32xf32>,
    %149 = vector.extract_strided_slice %29 {offsets = [12, 0], sizes = [2, 128], strides = [1, 1]} : vector<16x128xf32> to vector<2x128xf32>
    %cst_66 = arith.constant dense<0.000000e+00> : vector<2x128xf32>
    %150 = tpu.matmul %147, %30, %cst_66 {dimension_numbers = #tpu.dot_dimension_numbers<[1], [0], [0], [1], [0, 0, 1, 1], [], []>, precision = #tpu.contract_precision<fp32>} : vector<2x32xf32>, vector<32x128xf32>, vector<2x128xf32> -> vector<2x128xf32>
    %151 = arith.addf %149, %150 : vector<2x128xf32>
    %152 = arith.negf %151 : vector<2x128xf32>
    %153 = math.exp %152 : vector<2x128xf32>
    %cst_67 = arith.constant 1.000000e+00 : f32
    %154 = vector.broadcast %cst_67 : f32 to vector<2x128xf32>
    %155 = arith.addf %154, %153 : vector<2x128xf32>
    %156 = arith.divf %154, %155 : vector<2x128xf32>
    %157 = vector.extract_strided_slice %156 {offsets = [0, 0], sizes = [2, 32], strides = [1, 1]} : vector<2x128xf32> to vector<2x32xf32>
    %158 = vector.extract_strided_slice %156 {offsets = [0, 32], sizes = [2, 32], strides = [1, 1]} : vector<2x128xf32> to vector<2x32xf32>
    %159 = vector.extract_strided_slice %156 {offsets = [0, 96], sizes = [2, 32], strides = [1, 1]} : vector<2x128xf32> to vector<2x32xf32>
    %160 = vector.extract_strided_slice %151 {offsets = [0, 64], sizes = [2, 32], strides = [1, 1]} : vector<2x128xf32> to vector<2x32xf32>
    %161 = math.tanh %160 : vector<2x32xf32>
    %162 = arith.mulf %158, %145 : vector<2x32xf32>
    %163 = arith.mulf %157, %161 : vector<2x32xf32>
    %164 = arith.addf %162, %163 : vector<2x32xf32>
    %165 = math.tanh %164 : vector<2x32xf32>
    %166 = arith.mulf %159, %165 : vector<2x32xf32>
    %c12_68 = arith.constant 12 : index
    %c0_69 = arith.constant 0 : index
    %167 = vector.load %arg11[%c12_68, %c0_69] : memref<16x32xf32, #tpu.memory_space<vmem>>, vector<2x32xf32>
    tpu.vector_store %arg11[%c12_68, %c0_69], %166 {strides = array<i32>} : memref<16x32xf32, #tpu.memory_space<vmem>>, vector<2x32xf32>,
    %168 = vector.extract_strided_slice %29 {offsets = [14, 0], sizes = [2, 128], strides = [1, 1]} : vector<16x128xf32> to vector<2x128xf32>
    %cst_70 = arith.constant dense<0.000000e+00> : vector<2x128xf32>
    %169 = tpu.matmul %166, %30, %cst_70 {dimension_numbers = #tpu.dot_dimension_numbers<[1], [0], [0], [1], [0, 0, 1, 1], [], []>, precision = #tpu.contract_precision<fp32>} : vector<2x32xf32>, vector<32x128xf32>, vector<2x128xf32> -> vector<2x128xf32>
    %170 = arith.addf %168, %169 : vector<2x128xf32>
    %171 = arith.negf %170 : vector<2x128xf32>
    %172 = math.exp %171 : vector<2x128xf32>
    %cst_71 = arith.constant 1.000000e+00 : f32
    %173 = vector.broadcast %cst_71 : f32 to vector<2x128xf32>
    %174 = arith.addf %173, %172 : vector<2x128xf32>
    %175 = arith.divf %173, %174 : vector<2x128xf32>
    %176 = vector.extract_strided_slice %175 {offsets = [0, 0], sizes = [2, 32], strides = [1, 1]} : vector<2x128xf32> to vector<2x32xf32>
    %177 = vector.extract_strided_slice %175 {offsets = [0, 32], sizes = [2, 32], strides = [1, 1]} : vector<2x128xf32> to vector<2x32xf32>
    %178 = vector.extract_strided_slice %175 {offsets = [0, 96], sizes = [2, 32], strides = [1, 1]} : vector<2x128xf32> to vector<2x32xf32>
    %179 = vector.extract_strided_slice %170 {offsets = [0, 64], sizes = [2, 32], strides = [1, 1]} : vector<2x128xf32> to vector<2x32xf32>
    %180 = math.tanh %179 : vector<2x32xf32>
    %181 = arith.mulf %177, %164 : vector<2x32xf32>
    %182 = arith.mulf %176, %180 : vector<2x32xf32>
    %183 = arith.addf %181, %182 : vector<2x32xf32>
    %184 = math.tanh %183 : vector<2x32xf32>
    %185 = arith.mulf %178, %184 : vector<2x32xf32>
    %c14_72 = arith.constant 14 : index
    %c0_73 = arith.constant 0 : index
    %186 = vector.load %arg11[%c14_72, %c0_73] : memref<16x32xf32, #tpu.memory_space<vmem>>, vector<2x32xf32>
    tpu.vector_store %arg11[%c14_72, %c0_73], %185 {strides = array<i32>} : memref<16x32xf32, #tpu.memory_space<vmem>>, vector<2x32xf32>,
    %c0_74 = arith.constant 0 : index
    %c0_75 = arith.constant 0 : index
    %187 = vector.load %arg11[%c0_74, %c0_75] : memref<16x32xf32, #tpu.memory_space<vmem>>, vector<16x32xf32>
    %c0_76 = arith.constant 0 : index
    %c0_77 = arith.constant 0 : index
    %188 = vector.load %arg6[%c0_76, %c0_77] : memref<32x128xf32, #tpu.memory_space<vmem>>, vector<32x128xf32>
    %cst_78 = arith.constant dense<0.000000e+00> : vector<16x128xf32>
    %189 = tpu.matmul %187, %188, %cst_78 {dimension_numbers = #tpu.dot_dimension_numbers<[1], [0], [0], [1], [0, 0, 1, 1], [], []>, precision = #tpu.contract_precision<fp32>} : vector<16x32xf32>, vector<32x128xf32>, vector<16x128xf32> -> vector<16x128xf32>
    %c0_79 = arith.constant 0 : index
    %c0_80 = arith.constant 0 : index
    %190 = vector.load %arg8[%c0_79, %c0_80] : memref<1x128xf32, #tpu.memory_space<vmem>>, vector<1x128xf32>
    %191 = vector.broadcast %190 : vector<1x128xf32> to vector<16x128xf32>
    %192 = arith.addf %189, %191 : vector<16x128xf32>
    %c0_81 = arith.constant 0 : index
    %c0_82 = arith.constant 0 : index
    %193 = vector.load %arg7[%c0_81, %c0_82] : memref<32x128xf32, #tpu.memory_space<vmem>>, vector<32x128xf32>
    %c1_83 = arith.constant 1 : index
    %c0_84 = arith.constant 0 : index
    %c0_85 = arith.constant 0 : index
    %194 = vector.load %arg1[%c1_83, %c0_84, %c0_85] : memref<2x2x32xf32, #tpu.memory_space<vmem>>, vector<1x2x32xf32>
    %195 = vector.shape_cast %194 : vector<1x2x32xf32> to vector<2x32xf32>
    %c1_86 = arith.constant 1 : index
    %c0_87 = arith.constant 0 : index
    %c0_88 = arith.constant 0 : index
    %196 = vector.load %arg2[%c1_86, %c0_87, %c0_88] : memref<2x2x32xf32, #tpu.memory_space<vmem>>, vector<1x2x32xf32>
    %197 = vector.shape_cast %196 : vector<1x2x32xf32> to vector<2x32xf32>
    %198 = vector.extract_strided_slice %192 {offsets = [0, 0], sizes = [2, 128], strides = [1, 1]} : vector<16x128xf32> to vector<2x128xf32>
    %cst_89 = arith.constant dense<0.000000e+00> : vector<2x128xf32>
    %199 = tpu.matmul %195, %193, %cst_89 {dimension_numbers = #tpu.dot_dimension_numbers<[1], [0], [0], [1], [0, 0, 1, 1], [], []>, precision = #tpu.contract_precision<fp32>} : vector<2x32xf32>, vector<32x128xf32>, vector<2x128xf32> -> vector<2x128xf32>
    %200 = arith.addf %198, %199 : vector<2x128xf32>
    %201 = arith.negf %200 : vector<2x128xf32>
    %202 = math.exp %201 : vector<2x128xf32>
    %cst_90 = arith.constant 1.000000e+00 : f32
    %203 = vector.broadcast %cst_90 : f32 to vector<2x128xf32>
    %204 = arith.addf %203, %202 : vector<2x128xf32>
    %205 = arith.divf %203, %204 : vector<2x128xf32>
    %206 = vector.extract_strided_slice %205 {offsets = [0, 0], sizes = [2, 32], strides = [1, 1]} : vector<2x128xf32> to vector<2x32xf32>
    %207 = vector.extract_strided_slice %205 {offsets = [0, 32], sizes = [2, 32], strides = [1, 1]} : vector<2x128xf32> to vector<2x32xf32>
    %208 = vector.extract_strided_slice %205 {offsets = [0, 96], sizes = [2, 32], strides = [1, 1]} : vector<2x128xf32> to vector<2x32xf32>
    %209 = vector.extract_strided_slice %200 {offsets = [0, 64], sizes = [2, 32], strides = [1, 1]} : vector<2x128xf32> to vector<2x32xf32>
    %210 = math.tanh %209 : vector<2x32xf32>
    %211 = arith.mulf %207, %197 : vector<2x32xf32>
    %212 = arith.mulf %206, %210 : vector<2x32xf32>
    %213 = arith.addf %211, %212 : vector<2x32xf32>
    %214 = math.tanh %213 : vector<2x32xf32>
    %215 = arith.mulf %208, %214 : vector<2x32xf32>
    %c0_91 = arith.constant 0 : index
    %c7_92 = arith.constant 7 : index
    %c0_93 = arith.constant 0 : index
    %216 = vector.load %arg9[%c0_91, %c7_92, %c0_93] : memref<2x8x32xf32, #tpu.memory_space<vmem>>, vector<2x1x32xf32>
    %217 = vector.shape_cast %216 : vector<2x1x32xf32> to vector<2x32xf32>
    %218 = vector.shape_cast %215 : vector<2x32xf32> to vector<2x1x32xf32>
    tpu.vector_store %arg9[%c0_91, %c7_92, %c0_93], %218 {strides = array<i32>} : memref<2x8x32xf32, #tpu.memory_space<vmem>>, vector<2x1x32xf32>,
    %219 = vector.extract_strided_slice %192 {offsets = [2, 0], sizes = [2, 128], strides = [1, 1]} : vector<16x128xf32> to vector<2x128xf32>
    %cst_94 = arith.constant dense<0.000000e+00> : vector<2x128xf32>
    %220 = tpu.matmul %215, %193, %cst_94 {dimension_numbers = #tpu.dot_dimension_numbers<[1], [0], [0], [1], [0, 0, 1, 1], [], []>, precision = #tpu.contract_precision<fp32>} : vector<2x32xf32>, vector<32x128xf32>, vector<2x128xf32> -> vector<2x128xf32>
    %221 = arith.addf %219, %220 : vector<2x128xf32>
    %222 = arith.negf %221 : vector<2x128xf32>
    %223 = math.exp %222 : vector<2x128xf32>
    %cst_95 = arith.constant 1.000000e+00 : f32
    %224 = vector.broadcast %cst_95 : f32 to vector<2x128xf32>
    %225 = arith.addf %224, %223 : vector<2x128xf32>
    %226 = arith.divf %224, %225 : vector<2x128xf32>
    %227 = vector.extract_strided_slice %226 {offsets = [0, 0], sizes = [2, 32], strides = [1, 1]} : vector<2x128xf32> to vector<2x32xf32>
    %228 = vector.extract_strided_slice %226 {offsets = [0, 32], sizes = [2, 32], strides = [1, 1]} : vector<2x128xf32> to vector<2x32xf32>
    %229 = vector.extract_strided_slice %226 {offsets = [0, 96], sizes = [2, 32], strides = [1, 1]} : vector<2x128xf32> to vector<2x32xf32>
    %230 = vector.extract_strided_slice %221 {offsets = [0, 64], sizes = [2, 32], strides = [1, 1]} : vector<2x128xf32> to vector<2x32xf32>
    %231 = math.tanh %230 : vector<2x32xf32>
    %232 = arith.mulf %228, %213 : vector<2x32xf32>
    %233 = arith.mulf %227, %231 : vector<2x32xf32>
    %234 = arith.addf %232, %233 : vector<2x32xf32>
    %235 = math.tanh %234 : vector<2x32xf32>
    %236 = arith.mulf %229, %235 : vector<2x32xf32>
    %c0_96 = arith.constant 0 : index
    %c6_97 = arith.constant 6 : index
    %c0_98 = arith.constant 0 : index
    %237 = vector.load %arg9[%c0_96, %c6_97, %c0_98] : memref<2x8x32xf32, #tpu.memory_space<vmem>>, vector<2x1x32xf32>
    %238 = vector.shape_cast %237 : vector<2x1x32xf32> to vector<2x32xf32>
    %239 = vector.shape_cast %236 : vector<2x32xf32> to vector<2x1x32xf32>
    tpu.vector_store %arg9[%c0_96, %c6_97, %c0_98], %239 {strides = array<i32>} : memref<2x8x32xf32, #tpu.memory_space<vmem>>, vector<2x1x32xf32>,
    %240 = vector.extract_strided_slice %192 {offsets = [4, 0], sizes = [2, 128], strides = [1, 1]} : vector<16x128xf32> to vector<2x128xf32>
    %cst_99 = arith.constant dense<0.000000e+00> : vector<2x128xf32>
    %241 = tpu.matmul %236, %193, %cst_99 {dimension_numbers = #tpu.dot_dimension_numbers<[1], [0], [0], [1], [0, 0, 1, 1], [], []>, precision = #tpu.contract_precision<fp32>} : vector<2x32xf32>, vector<32x128xf32>, vector<2x128xf32> -> vector<2x128xf32>
    %242 = arith.addf %240, %241 : vector<2x128xf32>
    %243 = arith.negf %242 : vector<2x128xf32>
    %244 = math.exp %243 : vector<2x128xf32>
    %cst_100 = arith.constant 1.000000e+00 : f32
    %245 = vector.broadcast %cst_100 : f32 to vector<2x128xf32>
    %246 = arith.addf %245, %244 : vector<2x128xf32>
    %247 = arith.divf %245, %246 : vector<2x128xf32>
    %248 = vector.extract_strided_slice %247 {offsets = [0, 0], sizes = [2, 32], strides = [1, 1]} : vector<2x128xf32> to vector<2x32xf32>
    %249 = vector.extract_strided_slice %247 {offsets = [0, 32], sizes = [2, 32], strides = [1, 1]} : vector<2x128xf32> to vector<2x32xf32>
    %250 = vector.extract_strided_slice %247 {offsets = [0, 96], sizes = [2, 32], strides = [1, 1]} : vector<2x128xf32> to vector<2x32xf32>
    %251 = vector.extract_strided_slice %242 {offsets = [0, 64], sizes = [2, 32], strides = [1, 1]} : vector<2x128xf32> to vector<2x32xf32>
    %252 = math.tanh %251 : vector<2x32xf32>
    %253 = arith.mulf %249, %234 : vector<2x32xf32>
    %254 = arith.mulf %248, %252 : vector<2x32xf32>
    %255 = arith.addf %253, %254 : vector<2x32xf32>
    %256 = math.tanh %255 : vector<2x32xf32>
    %257 = arith.mulf %250, %256 : vector<2x32xf32>
    %c0_101 = arith.constant 0 : index
    %c5_102 = arith.constant 5 : index
    %c0_103 = arith.constant 0 : index
    %258 = vector.load %arg9[%c0_101, %c5_102, %c0_103] : memref<2x8x32xf32, #tpu.memory_space<vmem>>, vector<2x1x32xf32>
    %259 = vector.shape_cast %258 : vector<2x1x32xf32> to vector<2x32xf32>
    %260 = vector.shape_cast %257 : vector<2x32xf32> to vector<2x1x32xf32>
    tpu.vector_store %arg9[%c0_101, %c5_102, %c0_103], %260 {strides = array<i32>} : memref<2x8x32xf32, #tpu.memory_space<vmem>>, vector<2x1x32xf32>,
    %261 = vector.extract_strided_slice %192 {offsets = [6, 0], sizes = [2, 128], strides = [1, 1]} : vector<16x128xf32> to vector<2x128xf32>
    %cst_104 = arith.constant dense<0.000000e+00> : vector<2x128xf32>
    %262 = tpu.matmul %257, %193, %cst_104 {dimension_numbers = #tpu.dot_dimension_numbers<[1], [0], [0], [1], [0, 0, 1, 1], [], []>, precision = #tpu.contract_precision<fp32>} : vector<2x32xf32>, vector<32x128xf32>, vector<2x128xf32> -> vector<2x128xf32>
    %263 = arith.addf %261, %262 : vector<2x128xf32>
    %264 = arith.negf %263 : vector<2x128xf32>
    %265 = math.exp %264 : vector<2x128xf32>
    %cst_105 = arith.constant 1.000000e+00 : f32
    %266 = vector.broadcast %cst_105 : f32 to vector<2x128xf32>
    %267 = arith.addf %266, %265 : vector<2x128xf32>
    %268 = arith.divf %266, %267 : vector<2x128xf32>
    %269 = vector.extract_strided_slice %268 {offsets = [0, 0], sizes = [2, 32], strides = [1, 1]} : vector<2x128xf32> to vector<2x32xf32>
    %270 = vector.extract_strided_slice %268 {offsets = [0, 32], sizes = [2, 32], strides = [1, 1]} : vector<2x128xf32> to vector<2x32xf32>
    %271 = vector.extract_strided_slice %268 {offsets = [0, 96], sizes = [2, 32], strides = [1, 1]} : vector<2x128xf32> to vector<2x32xf32>
    %272 = vector.extract_strided_slice %263 {offsets = [0, 64], sizes = [2, 32], strides = [1, 1]} : vector<2x128xf32> to vector<2x32xf32>
    %273 = math.tanh %272 : vector<2x32xf32>
    %274 = arith.mulf %270, %255 : vector<2x32xf32>
    %275 = arith.mulf %269, %273 : vector<2x32xf32>
    %276 = arith.addf %274, %275 : vector<2x32xf32>
    %277 = math.tanh %276 : vector<2x32xf32>
    %278 = arith.mulf %271, %277 : vector<2x32xf32>
    %c0_106 = arith.constant 0 : index
    %c4_107 = arith.constant 4 : index
    %c0_108 = arith.constant 0 : index
    %279 = vector.load %arg9[%c0_106, %c4_107, %c0_108] : memref<2x8x32xf32, #tpu.memory_space<vmem>>, vector<2x1x32xf32>
    %280 = vector.shape_cast %279 : vector<2x1x32xf32> to vector<2x32xf32>
    %281 = vector.shape_cast %278 : vector<2x32xf32> to vector<2x1x32xf32>
    tpu.vector_store %arg9[%c0_106, %c4_107, %c0_108], %281 {strides = array<i32>} : memref<2x8x32xf32, #tpu.memory_space<vmem>>, vector<2x1x32xf32>,
    %282 = vector.extract_strided_slice %192 {offsets = [8, 0], sizes = [2, 128], strides = [1, 1]} : vector<16x128xf32> to vector<2x128xf32>
    %cst_109 = arith.constant dense<0.000000e+00> : vector<2x128xf32>
    %283 = tpu.matmul %278, %193, %cst_109 {dimension_numbers = #tpu.dot_dimension_numbers<[1], [0], [0], [1], [0, 0, 1, 1], [], []>, precision = #tpu.contract_precision<fp32>} : vector<2x32xf32>, vector<32x128xf32>, vector<2x128xf32> -> vector<2x128xf32>
    %284 = arith.addf %282, %283 : vector<2x128xf32>
    %285 = arith.negf %284 : vector<2x128xf32>
    %286 = math.exp %285 : vector<2x128xf32>
    %cst_110 = arith.constant 1.000000e+00 : f32
    %287 = vector.broadcast %cst_110 : f32 to vector<2x128xf32>
    %288 = arith.addf %287, %286 : vector<2x128xf32>
    %289 = arith.divf %287, %288 : vector<2x128xf32>
    %290 = vector.extract_strided_slice %289 {offsets = [0, 0], sizes = [2, 32], strides = [1, 1]} : vector<2x128xf32> to vector<2x32xf32>
    %291 = vector.extract_strided_slice %289 {offsets = [0, 32], sizes = [2, 32], strides = [1, 1]} : vector<2x128xf32> to vector<2x32xf32>
    %292 = vector.extract_strided_slice %289 {offsets = [0, 96], sizes = [2, 32], strides = [1, 1]} : vector<2x128xf32> to vector<2x32xf32>
    %293 = vector.extract_strided_slice %284 {offsets = [0, 64], sizes = [2, 32], strides = [1, 1]} : vector<2x128xf32> to vector<2x32xf32>
    %294 = math.tanh %293 : vector<2x32xf32>
    %295 = arith.mulf %291, %276 : vector<2x32xf32>
    %296 = arith.mulf %290, %294 : vector<2x32xf32>
    %297 = arith.addf %295, %296 : vector<2x32xf32>
    %298 = math.tanh %297 : vector<2x32xf32>
    %299 = arith.mulf %292, %298 : vector<2x32xf32>
    %c0_111 = arith.constant 0 : index
    %c3_112 = arith.constant 3 : index
    %c0_113 = arith.constant 0 : index
    %300 = vector.load %arg9[%c0_111, %c3_112, %c0_113] : memref<2x8x32xf32, #tpu.memory_space<vmem>>, vector<2x1x32xf32>
    %301 = vector.shape_cast %300 : vector<2x1x32xf32> to vector<2x32xf32>
    %302 = vector.shape_cast %299 : vector<2x32xf32> to vector<2x1x32xf32>
    tpu.vector_store %arg9[%c0_111, %c3_112, %c0_113], %302 {strides = array<i32>} : memref<2x8x32xf32, #tpu.memory_space<vmem>>, vector<2x1x32xf32>,
    %303 = vector.extract_strided_slice %192 {offsets = [10, 0], sizes = [2, 128], strides = [1, 1]} : vector<16x128xf32> to vector<2x128xf32>
    %cst_114 = arith.constant dense<0.000000e+00> : vector<2x128xf32>
    %304 = tpu.matmul %299, %193, %cst_114 {dimension_numbers = #tpu.dot_dimension_numbers<[1], [0], [0], [1], [0, 0, 1, 1], [], []>, precision = #tpu.contract_precision<fp32>} : vector<2x32xf32>, vector<32x128xf32>, vector<2x128xf32> -> vector<2x128xf32>
    %305 = arith.addf %303, %304 : vector<2x128xf32>
    %306 = arith.negf %305 : vector<2x128xf32>
    %307 = math.exp %306 : vector<2x128xf32>
    %cst_115 = arith.constant 1.000000e+00 : f32
    %308 = vector.broadcast %cst_115 : f32 to vector<2x128xf32>
    %309 = arith.addf %308, %307 : vector<2x128xf32>
    %310 = arith.divf %308, %309 : vector<2x128xf32>
    %311 = vector.extract_strided_slice %310 {offsets = [0, 0], sizes = [2, 32], strides = [1, 1]} : vector<2x128xf32> to vector<2x32xf32>
    %312 = vector.extract_strided_slice %310 {offsets = [0, 32], sizes = [2, 32], strides = [1, 1]} : vector<2x128xf32> to vector<2x32xf32>
    %313 = vector.extract_strided_slice %310 {offsets = [0, 96], sizes = [2, 32], strides = [1, 1]} : vector<2x128xf32> to vector<2x32xf32>
    %314 = vector.extract_strided_slice %305 {offsets = [0, 64], sizes = [2, 32], strides = [1, 1]} : vector<2x128xf32> to vector<2x32xf32>
    %315 = math.tanh %314 : vector<2x32xf32>
    %316 = arith.mulf %312, %297 : vector<2x32xf32>
    %317 = arith.mulf %311, %315 : vector<2x32xf32>
    %318 = arith.addf %316, %317 : vector<2x32xf32>
    %319 = math.tanh %318 : vector<2x32xf32>
    %320 = arith.mulf %313, %319 : vector<2x32xf32>
    %c0_116 = arith.constant 0 : index
    %c2_117 = arith.constant 2 : index
    %c0_118 = arith.constant 0 : index
    %321 = vector.load %arg9[%c0_116, %c2_117, %c0_118] : memref<2x8x32xf32, #tpu.memory_space<vmem>>, vector<2x1x32xf32>
    %322 = vector.shape_cast %321 : vector<2x1x32xf32> to vector<2x32xf32>
    %323 = vector.shape_cast %320 : vector<2x32xf32> to vector<2x1x32xf32>
    tpu.vector_store %arg9[%c0_116, %c2_117, %c0_118], %323 {strides = array<i32>} : memref<2x8x32xf32, #tpu.memory_space<vmem>>, vector<2x1x32xf32>,
    %324 = vector.extract_strided_slice %192 {offsets = [12, 0], sizes = [2, 128], strides = [1, 1]} : vector<16x128xf32> to vector<2x128xf32>
    %cst_119 = arith.constant dense<0.000000e+00> : vector<2x128xf32>
    %325 = tpu.matmul %320, %193, %cst_119 {dimension_numbers = #tpu.dot_dimension_numbers<[1], [0], [0], [1], [0, 0, 1, 1], [], []>, precision = #tpu.contract_precision<fp32>} : vector<2x32xf32>, vector<32x128xf32>, vector<2x128xf32> -> vector<2x128xf32>
    %326 = arith.addf %324, %325 : vector<2x128xf32>
    %327 = arith.negf %326 : vector<2x128xf32>
    %328 = math.exp %327 : vector<2x128xf32>
    %cst_120 = arith.constant 1.000000e+00 : f32
    %329 = vector.broadcast %cst_120 : f32 to vector<2x128xf32>
    %330 = arith.addf %329, %328 : vector<2x128xf32>
    %331 = arith.divf %329, %330 : vector<2x128xf32>
    %332 = vector.extract_strided_slice %331 {offsets = [0, 0], sizes = [2, 32], strides = [1, 1]} : vector<2x128xf32> to vector<2x32xf32>
    %333 = vector.extract_strided_slice %331 {offsets = [0, 32], sizes = [2, 32], strides = [1, 1]} : vector<2x128xf32> to vector<2x32xf32>
    %334 = vector.extract_strided_slice %331 {offsets = [0, 96], sizes = [2, 32], strides = [1, 1]} : vector<2x128xf32> to vector<2x32xf32>
    %335 = vector.extract_strided_slice %326 {offsets = [0, 64], sizes = [2, 32], strides = [1, 1]} : vector<2x128xf32> to vector<2x32xf32>
    %336 = math.tanh %335 : vector<2x32xf32>
    %337 = arith.mulf %333, %318 : vector<2x32xf32>
    %338 = arith.mulf %332, %336 : vector<2x32xf32>
    %339 = arith.addf %337, %338 : vector<2x32xf32>
    %340 = math.tanh %339 : vector<2x32xf32>
    %341 = arith.mulf %334, %340 : vector<2x32xf32>
    %c0_121 = arith.constant 0 : index
    %c1_122 = arith.constant 1 : index
    %c0_123 = arith.constant 0 : index
    %342 = vector.load %arg9[%c0_121, %c1_122, %c0_123] : memref<2x8x32xf32, #tpu.memory_space<vmem>>, vector<2x1x32xf32>
    %343 = vector.shape_cast %342 : vector<2x1x32xf32> to vector<2x32xf32>
    %344 = vector.shape_cast %341 : vector<2x32xf32> to vector<2x1x32xf32>
    tpu.vector_store %arg9[%c0_121, %c1_122, %c0_123], %344 {strides = array<i32>} : memref<2x8x32xf32, #tpu.memory_space<vmem>>, vector<2x1x32xf32>,
    %345 = vector.extract_strided_slice %192 {offsets = [14, 0], sizes = [2, 128], strides = [1, 1]} : vector<16x128xf32> to vector<2x128xf32>
    %cst_124 = arith.constant dense<0.000000e+00> : vector<2x128xf32>
    %346 = tpu.matmul %341, %193, %cst_124 {dimension_numbers = #tpu.dot_dimension_numbers<[1], [0], [0], [1], [0, 0, 1, 1], [], []>, precision = #tpu.contract_precision<fp32>} : vector<2x32xf32>, vector<32x128xf32>, vector<2x128xf32> -> vector<2x128xf32>
    %347 = arith.addf %345, %346 : vector<2x128xf32>
    %348 = arith.negf %347 : vector<2x128xf32>
    %349 = math.exp %348 : vector<2x128xf32>
    %cst_125 = arith.constant 1.000000e+00 : f32
    %350 = vector.broadcast %cst_125 : f32 to vector<2x128xf32>
    %351 = arith.addf %350, %349 : vector<2x128xf32>
    %352 = arith.divf %350, %351 : vector<2x128xf32>
    %353 = vector.extract_strided_slice %352 {offsets = [0, 0], sizes = [2, 32], strides = [1, 1]} : vector<2x128xf32> to vector<2x32xf32>
    %354 = vector.extract_strided_slice %352 {offsets = [0, 32], sizes = [2, 32], strides = [1, 1]} : vector<2x128xf32> to vector<2x32xf32>
    %355 = vector.extract_strided_slice %352 {offsets = [0, 96], sizes = [2, 32], strides = [1, 1]} : vector<2x128xf32> to vector<2x32xf32>
    %356 = vector.extract_strided_slice %347 {offsets = [0, 64], sizes = [2, 32], strides = [1, 1]} : vector<2x128xf32> to vector<2x32xf32>
    %357 = math.tanh %356 : vector<2x32xf32>
    %358 = arith.mulf %354, %339 : vector<2x32xf32>
    %359 = arith.mulf %353, %357 : vector<2x32xf32>
    %360 = arith.addf %358, %359 : vector<2x32xf32>
    %361 = math.tanh %360 : vector<2x32xf32>
    %362 = arith.mulf %355, %361 : vector<2x32xf32>
    %c0_126 = arith.constant 0 : index
    %c0_127 = arith.constant 0 : index
    %c0_128 = arith.constant 0 : index
    %363 = vector.load %arg9[%c0_126, %c0_127, %c0_128] : memref<2x8x32xf32, #tpu.memory_space<vmem>>, vector<2x1x32xf32>
    %364 = vector.shape_cast %363 : vector<2x1x32xf32> to vector<2x32xf32>
    %365 = vector.shape_cast %362 : vector<2x32xf32> to vector<2x1x32xf32>
    tpu.vector_store %arg9[%c0_126, %c0_127, %c0_128], %365 {strides = array<i32>} : memref<2x8x32xf32, #tpu.memory_space<vmem>>, vector<2x1x32xf32>,
    return
  }
}

</mosaic_0001>

<bundles_post_ra>
// kernel: decoder_rnn_forward.1
= control target key start
LH: loop header
LB: loop body
LE: loop exit
PB: predicated region body
PF: predicated region fallthrough
CT: control target
= control target key end

     0   :  { %14 = vsyncpa [#allocation5], 0  ;;  %s13922_s0 = inlined_call_operand.vmem [shape: f32[2,8,4], index: 0, kind: input, shape index: {}]   ;;  %s13923_s1 = inlined_call_operand.hbm [shape: f32[2,2,32], index: 1, kind: input, shape index: {}]   ;;  %s13924_s2 = inlined_call_operand.hbm [shape: f32[2,2,32], index: 2, kind: input, shape index: {}]   ;;  %s13925_s3 = inlined_call_operand.hbm [shape: f32[4,128], index: 3, kind: input, shape index: {}]   ;;  %s13926_s4 = inlined_call_operand.vmem [shape: f32[32,128], index: 4, kind: input, shape index: {}]   ;;  %s13927_s5 = inlined_call_operand.vmem [shape: f32[1,128], index: 5, kind: input, shape index: {}]   ;;  %s13928_s6 = inlined_call_operand.vmem [shape: f32[32,128], index: 6, kind: input, shape index: {}]   ;;  %s13929_s7 = inlined_call_operand.hbm [shape: f32[32,128], index: 7, kind: input, shape index: {}]   ;;  %s13930_s8 = inlined_call_operand.vmem [shape: f32[1,128], index: 8, kind: input, shape index: {}]   ;;  %s13931_s9 = inlined_call_operand.hbm [shape: f32[2,8,32], index: 9, kind: output, shape index: {}]  }
   0x1   :  { %15 = vsyncpa [#allocation8], 0 }
   0x2   :  { %16 = vsyncpa [#allocation11], 0 }
   0x3   :  { %17 = vsyncpa [#allocation6], 0  ;;  %s12658_s30 = smov [#allocation7]   ;;  %s12659_s11 = smov [#allocation4]  }
   0x4   :  { %s37_s10 = sshll.u32 %s12658_s30, 4  ;;  %s25_s12 = sshll.u32 %s12659_s11, 4  ;;  %s38_s10 = int_to_ptr.vmem [resolvable:$true] %s37_s10  ;;  %s12722_s12 = int_to_ptr.vmem [resolvable:$true] %s25_s12 }
   0x5   :  { %s12540_s15 = scalar_lea.hbm %s13924_s2, 64 }
   0x6   :  { %p12541_p0 = scmp.ne.s32.totalorder %s13924_s2, %s12540_s15  ;;  %p12544_p1 = scmp.lt.u32.totalorder %s12540_s15, %s13924_s2 }
   0x8   :  { %p12546_p2 = pnand %p12544_p1, %p12541_p0 }
   0xa   :  { %12549 = shalt.err (!%p12546_p2)
}
   0xb   :  { %s12550_s20 = scalar_lea.vmem %s38_s10, 64  ;;  %p12555_p4 = scmp.lt.s32.totalorder %s38_s10, %s38_s10 }
   0xc   :  { %p12551_p3 = scmp.ne.s32.totalorder %s38_s10, %s12550_s20  ;;  %p12556_p5 = scmp.lt.s32.totalorder %s12550_s20, %s12550_s20 }
   0xe   :  { %p12557_p6 = por %p12556_p5, %p12555_p4 }
  0x10   :  { %p12558_p7 = pnand %p12557_p6, %p12551_p3 }
  0x12   :  { %12561 = shalt.err (!%p12558_p7)
}
  0x13   :  { %s12660_s21 = smov 32   ;;  %s12661_s22 = smov 2  }
  0x14   :  { %43 = dma.hbm_to_vmem [thread:$0]  %s13924_s2, 64, %s38_s10, [#allocation8], %s12660_s21, %s12660_s21, %s12661_s22  }
  0x15   :  { %s12562_s27 = scalar_lea.hbm %s13923_s1, 64 }
  0x16   :  { %p12563_p8 = scmp.ne.s32.totalorder %s13923_s1, %s12562_s27  ;;  %p12566_p9 = scmp.lt.u32.totalorder %s12562_s27, %s13923_s1 }
  0x18   :  { %p12568_p10 = pnand %p12566_p9, %p12563_p8 }
  0x1a   :  { %12571 = shalt.err (!%p12568_p10)
}
  0x1b   :  { %s12572_s13 = scalar_lea.vmem %s12722_s12, 64  ;;  %p12577_p12 = scmp.lt.s32.totalorder %s12722_s12, %s12722_s12 }
  0x1c   :  { %p12573_p11 = scmp.ne.s32.totalorder %s12722_s12, %s12572_s13  ;;  %p12578_p13 = scmp.lt.s32.totalorder %s12572_s13, %s12572_s13 }
  0x1e   :  { %p12579_p0 = por %p12578_p13, %p12577_p12 }
  0x20   :  { %p12580_p1 = pnand %p12579_p0, %p12573_p11 }
  0x22   :  { %12583 = shalt.err (!%p12580_p1)
}
  0x23   :  { %31 = dma.hbm_to_vmem [thread:$0]  %s13923_s1, 64, %s12722_s12, [#allocation5], %s12660_s21, %s12660_s21, %s12661_s22  }
  0x24   :  { %s12662_s14 = smov [#allocation9]   ;;  %s12663_s16 = smov [#allocation10]  }
  0x25   :  { %s50_s15 = sshll.u32 %s12662_s14, 4  ;;  %s65_s17 = sshll.u32 %s12663_s16, 4  ;;  %s51_s15 = int_to_ptr.vmem [resolvable:$true] %s50_s15  ;;  %s12757_s17 = int_to_ptr.vmem [resolvable:$true] %s65_s17 }
  0x26   :  { %s12584_s20 = scalar_lea.hbm %s13925_s3, 64 }
  0x27   :  { %p12585_p2 = scmp.ne.s32.totalorder %s13925_s3, %s12584_s20  ;;  %p12588_p3 = scmp.lt.u32.totalorder %s12584_s20, %s13925_s3 }
  0x29   :  { %p12590_p4 = pnand %p12588_p3, %p12585_p2 }
  0x2b   :  { %12593 = shalt.err (!%p12590_p4)
}
  0x2c   :  { %s12594_s1 = scalar_lea.vmem %s51_s15, 64  ;;  %p12599_p6 = scmp.lt.s32.totalorder %s51_s15, %s51_s15 }
  0x2d   :  { %p12595_p5 = scmp.ne.s32.totalorder %s51_s15, %s12594_s1  ;;  %p12600_p7 = scmp.lt.s32.totalorder %s12594_s1, %s12594_s1 }
  0x2f   :  { %p12601_p8 = por %p12600_p7, %p12599_p6 }
  0x31   :  { %p12602_p9 = pnand %p12601_p8, %p12595_p5 }
  0x33   :  { %12605 = shalt.err (!%p12602_p9)
}
  0x34   :  { %53 = dma.hbm_to_vmem [thread:$0]  %s13925_s3, 64, %s51_s15, [#allocation8]  }
  0x35   :  { %s12606_s29 = scalar_lea.hbm %s13929_s7, 512 }
  0x36   :  { %p12607_p10 = scmp.ne.s32.totalorder %s13929_s7, %s12606_s29  ;;  %p12610_p11 = scmp.lt.u32.totalorder %s12606_s29, %s13929_s7 }
  0x38   :  { %p12612_p12 = pnand %p12610_p11, %p12607_p10 }
  0x3a   :  { %12615 = shalt.err (!%p12612_p12)
}
  0x3b   :  { %s12616_s10 = scalar_lea.vmem %s12757_s17, 512  ;;  %p12621_p0 = scmp.lt.s32.totalorder %s12757_s17, %s12757_s17 }
  0x3c   :  { %p12617_p13 = scmp.ne.s32.totalorder %s12757_s17, %s12616_s10  ;;  %p12622_p1 = scmp.lt.s32.totalorder %s12616_s10, %s12616_s10 }
  0x3e   :  { %p12623_p2 = por %p12622_p1, %p12621_p0 }
  0x40   :  { %p12624_p3 = pnand %p12623_p2, %p12617_p13 }
  0x42   :  { %12627 = shalt.err (!%p12624_p3)
}
  0x43   :  { %s12664_s3 = smov 128   ;;  %s12665_s14 = smov 8  }
  0x44   :  { %71 = dma.hbm_to_vmem [thread:$0]  %s13929_s7, 512, %s12757_s17, [#allocation11], %s12664_s3, %s12664_s3, %s12665_s14  }
  0x45   :  { %12650 = dma.done.wait [#allocation5], 64  }
  0x46   :  { %12651 = vsyncadd [#allocation5], 4294967232 }
  0x47   :  { %12652 = dma.done.wait [#allocation8], 128  }
  0x48   :  { %12653 = vsyncadd [#allocation8], 4294967168 }
  0x49   :  { %12654 = dma.done.wait [#allocation11], 512  }
  0x4a   :  { %12655 = vsyncadd [#allocation11], 4294966784  ;;  %vm169_vm0 = vcmask 1043456   ;;  %vm91_vm1 = vcmask 1041409   ;;  %vm94_vm2 = vcmask 25600   ;;  %v12666_v29 = vmov 0.0|0.0  }
  0x4b   :  { %v154_v0 = vld [vmem:[#allocation9] sm:$0xf]  ;;  %v86_v1 = vld [vmem:[%s13922_s0] sm:$0x1]  ;;  %v96_v5 = vld [vmem:[%s13922_s0 + $0x1] sm:$0x1] }
  0x4c   :  { %v87_v2 = vld [vmem:[%s13922_s0 + $0x8] sm:$0x1]  ;;  %v171_v3 = vsel %vm169_vm0, %v154_v0, 0  ;;  %v97_v6 = vld [vmem:[%s13922_s0 + $0x9] sm:$0x1]  ;;  %vm162_vm3 = vcmask 31744  }
  0x4d   :  { %v90_v4 = vrot.slane %v87_v2, 7  ;;  %v12803_v7 = vand.u32 4294901760, %v171_v3  ;;  %v100_v8 = vrot.slane %v97_v6, 7  ;;  %v104_v9 = vld [vmem:[%s13922_s0 + $0x2] sm:$0x1]  ;;  %v663_v43 = vld [vmem:[%s13926_s4 + $0x8] sm:$0xff] }
  0x4e   :  { %v105_v10 = vld [vmem:[%s13922_s0 + $0xa] sm:$0x1]  ;;  %v112_v13 = vld [vmem:[%s13922_s0 + $0x3] sm:$0x1]  ;;  %v113_v14 = vld [vmem:[%s13922_s0 + $0xb] sm:$0x1] }
  0x4f   :  { %v92_v11 = vsel %vm91_vm1, %v90_v4, %v86_v1  ;;  %v108_v12 = vrot.slane %v105_v10, 7  ;;  %v261_v15 = vsub.f32 %v171_v3, %v12803_v7  ;;  %v101_v16 = vsel %vm91_vm1, %v100_v8, %v96_v5  ;;  %v120_v18 = vld [vmem:[%s13922_s0 + $0x4] sm:$0x1]  ;;  %v121_v19 = vld [vmem:[%s13922_s0 + $0xc] sm:$0x1]  ;;  %10478 = vmatprep.subr.mxu1 %v12803_v7  ;;  %v664_v49 = vld [vmem:[%s13926_s4 + $0x10] sm:$0xff] }
  0x50   :  { %95 = vst.msk [vmem:[#allocation2] sm:$0x3] %vm94_vm2, %v92_v11  ;;  %v116_v17 = vrot.slane %v113_v14, 7  ;;  %103 = vst.msk [vmem:[#allocation2 + $0x2] sm:$0x3] %vm94_vm2, %v101_v16  ;;  %v124_v21 = vrot.slane %v121_v19, 7  ;;  %10479 = vmatpush3.msra.mxu1 %v12803_v7 }
  0x51   :  { %v109_v20 = vsel %vm91_vm1, %v108_v12, %v104_v9  ;;  %v128_v22 = vld [vmem:[%s13922_s0 + $0x5] sm:$0x1]  ;;  %v129_v23 = vld [vmem:[%s13922_s0 + $0xd] sm:$0x1]  ;;  %v12837_v24 = vand.u32 4294901760, %v261_v15  ;;  %11654 = vmatprep.subr.bf16.mxu1 %v12666_v29  ;;  %v676_v48 = vand.u32 4294901760, %v663_v43 }
  0x52   :  { %111 = vst.msk [vmem:[#allocation2 + $0x4] sm:$0x3] %vm94_vm2, %v109_v20  ;;  %v117_v25 = vsel %vm91_vm1, %v116_v17, %v112_v13  ;;  %v132_v26 = vrot.slane %v129_v23, 7  ;;  %v136_v27 = vld [vmem:[%s13922_s0 + $0x6] sm:$0x1]  ;;  %v125_v30 = vsel %vm91_vm1, %v124_v21, %v120_v18  ;;  %v665_v51 = vld [vmem:[%s13926_s4 + $0x18] sm:$0xff] }
  0x53   :  { %v137_v28 = vld [vmem:[%s13922_s0 + $0xe] sm:$0x1]  ;;  %119 = vst.msk [vmem:[#allocation2 + $0x6] sm:$0x3] %vm94_vm2, %v117_v25  ;;  %v144_v32 = vld [vmem:[%s13922_s0 + $0x7] sm:$0x1]  ;;  %v263_v34 = vsub.f32 %v261_v15, %v12837_v24  ;;  %v12882_v59 = vsub.f32 %v663_v43, %v676_v48 }
  0x54   :  { %v140_v31 = vrot.slane %v137_v28, 7  ;;  %v145_v33 = vld [vmem:[%s13922_s0 + $0xf] sm:$0x1]  ;;  %127 = vst.msk [vmem:[#allocation2 + $0x8] sm:$0x3] %vm94_vm2, %v125_v30  ;;  %v133_v35 = vsel %vm91_vm1, %v132_v26, %v128_v22  ;;  %v662_v41 = vld [vmem:[%s13926_s4] sm:$0xff] }
  0x55   :  { %v148_v36 = vrot.slane %v145_v33, 7  ;;  %135 = vst.msk [vmem:[#allocation2 + $0xa] sm:$0x3] %vm94_vm2, %v133_v35  ;;  %v264_v38 = vand.u32 4294901760, %v263_v34  ;;  %v673_v45 = vand.u32 4294901760, %v662_v41  ;;  %v679_v54 = vand.u32 4294901760, %v664_v49 }
  0x56   :  { %v141_v37 = vsel %vm91_vm1, %v140_v31, %v136_v27  ;;  %v682_v58 = vand.u32 4294901760, %v665_v51  ;;  %v761_v0 = vand.u32 4294901760, %v12882_v59  ;;  %v666_v8 = vld [vmem:[#allocation4] sm:$0x3]  ;;  %vm668_vm4 = vcmask 261120  }
  0x57   :  { %143 = vst.msk [vmem:[#allocation2 + $0xc] sm:$0x3] %vm94_vm2, %v141_v37  ;;  %v149_v39 = vsel %vm91_vm1, %v148_v36, %v144_v32  ;;  %10483 = vmatprep.subr.mxu0 %v264_v38  ;;  %v12880_v55 = vsub.f32 %v662_v41, %v673_v45  ;;  %v12887_v1 = vsub.f32 %v664_v49, %v679_v54  ;;  %vm12667_vm5 = vmmov 0   ;;  %v9926_v31 = vld [vmem:[%s13927_s5] ss:$0 sm:$0xff]  ;;  %s12669_s5 = smov 64  }
  0x58   :  { %151 = vst.msk [vmem:[#allocation2 + $0xe] sm:$0x3] %vm94_vm2, %v149_v39  ;;  %10484 = vmatpush3.msra.mxu0 %v264_v38  ;;  %v12889_v2 = vsub.f32 %v665_v51, %v682_v58  ;;  %v12668_v10 = vmov 0.0   ;;  %v670_v11 = vsel %vm668_vm4, %v666_v8, 0  ;;  %v12908_v13 = vpack.c.bf16 %v676_v48, %v673_v45 }
  0x59   :  { %10488 = vmatprep.subr.mxu0 %v261_v15  ;;  %v754_v62 = vand.u32 4294901760, %v12880_v55  ;;  %v768_v5 = vand.u32 4294901760, %v12887_v1  ;;  %v741_v12 = vand.u32 4294901760, %v670_v11  ;;  %v12915_v14 = vpack.c.bf16 %v682_v58, %v679_v54 }
  0x5a   :  { %v152_v40 = vld [vmem:[#allocation2] sm:$0xff]  ;;  %v775_v6 = vand.u32 4294901760, %v12889_v2  ;;  %v762_v18 = vsub.f32 %v12882_v59, %v761_v0  ;;  %v12943_v28 = vpack.c.bf16 %v12882_v59, %v12880_v55  ;;  %v12949_v30 = vpack.c.bf16 %v12889_v2, %v12887_v1 }
  0x5b   :  { %v164_v42 = vsel %vm162_vm3, %v152_v40, 0  ;;  %v12891_v4 = vpack.c.bf16 %v761_v0, %v754_v62  ;;  %v755_v17 = vsub.f32 %v12880_v55, %v754_v62  ;;  %v667_v59 = vld [vmem:[#allocation7] sm:$0x3]  ;;  %vm1190_vm6 = vcmask 254976  }
  0x5c   :  { %v12870_v44 = vand.u32 4294901760, %v164_v42  ;;  %v12898_v9 = vpack.c.bf16 %v775_v6, %v768_v5  ;;  %v763_v21 = vand.u32 4294901760, %v762_v18  ;;  %v776_v22 = vsub.f32 %v12889_v2, %v775_v6 }
  0x5d   :  { %v756_v20 = vand.u32 4294901760, %v755_v17  ;;  %vm1714_vm7 = vcmask 257026   ;;  %vm2768_vm8 = vcmask 261126   ;;  %vm2241_vm9 = vcmask 259076  }
  0x5e   :  { %10485 = vmatprep.mubr.f32.mxu0 %v12870_v44  ;;  %v240_v47 = vsub.f32 %v164_v42, %v12870_v44  ;;  %v777_v26 = vand.u32 4294901760, %v776_v22  ;;  %vm5977_vm10 = vcmask 253952  }
  0x5f   :  { %v153_v46 = vld [vmem:[#allocation2 + $0x8] sm:$0xff] }
  0x60   :  { %v167_v50 = vsel %vm162_vm3, %v153_v46, 0  ;;  %v241_v53 = vand.u32 4294901760, %v240_v47 }
  0x61   :  { %v249_v52 = vand.u32 4294901760, %v167_v50 }
  0x62   :  { %v242_v57 = vsub.f32 %v240_v47, %v241_v53 }
  0x63   :  { %10486 = vmatmul.mubr.f32.vlgmr.msra.gmra.mrb[0].mxu0 %v249_v52  ;;  %v250_v56 = vsub.f32 %v167_v50, %v249_v52 }
  0x64   :  { %10489 = vmatpush3.msra.mxu0 %v261_v15  ;;  %10490 = vmatprep.mubr.f32.mxu0 %v240_v47  ;;  %v243_v61 = vand.u32 4294901760, %v242_v57  ;;  %v742_v15 = vsub.f32 %v670_v11, %v741_v12 }
  0x65   :  { %10493 = vmatprep.subr.mxu0 %v12803_v7  ;;  %v251_v60 = vand.u32 4294901760, %v250_v56 }
  0x66   :  { %10480 = vmatprep.mubr.f32.mxu1 %v243_v61  ;;  %v743_v16 = vand.u32 4294901760, %v742_v15 }
  0x67   :  { %v252_v63 = vsub.f32 %v250_v56, %v251_v60 }
  0x68   :  { %v744_v19 = vsub.f32 %v742_v15, %v743_v16 }
  0x69   :  { %v253_v3 = vand.u32 4294901760, %v252_v63 }
  0x6a   :  { %v745_v23 = vand.u32 4294901760, %v744_v19 }
  0x6b   :  { %10491 = vmatmul.mubr.f32.vlgmr.msra.gmra.mrb[0].mxu0 %v250_v56  ;;  %10481 = vmatmul.mubr.f32.vlgmr.msra.gmra.mrb[0].mxu1 %v253_v3 }
  0x6c   :  { %10494 = vmatpush3.msra.mxu0 %v12803_v7  ;;  %10495 = vmatprep.mubr.f32.mxu0 %v241_v53 }
  0x6d   :  { %10498 = vmatprep.subr.mxu0 %v12837_v24  ;;  %11656 = vmatpush3.bf16.msra.mxu1 %v12891_v4 }
  0x6e   :  { %11657 = vmatprep.subr.bf16.mxu1 %v12666_v29  ;;  %10560 = vmatprep.mubr.msk.f32.mxu1 %vm12667_vm5, %v12668_v10 }
  0x71   :  { %11659 = vmatpush3.bf16.msra.mxu1 %v12898_v9 }
  0x72   :  { %11666 = vmatprep.subr.bf16.mxu1 %v12666_v29 }
  0x73   :  { %10496 = vmatmul.mubr.f32.vlgmr.msra.gmra.mrb[0].mxu0 %v251_v60 }
  0x74   :  { %10499 = vmatpush3.msra.mxu0 %v12837_v24  ;;  %10500 = vmatprep.mubr.f32.mxu0 %v12870_v44  ;;  %v12931_v24 = vpack.c.bf16 %v763_v21, %v756_v20 }
  0x75   :  { %10503 = vmatprep.subr.mxu0 %v12803_v7  ;;  %10561 = vmatmul.mubr.f32.vlgmr.msra.gmra.mrb[2].mxu1 %v741_v12 }
  0x76   :  { %11668 = vmatpush3.bf16.msra.mxu1 %v12908_v13  ;;  %10582 = vmatprep.mubr.msk.f32.mxu1 %vm12667_vm5, %v12668_v10 }
  0x77   :  { %11669 = vmatprep.subr.bf16.mxu1 %v12666_v29 }
  0x7a   :  { %11671 = vmatpush3.bf16.msra.mxu1 %v12915_v14 }
  0x7b   :  { %10501 = vmatmul.mubr.f32.vlgmr.msra.gmra.mrb[0].mxu0 %v249_v52  ;;  %11672 = vmatprep.subr.bf16.mxu1 %v12666_v29 }
  0x7c   :  { %10504 = vmatpush3.msra.mxu0 %v12803_v7  ;;  %10505 = vmatprep.mubr.f32.mxu0 %v12870_v44  ;;  %v769_v7 = vsub.f32 %v12887_v1, %v768_v5 }
  0x7d   :  { %11630 = vmatprep.subr.bf16.mxu0 %v12666_v29 }
  0x7e   :  { %v770_v25 = vand.u32 4294901760, %v769_v7 }
  0x80   :  { %v12935_v27 = vpack.c.bf16 %v777_v26, %v770_v25 }
  0x83   :  { %10506 = vmatmul.mubr.f32.vlgmr.msra.gmra.mrb[0].mxu0 %v249_v52 }
  0x84   :  { %11632 = vmatpush3.bf16.msra.mxu0 %v12908_v13  ;;  %10516 = vmatprep.mubr.msk.f32.mxu0 %vm12667_vm5, %v12668_v10 }
  0x85   :  { %11633 = vmatprep.subr.bf16.mxu0 %v12666_v29 }
  0x88   :  { %11635 = vmatpush3.bf16.msra.mxu0 %v12915_v14 }
  0x89   :  { %11636 = vmatprep.subr.bf16.mxu0 %v12666_v29 }
  0x8b   :  { %10517 = vmatmul.mubr.f32.vlgmr.msra.gmra.mrb[2].mxu0 %v745_v23 }
  0x8c   :  { %11638 = vmatpush3.bf16.msra.mxu0 %v12931_v24  ;;  %10527 = vmatprep.mubr.msk.f32.mxu0 %vm12667_vm5, %v12668_v10 }
  0x8d   :  { %11639 = vmatprep.subr.bf16.mxu0 %v12666_v29 }
  0x90   :  { %11641 = vmatpush3.bf16.msra.mxu0 %v12935_v27 }
  0x91   :  { %11642 = vmatprep.subr.bf16.mxu0 %v12666_v29 }
  0x93   :  { %10528 = vmatmul.mubr.f32.vlgmr.msra.gmra.mrb[4].mxu0 %v741_v12 }
  0x94   :  { %11644 = vmatpush3.bf16.msra.mxu0 %v12943_v28  ;;  %10538 = vmatprep.mubr.msk.f32.mxu0 %vm12667_vm5, %v12668_v10 }
  0x95   :  { %11645 = vmatprep.subr.bf16.mxu0 %v12666_v29 }
  0x98   :  { %11647 = vmatpush3.bf16.msra.mxu0 %v12949_v30 }
  0x99   :  { %11648 = vmatprep.subr.bf16.mxu0 %v12666_v29 }
  0x9b   :  { %10539 = vmatmul.mubr.f32.vlgmr.msra.gmra.mrb[6].mxu0 %v742_v15 }
  0x9c   :  { %11650 = vmatpush3.bf16.msra.mxu0 %v12908_v13  ;;  %10549 = vmatprep.mubr.msk.f32.mxu0 %vm12667_vm5, %v12668_v10 }
  0x9d   :  { %11651 = vmatprep.subr.bf16.mxu0 %v12666_v29 }
  0xa0   :  { %11653 = vmatpush3.bf16.msra.mxu0 %v12915_v14 }
  0xa1   :  { %11660 = vmatprep.subr.bf16.mxu0 %v12666_v29 }
  0xa3   :  { %10550 = vmatmul.mubr.f32.vlgmr.msra.gmra.mrb[8].mxu0 %v743_v16 }
  0xa4   :  { %11662 = vmatpush3.bf16.msra.mxu0 %v12908_v13  ;;  %10571 = vmatprep.mubr.msk.f32.mxu0 %vm12667_vm5, %v12668_v10 }
  0xa5   :  { %11663 = vmatprep.subr.bf16.mxu0 %v12666_v29 }
  0xa8   :  { %11665 = vmatpush3.bf16.msra.mxu0 %v12915_v14 }
  0xa9   :  { %11702 = vmatprep.subr.bf16.mxu0 %v12666_v29 }
  0xab   :  { %10572 = vmatmul.mubr.f32.vlgmr.msra.gmra.mrb[10].mxu0 %v741_v12 }
  0xac   :  { %11704 = vmatpush3.bf16.msra.mxu0 %v12908_v13  ;;  %10648 = vmatprep.mubr.msk.f32.mxu0 %vm12667_vm5, %v12668_v10 }
  0xad   :  { %11705 = vmatprep.subr.bf16.mxu0 %v12666_v29 }
  0xb0   :  { %11707 = vmatpush3.bf16.msra.mxu0 %v12915_v14 }
  0xb1   :  { %11708 = vmatprep.subr.bf16.mxu0 %v12666_v29 }
 0x13e   :  { %v10482_v32 = vpop.f32.mrb[0].mxu1 }
 0x13f   :  { %v256_v33 = vadd.f32 %v10482_v32, %v9926_v31  ;;  %v245_v34 = vpop.f32.mrb[1].mxu1 }
 0x140   :  { %v246_v37 = vadd.f32 %v9926_v31, %v245_v34 }
 0x148   :  { %v1078_v35 = vpop.f32.mrb[2].mxu1 }
 0x149   :  { %v10562_v36 = vpop.f32.mrb[3].mxu1 }
 0x156   :  { %v10507_v38 = vpop.f32.mrb[0].mxu0 }
 0x157   :  { %v12977_v39 = vadd.f32 %v10507_v38, %v256_v33  ;;  %v652_v40 = vpop.f32.mrb[1].mxu0 }
 0x158   :  { %v12979_v41 = vadd.f32 %v652_v40, %v246_v37 }
 0x15e   :  { %v747_v42 = vpop.f32.mrb[2].mxu0 }
 0x15f   :  { %v10518_v43 = vpop.f32.mrb[3].mxu0 }
 0x166   :  { %v838_v44 = vpop.f32.mrb[4].mxu0 }
 0x167   :  { %v839_v45 = vadd.f32 %v838_v44, %v747_v42  ;;  %v10529_v46 = vpop.f32.mrb[5].mxu0 }
 0x16e   :  { %v918_v47 = vpop.f32.mrb[6].mxu0 }
 0x16f   :  { %v919_v48 = vadd.f32 %v918_v47, %v839_v45  ;;  %v10540_v49 = vpop.f32.mrb[7].mxu0 }
 0x176   :  { %v995_v50 = vpop.f32.mrb[8].mxu0 }
 0x177   :  { %v996_v51 = vadd.f32 %v995_v50, %v919_v48  ;;  %v10551_v52 = vpop.f32.mrb[9].mxu0 }
 0x179   :  { %v1079_v53 = vadd.f32 %v1078_v35, %v996_v51 }
 0x17e   :  { %v1153_v54 = vpop.f32.mrb[10].mxu0 }
 0x17f   :  { %v1154_v55 = vadd.f32 %v1153_v54, %v1079_v53  ;;  %v10573_v56 = vpop.f32.mrb[11].mxu0 }
 0x181   :  { %v1157_v57 = vadd.f32 %v12979_v41, %v1154_v55 }
 0x183   :  { %12412 = vtanh.f32 %v1157_v57  ;;  %v9927_v60 = vmul.f32 -1.442695, %v1157_v57 }
 0x185   :  { %12414 = vpow2.f32 %v9927_v60 }
 0x18d   :  { %v12413_v58 = vpop.eup %12412 }
 0x18e   :  { %1171 = vrot.lane.b32.xlu0 %v12413_v58, %s12669_s5 }
 0x18f   :  { %v12415_v61 = vpop.eup %12414 }
 0x190   :  { %v1161_v62 = vadd.f32 1.0, %v12415_v61 }
 0x192   :  { %1166 = vrot.lane.b32.xlu0 %v667_v59, %s12660_s21  ;;  %12416 = vrcp.f32 %v1161_v62 }
 0x19c   :  { %v12417_v63 = vpop.eup %12416 }
 0x200   :  { %v1172_v0 = vpop.permute.xlu0 %1171 }
 0x201   :  { %v1174_v1 = vmul.f32 %v12417_v63, %v1172_v0 }
 0x203   :  { %1176 = vrot.lane.b32.xlu1 %v1174_v1, %s12660_s21 }
 0x204   :  { %v1167_v2 = vpop.permute.xlu0 %1166 }
 0x205   :  { %v1169_v3 = vmul.f32 %v12417_v63, %v1167_v2 }
 0x275   :  { %v1177_v5 = vpop.permute.xlu1 %1176 }
 0x276   :  { %v12985_v6 = vadd.f32 %v1177_v5, %v1169_v3 }
 0x278   :  { %12418 = vtanh.f32 %v12985_v6  ;;  %v1691_v37 = vrot.slane %v12985_v6, 6 }
 0x282   :  { %v12419_v8 = vpop.eup %12418 }
 0x283   :  { %1182 = vrot.lane.b32.xlu1 %v12419_v8, %s12669_s5 }
 0x2f5   :  { %v1183_v11 = vpop.permute.xlu1 %1182 }
 0x2f6   :  { %v1185_v12 = vmul.f32 %v12417_v63, %v1183_v11 }
 0x2f8   :  { %1187 = vrot.lane.b32.xlu0 %v1185_v12, %s12660_s21 }
 0x36a   :  { %v1188_v15 = vpop.permute.xlu0 %1187 }
 0x36b   :  { %1191 = vst.msk [vmem:[#allocation3] sm:$0x3] %vm1190_vm6, %v1188_v15  ;;  %v1192_v16 = vsel %vm668_vm4, %v1188_v15, 0 }
 0x36c   :  { %v1263_v17 = vand.u32 4294901760, %v1192_v16 }
 0x36e   :  { %v1264_v18 = vsub.f32 %v1192_v16, %v1263_v17 }
 0x370   :  { %v1265_v19 = vand.u32 4294901760, %v1264_v18 }
 0x372   :  { %v1266_v20 = vsub.f32 %v1264_v18, %v1265_v19 }
 0x374   :  { %v1267_v21 = vand.u32 4294901760, %v1266_v20 }
 0x376   :  { %10583 = vmatmul.mubr.f32.vlgmr.msra.gmra.mrb[4].mxu1 %v1267_v21 }
 0x377   :  { %11674 = vmatpush3.bf16.msra.mxu1 %v12931_v24  ;;  %10593 = vmatprep.mubr.msk.f32.mxu1 %vm12667_vm5, %v12668_v10 }
 0x378   :  { %11675 = vmatprep.subr.bf16.mxu1 %v12666_v29 }
 0x37b   :  { %11677 = vmatpush3.bf16.msra.mxu1 %v12935_v27 }
 0x37c   :  { %11678 = vmatprep.subr.bf16.mxu1 %v12666_v29 }
 0x37e   :  { %10594 = vmatmul.mubr.f32.vlgmr.msra.gmra.mrb[4].mxu1 %v1263_v17 }
 0x37f   :  { %11680 = vmatpush3.bf16.msra.mxu1 %v12943_v28  ;;  %10604 = vmatprep.mubr.msk.f32.mxu1 %vm12667_vm5, %v12668_v10 }
 0x380   :  { %11681 = vmatprep.subr.bf16.mxu1 %v12666_v29 }
 0x383   :  { %11683 = vmatpush3.bf16.msra.mxu1 %v12949_v30 }
 0x384   :  { %11684 = vmatprep.subr.bf16.mxu1 %v12666_v29 }
 0x386   :  { %10605 = vmatmul.mubr.f32.vlgmr.msra.gmra.mrb[4].mxu1 %v1264_v18 }
 0x387   :  { %11686 = vmatpush3.bf16.msra.mxu1 %v12908_v13  ;;  %10615 = vmatprep.mubr.msk.f32.mxu1 %vm12667_vm5, %v12668_v10 }
 0x388   :  { %11687 = vmatprep.subr.bf16.mxu1 %v12666_v29 }
 0x38b   :  { %11689 = vmatpush3.bf16.msra.mxu1 %v12915_v14 }
 0x38c   :  { %11690 = vmatprep.subr.bf16.mxu1 %v12666_v29 }
 0x38e   :  { %10616 = vmatmul.mubr.f32.vlgmr.msra.gmra.mrb[4].mxu1 %v1265_v19 }
 0x38f   :  { %11692 = vmatpush3.bf16.msra.mxu1 %v12891_v4  ;;  %10626 = vmatprep.mubr.msk.f32.mxu1 %vm12667_vm5, %v12668_v10 }
 0x390   :  { %11693 = vmatprep.subr.bf16.mxu1 %v12666_v29 }
 0x393   :  { %11695 = vmatpush3.bf16.msra.mxu1 %v12898_v9 }
 0x394   :  { %11696 = vmatprep.subr.bf16.mxu1 %v12666_v29 }
 0x396   :  { %10627 = vmatmul.mubr.f32.vlgmr.msra.gmra.mrb[4].mxu1 %v1263_v17 }
 0x397   :  { %11698 = vmatpush3.bf16.msra.mxu1 %v12908_v13  ;;  %10637 = vmatprep.mubr.msk.f32.mxu1 %vm12667_vm5, %v12668_v10 }
 0x398   :  { %11699 = vmatprep.subr.bf16.mxu1 %v12666_v29 }
 0x39b   :  { %11701 = vmatpush3.bf16.msra.mxu1 %v12915_v14 }
 0x39c   :  { %11738 = vmatprep.subr.bf16.mxu1 %v12666_v29 }
 0x39e   :  { %10638 = vmatmul.mubr.f32.vlgmr.msra.gmra.mrb[4].mxu1 %v1263_v17 }
 0x39f   :  { %11740 = vmatpush3.bf16.msra.mxu1 %v12908_v13  ;;  %10714 = vmatprep.mubr.msk.f32.mxu1 %vm12667_vm5, %v12668_v10 }
 0x3a0   :  { %11741 = vmatprep.subr.bf16.mxu1 %v12666_v29 }
 0x3a3   :  { %11743 = vmatpush3.bf16.msra.mxu1 %v12915_v14 }
 0x3a4   :  { %11744 = vmatprep.subr.bf16.mxu1 %v12666_v29 }
 0x471   :  { %v1675_v7 = vpop.f32.mrb[4].mxu1 }
 0x472   :  { %v1680_v22 = vrot.slane %v1675_v7, 6  ;;  %v10639_v23 = vpop.f32.mrb[5].mxu1 }
 0x474   :  { %v1682_v25 = vadd.f32 %v12979_v41, %v1680_v22 }
 0x476   :  { %12420 = vtanh.f32 %v1682_v25  ;;  %v9928_v31 = vmul.f32 -1.442695, %v1682_v25 }
 0x478   :  { %12422 = vpow2.f32 %v9928_v31 }
 0x480   :  { %v12421_v26 = vpop.eup %12420 }
 0x481   :  { %1695 = vrot.lane.b32.xlu1 %v12421_v26, %s12669_s5 }
 0x482   :  { %v12423_v32 = vpop.eup %12422 }
 0x483   :  { %v1686_v33 = vadd.f32 1.0, %v12423_v32 }
 0x485   :  { %12424 = vrcp.f32 %v1686_v33 }
 0x48f   :  { %v12425_v34 = vpop.eup %12424 }
 0x490   :  { %v1693_v38 = vmul.f32 %v12425_v34, %v1691_v37 }
 0x4f3   :  { %v1696_v35 = vpop.permute.xlu1 %1695 }
 0x4f4   :  { %v1698_v36 = vmul.f32 %v12425_v34, %v1696_v35 }
 0x4f6   :  { %1700 = vrot.lane.b32.xlu0 %v1698_v36, %s12660_s21 }
 0x568   :  { %v1701_v40 = vpop.permute.xlu0 %1700 }
 0x569   :  { %v13032_v42 = vadd.f32 %v1701_v40, %v1693_v38 }
 0x56b   :  { %12426 = vtanh.f32 %v13032_v42  ;;  %v2218_v1 = vrot.slane %v13032_v42, 6 }
 0x575   :  { %v12427_v43 = vpop.eup %12426 }
 0x576   :  { %1706 = vrot.lane.b32.xlu1 %v12427_v43, %s12669_s5 }
 0x5e8   :  { %v1707_v44 = vpop.permute.xlu1 %1706 }
 0x5e9   :  { %v13036_v45 = vmul.f32 %v12425_v34, %v1707_v44 }
 0x5eb   :  { %v1716_v46 = vrot.slane %v13036_v45, 2 }
 0x5ed   :  { %1717 = vrot.lane.b32.xlu0 %v1716_v46, %s12660_s21 }
 0x65f   :  { %v1718_v47 = vpop.permute.xlu0 %1717 }
 0x660   :  { %v1719_v48 = vsel %vm668_vm4, %v1718_v47, 0 }
 0x661   :  { %v1790_v49 = vand.u32 4294901760, %v1719_v48 }
 0x663   :  { %v1791_v50 = vsub.f32 %v1719_v48, %v1790_v49 }
 0x665   :  { %v1792_v51 = vand.u32 4294901760, %v1791_v50 }
 0x667   :  { %v1793_v52 = vsub.f32 %v1791_v50, %v1792_v51 }
 0x669   :  { %v1794_v53 = vand.u32 4294901760, %v1793_v52 }
 0x66b   :  { %10649 = vmatmul.mubr.f32.vlgmr.msra.gmra.mrb[12].mxu0 %v1794_v53 }
 0x66c   :  { %11710 = vmatpush3.bf16.msra.mxu0 %v12931_v24  ;;  %10659 = vmatprep.mubr.msk.f32.mxu0 %vm12667_vm5, %v12668_v10 }
 0x66d   :  { %11711 = vmatprep.subr.bf16.mxu0 %v12666_v29 }
 0x670   :  { %11713 = vmatpush3.bf16.msra.mxu0 %v12935_v27 }
 0x671   :  { %11714 = vmatprep.subr.bf16.mxu0 %v12666_v29 }
 0x673   :  { %10660 = vmatmul.mubr.f32.vlgmr.msra.gmra.mrb[12].mxu0 %v1790_v49 }
 0x674   :  { %11716 = vmatpush3.bf16.msra.mxu0 %v12943_v28  ;;  %10670 = vmatprep.mubr.msk.f32.mxu0 %vm12667_vm5, %v12668_v10 }
 0x675   :  { %11717 = vmatprep.subr.bf16.mxu0 %v12666_v29 }
 0x678   :  { %11719 = vmatpush3.bf16.msra.mxu0 %v12949_v30 }
 0x679   :  { %11720 = vmatprep.subr.bf16.mxu0 %v12666_v29 }
 0x67b   :  { %10671 = vmatmul.mubr.f32.vlgmr.msra.gmra.mrb[12].mxu0 %v1791_v50 }
 0x67c   :  { %11722 = vmatpush3.bf16.msra.mxu0 %v12908_v13  ;;  %10681 = vmatprep.mubr.msk.f32.mxu0 %vm12667_vm5, %v12668_v10 }
 0x67d   :  { %11723 = vmatprep.subr.bf16.mxu0 %v12666_v29 }
 0x680   :  { %11725 = vmatpush3.bf16.msra.mxu0 %v12915_v14 }
 0x681   :  { %11726 = vmatprep.subr.bf16.mxu0 %v12666_v29 }
 0x683   :  { %10682 = vmatmul.mubr.f32.vlgmr.msra.gmra.mrb[12].mxu0 %v1792_v51 }
 0x684   :  { %11728 = vmatpush3.bf16.msra.mxu0 %v12891_v4  ;;  %10692 = vmatprep.mubr.msk.f32.mxu0 %vm12667_vm5, %v12668_v10 }
 0x685   :  { %11729 = vmatprep.subr.bf16.mxu0 %v12666_v29 }
 0x688   :  { %11731 = vmatpush3.bf16.msra.mxu0 %v12898_v9 }
 0x689   :  { %11732 = vmatprep.subr.bf16.mxu0 %v12666_v29 }
 0x68b   :  { %10693 = vmatmul.mubr.f32.vlgmr.msra.gmra.mrb[12].mxu0 %v1790_v49 }
 0x68c   :  { %11734 = vmatpush3.bf16.msra.mxu0 %v12908_v13  ;;  %10703 = vmatprep.mubr.msk.f32.mxu0 %vm12667_vm5, %v12668_v10 }
 0x68d   :  { %11735 = vmatprep.subr.bf16.mxu0 %v12666_v29 }
 0x690   :  { %11737 = vmatpush3.bf16.msra.mxu0 %v12915_v14 }
 0x691   :  { %11774 = vmatprep.subr.bf16.mxu0 %v12666_v29 }
 0x693   :  { %10704 = vmatmul.mubr.f32.vlgmr.msra.gmra.mrb[12].mxu0 %v1790_v49 }
 0x694   :  { %11776 = vmatpush3.bf16.msra.mxu0 %v12908_v13  ;;  %10780 = vmatprep.mubr.msk.f32.mxu0 %vm12667_vm5, %v12668_v10 }
 0x695   :  { %11777 = vmatprep.subr.bf16.mxu0 %v12666_v29 }
 0x698   :  { %11779 = vmatpush3.bf16.msra.mxu0 %v12915_v14 }
 0x699   :  { %11780 = vmatprep.subr.bf16.mxu0 %v12666_v29 }
 0x766   :  { %v2202_v54 = vpop.f32.mrb[12].mxu0 }
 0x767   :  { %v2207_v55 = vrot.slane %v2202_v54, 4  ;;  %v10705_v56 = vpop.f32.mrb[13].mxu0 }
 0x769   :  { %v2209_v57 = vadd.f32 %v12979_v41, %v2207_v55 }
 0x76b   :  { %12428 = vtanh.f32 %v2209_v57  ;;  %v9929_v59 = vmul.f32 -1.442695, %v2209_v57 }
 0x76d   :  { %12430 = vpow2.f32 %v9929_v59 }
 0x775   :  { %v12429_v58 = vpop.eup %12428 }
 0x776   :  { %2222 = vrot.lane.b32.xlu1 %v12429_v58, %s12669_s5 }
 0x777   :  { %v12431_v60 = vpop.eup %12430 }
 0x778   :  { %v2213_v61 = vadd.f32 1.0, %v12431_v60 }
 0x77a   :  { %12432 = vrcp.f32 %v2213_v61 }
 0x784   :  { %v12433_v62 = vpop.eup %12432 }
 0x785   :  { %v2220_v2 = vmul.f32 %v12433_v62, %v2218_v1 }
 0x7e8   :  { %v2223_v63 = vpop.permute.xlu1 %2222 }
 0x7e9   :  { %v2225_v0 = vmul.f32 %v12433_v62, %v2223_v63 }
 0x7eb   :  { %2227 = vrot.lane.b32.xlu0 %v2225_v0, %s12660_s21 }
 0x85d   :  { %v2228_v3 = vpop.permute.xlu0 %2227 }
 0x85e   :  { %v13081_v5 = vadd.f32 %v2228_v3, %v2220_v2 }
 0x860   :  { %12434 = vtanh.f32 %v13081_v5  ;;  %v2745_v37 = vrot.slane %v13081_v5, 6 }
 0x86a   :  { %v12435_v6 = vpop.eup %12434 }
 0x86b   :  { %2233 = vrot.lane.b32.xlu1 %v12435_v6, %s12669_s5 }
 0x8dd   :  { %v2234_v8 = vpop.permute.xlu1 %2233 }
 0x8de   :  { %v13085_v11 = vmul.f32 %v12433_v62, %v2234_v8 }
 0x8e0   :  { %v2243_v12 = vrot.slane %v13085_v11, 4 }
 0x8e2   :  { %2244 = vrot.lane.b32.xlu0 %v2243_v12, %s12660_s21 }
 0x954   :  { %v2245_v15 = vpop.permute.xlu0 %2244 }
 0x955   :  { %v2246_v16 = vsel %vm668_vm4, %v2245_v15, 0 }
 0x956   :  { %v2317_v17 = vand.u32 4294901760, %v2246_v16 }
 0x958   :  { %v2318_v18 = vsub.f32 %v2246_v16, %v2317_v17 }
 0x95a   :  { %v2319_v19 = vand.u32 4294901760, %v2318_v18 }
 0x95c   :  { %v2320_v20 = vsub.f32 %v2318_v18, %v2319_v19 }
 0x95e   :  { %v2321_v21 = vand.u32 4294901760, %v2320_v20 }
 0x960   :  { %10715 = vmatmul.mubr.f32.vlgmr.msra.gmra.mrb[6].mxu1 %v2321_v21 }
 0x961   :  { %11746 = vmatpush3.bf16.msra.mxu1 %v12931_v24  ;;  %10725 = vmatprep.mubr.msk.f32.mxu1 %vm12667_vm5, %v12668_v10 }
 0x962   :  { %11747 = vmatprep.subr.bf16.mxu1 %v12666_v29 }
 0x965   :  { %11749 = vmatpush3.bf16.msra.mxu1 %v12935_v27 }
 0x966   :  { %11750 = vmatprep.subr.bf16.mxu1 %v12666_v29 }
 0x968   :  { %10726 = vmatmul.mubr.f32.vlgmr.msra.gmra.mrb[6].mxu1 %v2317_v17 }
 0x969   :  { %11752 = vmatpush3.bf16.msra.mxu1 %v12943_v28  ;;  %10736 = vmatprep.mubr.msk.f32.mxu1 %vm12667_vm5, %v12668_v10 }
 0x96a   :  { %11753 = vmatprep.subr.bf16.mxu1 %v12666_v29 }
 0x96d   :  { %11755 = vmatpush3.bf16.msra.mxu1 %v12949_v30 }
 0x96e   :  { %11756 = vmatprep.subr.bf16.mxu1 %v12666_v29 }
 0x970   :  { %10737 = vmatmul.mubr.f32.vlgmr.msra.gmra.mrb[6].mxu1 %v2318_v18 }
 0x971   :  { %11758 = vmatpush3.bf16.msra.mxu1 %v12908_v13  ;;  %10747 = vmatprep.mubr.msk.f32.mxu1 %vm12667_vm5, %v12668_v10 }
 0x972   :  { %11759 = vmatprep.subr.bf16.mxu1 %v12666_v29 }
 0x975   :  { %11761 = vmatpush3.bf16.msra.mxu1 %v12915_v14 }
 0x976   :  { %11762 = vmatprep.subr.bf16.mxu1 %v12666_v29 }
 0x978   :  { %10748 = vmatmul.mubr.f32.vlgmr.msra.gmra.mrb[6].mxu1 %v2319_v19 }
 0x979   :  { %11764 = vmatpush3.bf16.msra.mxu1 %v12891_v4  ;;  %10758 = vmatprep.mubr.msk.f32.mxu1 %vm12667_vm5, %v12668_v10 }
 0x97a   :  { %11765 = vmatprep.subr.bf16.mxu1 %v12666_v29 }
 0x97d   :  { %11767 = vmatpush3.bf16.msra.mxu1 %v12898_v9 }
 0x97e   :  { %11768 = vmatprep.subr.bf16.mxu1 %v12666_v29 }
 0x980   :  { %10759 = vmatmul.mubr.f32.vlgmr.msra.gmra.mrb[6].mxu1 %v2317_v17 }
 0x981   :  { %11770 = vmatpush3.bf16.msra.mxu1 %v12908_v13  ;;  %10769 = vmatprep.mubr.msk.f32.mxu1 %vm12667_vm5, %v12668_v10 }
 0x982   :  { %11771 = vmatprep.subr.bf16.mxu1 %v12666_v29 }
 0x985   :  { %11773 = vmatpush3.bf16.msra.mxu1 %v12915_v14 }
 0x986   :  { %11810 = vmatprep.subr.bf16.mxu1 %v12666_v29 }
 0x988   :  { %10770 = vmatmul.mubr.f32.vlgmr.msra.gmra.mrb[6].mxu1 %v2317_v17 }
 0x989   :  { %11812 = vmatpush3.bf16.msra.mxu1 %v12908_v13  ;;  %10846 = vmatprep.mubr.msk.f32.mxu1 %vm12667_vm5, %v12668_v10 }
 0x98a   :  { %11813 = vmatprep.subr.bf16.mxu1 %v12666_v29 }
 0x98d   :  { %11815 = vmatpush3.bf16.msra.mxu1 %v12915_v14 }
 0x98e   :  { %11816 = vmatprep.subr.bf16.mxu1 %v12666_v29 }
 0xa5b   :  { %v2729_v7 = vpop.f32.mrb[6].mxu1 }
 0xa5c   :  { %v2734_v22 = vrot.slane %v2729_v7, 2  ;;  %v10771_v23 = vpop.f32.mrb[7].mxu1 }
 0xa5e   :  { %v2736_v25 = vadd.f32 %v12979_v41, %v2734_v22 }
 0xa60   :  { %12436 = vtanh.f32 %v2736_v25  ;;  %v9930_v31 = vmul.f32 -1.442695, %v2736_v25 }
 0xa62   :  { %12438 = vpow2.f32 %v9930_v31 }
 0xa6a   :  { %v12437_v26 = vpop.eup %12436 }
 0xa6b   :  { %2749 = vrot.lane.b32.xlu1 %v12437_v26, %s12669_s5 }
 0xa6c   :  { %v12439_v32 = vpop.eup %12438 }
 0xa6d   :  { %v2740_v33 = vadd.f32 1.0, %v12439_v32 }
 0xa6f   :  { %12440 = vrcp.f32 %v2740_v33 }
 0xa79   :  { %v12441_v34 = vpop.eup %12440 }
 0xa7a   :  { %v2747_v38 = vmul.f32 %v12441_v34, %v2745_v37 }
 0xadd   :  { %v2750_v35 = vpop.permute.xlu1 %2749 }
 0xade   :  { %v2752_v36 = vmul.f32 %v12441_v34, %v2750_v35 }
 0xae0   :  { %2754 = vrot.lane.b32.xlu0 %v2752_v36, %s12660_s21 }
 0xb52   :  { %v2755_v40 = vpop.permute.xlu0 %2754 }
 0xb53   :  { %v13130_v42 = vadd.f32 %v2755_v40, %v2747_v38 }
 0xb55   :  { %12442 = vtanh.f32 %v13130_v42  ;;  %v3269_v7 = vrot.slane %v13130_v42, 6 }
 0xb5f   :  { %v12443_v41 = vpop.eup %12442 }
 0xb60   :  { %2760 = vrot.lane.b32.xlu1 %v12443_v41, %s12669_s5 }
 0xbd2   :  { %v2761_v43 = vpop.permute.xlu1 %2760 }
 0xbd3   :  { %v13134_v44 = vmul.f32 %v12441_v34, %v2761_v43 }
 0xbd5   :  { %v2770_v46 = vrot.slane %v13134_v44, 6 }
 0xbd7   :  { %2771 = vrot.lane.b32.xlu0 %v2770_v46, %s12660_s21 }
 0xc49   :  { %v2772_v47 = vpop.permute.xlu0 %2771 }
 0xc4a   :  { %v2773_v48 = vsel %vm668_vm4, %v2772_v47, 0 }
 0xc4b   :  { %v2844_v49 = vand.u32 4294901760, %v2773_v48 }
 0xc4d   :  { %v2845_v50 = vsub.f32 %v2773_v48, %v2844_v49 }
 0xc4f   :  { %v2846_v51 = vand.u32 4294901760, %v2845_v50 }
 0xc51   :  { %v2847_v52 = vsub.f32 %v2845_v50, %v2846_v51 }
 0xc53   :  { %v2848_v53 = vand.u32 4294901760, %v2847_v52 }
 0xc55   :  { %10781 = vmatmul.mubr.f32.vlgmr.msra.gmra.mrb[14].mxu0 %v2848_v53 }
 0xc56   :  { %11782 = vmatpush3.bf16.msra.mxu0 %v12931_v24  ;;  %10791 = vmatprep.mubr.msk.f32.mxu0 %vm12667_vm5, %v12668_v10 }
 0xc57   :  { %11783 = vmatprep.subr.bf16.mxu0 %v12666_v29 }
 0xc5a   :  { %11785 = vmatpush3.bf16.msra.mxu0 %v12935_v27 }
 0xc5b   :  { %11786 = vmatprep.subr.bf16.mxu0 %v12666_v29 }
 0xc5d   :  { %10792 = vmatmul.mubr.f32.vlgmr.msra.gmra.mrb[16].mxu0 %v2844_v49 }
 0xc5e   :  { %11788 = vmatpush3.bf16.msra.mxu0 %v12943_v28  ;;  %10802 = vmatprep.mubr.msk.f32.mxu0 %vm12667_vm5, %v12668_v10 }
 0xc5f   :  { %11789 = vmatprep.subr.bf16.mxu0 %v12666_v29 }
 0xc62   :  { %11791 = vmatpush3.bf16.msra.mxu0 %v12949_v30 }
 0xc63   :  { %11792 = vmatprep.subr.bf16.mxu0 %v12666_v29 }
 0xc65   :  { %10803 = vmatmul.mubr.f32.vlgmr.msra.gmra.mrb[18].mxu0 %v2845_v50 }
 0xc66   :  { %11794 = vmatpush3.bf16.msra.mxu0 %v12908_v13  ;;  %10813 = vmatprep.mubr.msk.f32.mxu0 %vm12667_vm5, %v12668_v10 }
 0xc67   :  { %11795 = vmatprep.subr.bf16.mxu0 %v12666_v29 }
 0xc6a   :  { %11797 = vmatpush3.bf16.msra.mxu0 %v12915_v14 }
 0xc6b   :  { %11798 = vmatprep.subr.bf16.mxu0 %v12666_v29 }
 0xc6d   :  { %10814 = vmatmul.mubr.f32.vlgmr.msra.gmra.mrb[20].mxu0 %v2846_v51 }
 0xc6e   :  { %11800 = vmatpush3.bf16.msra.mxu0 %v12891_v4  ;;  %10824 = vmatprep.mubr.msk.f32.mxu0 %vm12667_vm5, %v12668_v10 }
 0xc6f   :  { %11801 = vmatprep.subr.bf16.mxu0 %v12666_v29 }
 0xc72   :  { %11803 = vmatpush3.bf16.msra.mxu0 %v12898_v9 }
 0xc73   :  { %11804 = vmatprep.subr.bf16.mxu0 %v12666_v29 }
 0xc75   :  { %10825 = vmatmul.mubr.f32.vlgmr.msra.gmra.mrb[22].mxu0 %v2844_v49 }
 0xc76   :  { %11806 = vmatpush3.bf16.msra.mxu0 %v12908_v13  ;;  %10835 = vmatprep.mubr.msk.f32.mxu0 %vm12667_vm5, %v12668_v10 }
 0xc77   :  { %11807 = vmatprep.subr.bf16.mxu0 %v12666_v29 }
 0xc7a   :  { %11809 = vmatpush3.bf16.msra.mxu0 %v12915_v14 }
 0xc7b   :  { %11846 = vmatprep.subr.bf16.mxu0 %v12666_v29 }
 0xc7d   :  { %10836 = vmatmul.mubr.f32.vlgmr.msra.gmra.mrb[24].mxu0 %v2844_v49 }
 0xc7e   :  { %11848 = vmatpush3.bf16.msra.mxu0 %v12908_v13  ;;  %10912 = vmatprep.mubr.msk.f32.mxu0 %vm12667_vm5, %v12668_v10 }
 0xc7f   :  { %11849 = vmatprep.subr.bf16.mxu0 %v12666_v29 }
 0xc82   :  { %11851 = vmatpush3.bf16.msra.mxu0 %v12915_v14 }
 0xc83   :  { %11852 = vmatprep.subr.bf16.mxu0 %v12666_v29 }
 0xd28   :  { %v2850_v54 = vpop.f32.mrb[14].mxu0 }
 0xd29   :  { %v10782_v55 = vpop.f32.mrb[15].mxu0 }
 0xd30   :  { %v2941_v56 = vpop.f32.mrb[16].mxu0 }
 0xd31   :  { %v2942_v57 = vadd.f32 %v2941_v56, %v2850_v54  ;;  %v10793_v58 = vpop.f32.mrb[17].mxu0 }
 0xd38   :  { %v3021_v59 = vpop.f32.mrb[18].mxu0 }
 0xd39   :  { %v3022_v60 = vadd.f32 %v3021_v59, %v2942_v57  ;;  %v10804_v61 = vpop.f32.mrb[19].mxu0 }
 0xd40   :  { %v3098_v62 = vpop.f32.mrb[20].mxu0 }
 0xd41   :  { %v3099_v63 = vadd.f32 %v3098_v62, %v3022_v60  ;;  %v10815_v0 = vpop.f32.mrb[21].mxu0 }
 0xd48   :  { %v3181_v1 = vpop.f32.mrb[22].mxu0 }
 0xd49   :  { %v3182_v2 = vadd.f32 %v3181_v1, %v3099_v63  ;;  %v10826_v3 = vpop.f32.mrb[23].mxu0 }
 0xd50   :  { %v3256_v5 = vpop.f32.mrb[24].mxu0 }
 0xd51   :  { %v3257_v6 = vadd.f32 %v3256_v5, %v3182_v2  ;;  %v10837_v8 = vpop.f32.mrb[25].mxu0 }
 0xd53   :  { %v3260_v12 = vadd.f32 %v12977_v39, %v3257_v6 }
 0xd55   :  { %12444 = vtanh.f32 %v3260_v12  ;;  %v9931_v16 = vmul.f32 -1.442695, %v3260_v12 }
 0xd57   :  { %12446 = vpow2.f32 %v9931_v16 }
 0xd5f   :  { %v12445_v15 = vpop.eup %12444 }
 0xd60   :  { %3273 = vrot.lane.b32.xlu1 %v12445_v15, %s12669_s5 }
 0xd61   :  { %v12447_v17 = vpop.eup %12446 }
 0xd62   :  { %v3264_v18 = vadd.f32 1.0, %v12447_v17 }
 0xd64   :  { %12448 = vrcp.f32 %v3264_v18 }
 0xd6e   :  { %v12449_v19 = vpop.eup %12448 }
 0xd6f   :  { %v3271_v22 = vmul.f32 %v12449_v19, %v3269_v7 }
 0xdd2   :  { %v3274_v20 = vpop.permute.xlu1 %3273 }
 0xdd3   :  { %v3276_v21 = vmul.f32 %v12449_v19, %v3274_v20 }
 0xdd5   :  { %3278 = vrot.lane.b32.xlu0 %v3276_v21, %s12660_s21 }
 0xe47   :  { %v3279_v23 = vpop.permute.xlu0 %3278 }
 0xe48   :  { %v13179_v25 = vadd.f32 %v3279_v23, %v3271_v22 }
 0xe4a   :  { %12450 = vtanh.f32 %v13179_v25  ;;  %v3792_v54 = vrot.slane %v13179_v25, 6 }
 0xe54   :  { %v12451_v26 = vpop.eup %12450 }
 0xe55   :  { %3284 = vrot.lane.b32.xlu1 %v12451_v26, %s12669_s5 }
 0xec7   :  { %v3285_v31 = vpop.permute.xlu1 %3284 }
 0xec8   :  { %v3287_v32 = vmul.f32 %v12449_v19, %v3285_v31 }
 0xeca   :  { %3289 = vrot.lane.b32.xlu0 %v3287_v32, %s12660_s21 }
 0xf3c   :  { %v3290_v33 = vpop.permute.xlu0 %3289 }
 0xf3d   :  { %3292 = vst.msk [vmem:[#allocation3 + $0x8] sm:$0x3] %vm1190_vm6, %v3290_v33  ;;  %v3293_v34 = vsel %vm668_vm4, %v3290_v33, 0 }
 0xf3e   :  { %v3364_v35 = vand.u32 4294901760, %v3293_v34 }
 0xf40   :  { %v3365_v36 = vsub.f32 %v3293_v34, %v3364_v35 }
 0xf42   :  { %v3366_v37 = vand.u32 4294901760, %v3365_v36 }
 0xf44   :  { %v3367_v38 = vsub.f32 %v3365_v36, %v3366_v37 }
 0xf46   :  { %v3368_v40 = vand.u32 4294901760, %v3367_v38 }
 0xf48   :  { %10847 = vmatmul.mubr.f32.vlgmr.msra.gmra.mrb[8].mxu1 %v3368_v40 }
 0xf49   :  { %11818 = vmatpush3.bf16.msra.mxu1 %v12931_v24  ;;  %10857 = vmatprep.mubr.msk.f32.mxu1 %vm12667_vm5, %v12668_v10 }
 0xf4a   :  { %11819 = vmatprep.subr.bf16.mxu1 %v12666_v29 }
 0xf4d   :  { %11821 = vmatpush3.bf16.msra.mxu1 %v12935_v27 }
 0xf4e   :  { %11822 = vmatprep.subr.bf16.mxu1 %v12666_v29 }
 0xf50   :  { %10858 = vmatmul.mubr.f32.vlgmr.msra.gmra.mrb[8].mxu1 %v3364_v35 }
 0xf51   :  { %11824 = vmatpush3.bf16.msra.mxu1 %v12943_v28  ;;  %10868 = vmatprep.mubr.msk.f32.mxu1 %vm12667_vm5, %v12668_v10 }
 0xf52   :  { %11825 = vmatprep.subr.bf16.mxu1 %v12666_v29 }
 0xf55   :  { %11827 = vmatpush3.bf16.msra.mxu1 %v12949_v30 }
 0xf56   :  { %11828 = vmatprep.subr.bf16.mxu1 %v12666_v29 }
 0xf58   :  { %10869 = vmatmul.mubr.f32.vlgmr.msra.gmra.mrb[8].mxu1 %v3365_v36 }
 0xf59   :  { %11830 = vmatpush3.bf16.msra.mxu1 %v12908_v13  ;;  %10879 = vmatprep.mubr.msk.f32.mxu1 %vm12667_vm5, %v12668_v10 }
 0xf5a   :  { %11831 = vmatprep.subr.bf16.mxu1 %v12666_v29 }
 0xf5d   :  { %11833 = vmatpush3.bf16.msra.mxu1 %v12915_v14 }
 0xf5e   :  { %11834 = vmatprep.subr.bf16.mxu1 %v12666_v29 }
 0xf60   :  { %10880 = vmatmul.mubr.f32.vlgmr.msra.gmra.mrb[8].mxu1 %v3366_v37 }
 0xf61   :  { %11836 = vmatpush3.bf16.msra.mxu1 %v12891_v4  ;;  %10890 = vmatprep.mubr.msk.f32.mxu1 %vm12667_vm5, %v12668_v10 }
 0xf62   :  { %11837 = vmatprep.subr.bf16.mxu1 %v12666_v29 }
 0xf65   :  { %11839 = vmatpush3.bf16.msra.mxu1 %v12898_v9 }
 0xf66   :  { %11840 = vmatprep.subr.bf16.mxu1 %v12666_v29 }
 0xf68   :  { %10891 = vmatmul.mubr.f32.vlgmr.msra.gmra.mrb[8].mxu1 %v3364_v35 }
 0xf69   :  { %11842 = vmatpush3.bf16.msra.mxu1 %v12908_v13  ;;  %10901 = vmatprep.mubr.msk.f32.mxu1 %vm12667_vm5, %v12668_v10 }
 0xf6a   :  { %11843 = vmatprep.subr.bf16.mxu1 %v12666_v29 }
 0xf6d   :  { %11845 = vmatpush3.bf16.msra.mxu1 %v12915_v14 }
 0xf6e   :  { %11882 = vmatprep.subr.bf16.mxu1 %v12666_v29 }
 0xf70   :  { %10902 = vmatmul.mubr.f32.vlgmr.msra.gmra.mrb[8].mxu1 %v3364_v35 }
 0xf71   :  { %11884 = vmatpush3.bf16.msra.mxu1 %v12908_v13  ;;  %10978 = vmatprep.mubr.msk.f32.mxu1 %vm12667_vm5, %v12668_v10 }
 0xf72   :  { %11885 = vmatprep.subr.bf16.mxu1 %v12666_v29 }
 0xf75   :  { %11887 = vmatpush3.bf16.msra.mxu1 %v12915_v14 }
 0xf76   :  { %11888 = vmatprep.subr.bf16.mxu1 %v12666_v29 }
0x1043   :  { %v3776_v42 = vpop.f32.mrb[8].mxu1 }
0x1044   :  { %v3781_v41 = vrot.slane %v3776_v42, 6  ;;  %v10903_v43 = vpop.f32.mrb[9].mxu1 }
0x1046   :  { %v3783_v46 = vadd.f32 %v12977_v39, %v3781_v41 }
0x1048   :  { %12452 = vtanh.f32 %v3783_v46  ;;  %v9932_v48 = vmul.f32 -1.442695, %v3783_v46 }
0x104a   :  { %12454 = vpow2.f32 %v9932_v48 }
0x1052   :  { %v12453_v47 = vpop.eup %12452 }
0x1053   :  { %3796 = vrot.lane.b32.xlu1 %v12453_v47, %s12669_s5 }
0x1054   :  { %v12455_v49 = vpop.eup %12454 }
0x1055   :  { %v3787_v50 = vadd.f32 1.0, %v12455_v49 }
0x1057   :  { %12456 = vrcp.f32 %v3787_v50 }
0x1061   :  { %v12457_v51 = vpop.eup %12456 }
0x1062   :  { %v3794_v55 = vmul.f32 %v12457_v51, %v3792_v54  ;;  %v4871_v54 = vld [vmem:[%s13928_s6 + $0x8] sm:$0xff] }
0x10c5   :  { %v3797_v52 = vpop.permute.xlu1 %3796 }
0x10c6   :  { %v3799_v53 = vmul.f32 %v12457_v51, %v3797_v52 }
0x10c8   :  { %3801 = vrot.lane.b32.xlu0 %v3799_v53, %s12660_s21 }
0x113a   :  { %v3802_v56 = vpop.permute.xlu0 %3801 }
0x113b   :  { %v13226_v57 = vadd.f32 %v3802_v56, %v3794_v55  ;;  %v4872_v55 = vld [vmem:[%s13928_s6 + $0x10] sm:$0xff] }
0x113d   :  { %12458 = vtanh.f32 %v13226_v57  ;;  %v4318_v22 = vrot.slane %v13226_v57, 6  ;;  %v4891_v57 = vand.u32 4294901760, %v4871_v54 }
0x1147   :  { %v12459_v58 = vpop.eup %12458 }
0x1148   :  { %3807 = vrot.lane.b32.xlu1 %v12459_v58, %s12669_s5  ;;  %v4894_v58 = vand.u32 4294901760, %v4872_v55 }
0x11ba   :  { %v3808_v59 = vpop.permute.xlu1 %3807 }
0x11bb   :  { %v13230_v60 = vmul.f32 %v12457_v51, %v3808_v59 }
0x11bd   :  { %v3816_v61 = vrot.slane %v13230_v60, 2 }
0x11bf   :  { %3817 = vrot.lane.b32.xlu0 %v3816_v61, %s12660_s21 }
0x1231   :  { %v3818_v62 = vpop.permute.xlu0 %3817 }
0x1232   :  { %v3819_v63 = vsel %vm668_vm4, %v3818_v62, 0  ;;  %v4985_v62 = vsub.f32 %v4871_v54, %v4891_v57 }
0x1233   :  { %v3890_v0 = vand.u32 4294901760, %v3819_v63 }
0x1235   :  { %v3891_v1 = vsub.f32 %v3819_v63, %v3890_v0 }
0x1237   :  { %v3892_v2 = vand.u32 4294901760, %v3891_v1 }
0x1239   :  { %v3893_v3 = vsub.f32 %v3891_v1, %v3892_v2 }
0x123b   :  { %v3894_v5 = vand.u32 4294901760, %v3893_v3 }
0x123d   :  { %10913 = vmatmul.mubr.f32.vlgmr.msra.gmra.mrb[26].mxu0 %v3894_v5 }
0x123e   :  { %11854 = vmatpush3.bf16.msra.mxu0 %v12931_v24  ;;  %10923 = vmatprep.mubr.msk.f32.mxu0 %vm12667_vm5, %v12668_v10 }
0x123f   :  { %11855 = vmatprep.subr.bf16.mxu0 %v12666_v29 }
0x1242   :  { %11857 = vmatpush3.bf16.msra.mxu0 %v12935_v27 }
0x1243   :  { %11858 = vmatprep.subr.bf16.mxu0 %v12666_v29 }
0x1245   :  { %10924 = vmatmul.mubr.f32.vlgmr.msra.gmra.mrb[26].mxu0 %v3890_v0 }
0x1246   :  { %11860 = vmatpush3.bf16.msra.mxu0 %v12943_v28  ;;  %10934 = vmatprep.mubr.msk.f32.mxu0 %vm12667_vm5, %v12668_v10 }
0x1247   :  { %11861 = vmatprep.subr.bf16.mxu0 %v12666_v29 }
0x124a   :  { %11863 = vmatpush3.bf16.msra.mxu0 %v12949_v30 }
0x124b   :  { %11864 = vmatprep.subr.bf16.mxu0 %v12666_v29 }
0x124d   :  { %10935 = vmatmul.mubr.f32.vlgmr.msra.gmra.mrb[26].mxu0 %v3891_v1  ;;  %v4986_v1 = vand.u32 4294901760, %v4985_v62 }
0x124e   :  { %11866 = vmatpush3.bf16.msra.mxu0 %v12908_v13  ;;  %10945 = vmatprep.mubr.msk.f32.mxu0 %vm12667_vm5, %v12668_v10 }
0x124f   :  { %11867 = vmatprep.subr.bf16.mxu0 %v12666_v29  ;;  %v4987_v3 = vsub.f32 %v4985_v62, %v4986_v1 }
0x1252   :  { %11869 = vmatpush3.bf16.msra.mxu0 %v12915_v14 }
0x1253   :  { %11870 = vmatprep.subr.bf16.mxu0 %v12666_v29 }
0x1255   :  { %10946 = vmatmul.mubr.f32.vlgmr.msra.gmra.mrb[26].mxu0 %v3892_v2 }
0x1256   :  { %11872 = vmatpush3.bf16.msra.mxu0 %v12891_v4  ;;  %10956 = vmatprep.mubr.msk.f32.mxu0 %vm12667_vm5, %v12668_v10 }
0x1257   :  { %11873 = vmatprep.subr.bf16.mxu0 %v12666_v29 }
0x125a   :  { %11875 = vmatpush3.bf16.msra.mxu0 %v12898_v9 }
0x125b   :  { %11876 = vmatprep.subr.bf16.mxu0 %v12666_v29 }
0x125d   :  { %10957 = vmatmul.mubr.f32.vlgmr.msra.gmra.mrb[26].mxu0 %v3890_v0 }
0x125e   :  { %11878 = vmatpush3.bf16.msra.mxu0 %v12908_v13  ;;  %10967 = vmatprep.mubr.msk.f32.mxu0 %vm12667_vm5, %v12668_v10 }
0x125f   :  { %11879 = vmatprep.subr.bf16.mxu0 %v12666_v29 }
0x1262   :  { %11881 = vmatpush3.bf16.msra.mxu0 %v12915_v14 }
0x1265   :  { %10968 = vmatmul.mubr.f32.vlgmr.msra.gmra.mrb[26].mxu0 %v3890_v0 }
0x1338   :  { %v4302_v6 = vpop.f32.mrb[26].mxu0 }
0x1339   :  { %v4307_v8 = vrot.slane %v4302_v6, 4  ;;  %v10969_v12 = vpop.f32.mrb[27].mxu0  ;;  %v4988_v6 = vand.u32 4294901760, %v4987_v3 }
0x133b   :  { %v4309_v15 = vadd.f32 %v12977_v39, %v4307_v8 }
0x133d   :  { %12460 = vtanh.f32 %v4309_v15  ;;  %v9933_v17 = vmul.f32 -1.442695, %v4309_v15 }
0x133f   :  { %12462 = vpow2.f32 %v9933_v17 }
0x1347   :  { %v12461_v16 = vpop.eup %12460 }
0x1348   :  { %4322 = vrot.lane.b32.xlu1 %v12461_v16, %s12669_s5  ;;  %v4992_v16 = vsub.f32 %v4872_v55, %v4894_v58 }
0x1349   :  { %v12463_v18 = vpop.eup %12462 }
0x134a   :  { %v4313_v19 = vadd.f32 1.0, %v12463_v18 }
0x134c   :  { %12464 = vrcp.f32 %v4313_v19  ;;  %v4993_v19 = vand.u32 4294901760, %v4992_v16 }
0x1356   :  { %v12465_v20 = vpop.eup %12464 }
0x1357   :  { %v4320_v23 = vmul.f32 %v12465_v20, %v4318_v22 }
0x13ba   :  { %v4323_v21 = vpop.permute.xlu1 %4322 }
0x13bb   :  { %v4325_v7 = vmul.f32 %v12465_v20, %v4323_v21  ;;  %v4994_v21 = vsub.f32 %v4992_v16, %v4993_v19 }
0x13bd   :  { %4327 = vrot.lane.b32.xlu0 %v4325_v7, %s12660_s21 }
0x142f   :  { %v4328_v25 = vpop.permute.xlu0 %4327 }
0x1430   :  { %v13268_v26 = vadd.f32 %v4328_v25, %v4320_v23  ;;  %v4995_v23 = vand.u32 4294901760, %v4994_v21 }
0x1432   :  { %12466 = vtanh.f32 %v13268_v26 }
0x143c   :  { %v12467_v31 = vpop.eup %12466 }
0x143d   :  { %4333 = vrot.lane.b32.xlu1 %v12467_v31, %s12669_s5 }
0x14af   :  { %v4334_v32 = vpop.permute.xlu1 %4333 }
0x14b0   :  { %v4336_v33 = vmul.f32 %v12465_v20, %v4334_v32 }
0x14b2   :  { %v4342_v34 = vrot.slane %v4336_v33, 4 }
0x14b4   :  { %4343 = vrot.lane.b32.xlu0 %v4342_v34, %s12660_s21 }
0x1526   :  { %v4344_v35 = vpop.permute.xlu0 %4343 }
0x1527   :  { %v4345_v36 = vsel %vm668_vm4, %v4344_v35, 0 }
0x1528   :  { %v4416_v37 = vand.u32 4294901760, %v4345_v36 }
0x152a   :  { %v4417_v38 = vsub.f32 %v4345_v36, %v4416_v37 }
0x152c   :  { %v4418_v40 = vand.u32 4294901760, %v4417_v38 }
0x152e   :  { %v4419_v42 = vsub.f32 %v4417_v38, %v4418_v40 }
0x1530   :  { %v4420_v41 = vand.u32 4294901760, %v4419_v42 }
0x1532   :  { %10979 = vmatmul.mubr.f32.vlgmr.msra.gmra.mrb[10].mxu1 %v4420_v41 }
0x1533   :  { %11890 = vmatpush3.bf16.msra.mxu1 %v12931_v24  ;;  %10989 = vmatprep.mubr.msk.f32.mxu1 %vm12667_vm5, %v12668_v10 }
0x1534   :  { %11891 = vmatprep.subr.bf16.mxu1 %v12666_v29 }
0x1537   :  { %11893 = vmatpush3.bf16.msra.mxu1 %v12935_v27 }
0x1538   :  { %11894 = vmatprep.subr.bf16.mxu1 %v12666_v29 }
0x153a   :  { %10990 = vmatmul.mubr.f32.vlgmr.msra.gmra.mrb[10].mxu1 %v4416_v37 }
0x153b   :  { %11896 = vmatpush3.bf16.msra.mxu1 %v12943_v28  ;;  %11000 = vmatprep.mubr.msk.f32.mxu1 %vm12667_vm5, %v12668_v10 }
0x153c   :  { %11897 = vmatprep.subr.bf16.mxu1 %v12666_v29 }
0x153f   :  { %11899 = vmatpush3.bf16.msra.mxu1 %v12949_v30 }
0x1540   :  { %11900 = vmatprep.subr.bf16.mxu1 %v12666_v29 }
0x1542   :  { %11001 = vmatmul.mubr.f32.vlgmr.msra.gmra.mrb[10].mxu1 %v4417_v38 }
0x1543   :  { %11902 = vmatpush3.bf16.msra.mxu1 %v12908_v13  ;;  %11011 = vmatprep.mubr.msk.f32.mxu1 %vm12667_vm5, %v12668_v10 }
0x1544   :  { %11903 = vmatprep.subr.bf16.mxu1 %v12666_v29 }
0x1547   :  { %11905 = vmatpush3.bf16.msra.mxu1 %v12915_v14 }
0x1548   :  { %11906 = vmatprep.subr.bf16.mxu1 %v12666_v29 }
0x154a   :  { %11012 = vmatmul.mubr.f32.vlgmr.msra.gmra.mrb[10].mxu1 %v4418_v40 }
0x154b   :  { %11908 = vmatpush3.bf16.msra.mxu1 %v12891_v4  ;;  %11022 = vmatprep.mubr.msk.f32.mxu1 %vm12667_vm5, %v12668_v10 }
0x154c   :  { %11909 = vmatprep.subr.bf16.mxu1 %v12666_v29 }
0x154f   :  { %11911 = vmatpush3.bf16.msra.mxu1 %v12898_v9 }
0x1550   :  { %11912 = vmatprep.subr.bf16.mxu1 %v12666_v29 }
0x1552   :  { %11023 = vmatmul.mubr.f32.vlgmr.msra.gmra.mrb[10].mxu1 %v4416_v37 }
0x1553   :  { %11914 = vmatpush3.bf16.msra.mxu1 %v12908_v13  ;;  %11033 = vmatprep.mubr.msk.f32.mxu1 %vm12667_vm5, %v12668_v10 }
0x1554   :  { %11915 = vmatprep.subr.bf16.mxu1 %v12666_v29 }
0x1557   :  { %11917 = vmatpush3.bf16.msra.mxu1 %v12915_v14 }
0x1558   :  { %11966 = vmatprep.subr.bf16.mxu1 %v12666_v29 }
0x155a   :  { %11034 = vmatmul.mubr.f32.vlgmr.msra.gmra.mrb[10].mxu1 %v4416_v37 }
0x155b   :  { %11110 = vmatprep.mubr.msk.f32.mxu1 %vm12667_vm5, %v12668_v10 }
0x162d   :  { %v4828_v4 = vpop.f32.mrb[10].mxu1 }
0x162e   :  { %v4833_v9 = vrot.slane %v4828_v4, 2  ;;  %v11035_v24 = vpop.f32.mrb[11].mxu1  ;;  %v5415_v4 = vld [vmem:[#allocation10] sm:$0xff] }
0x162f   :  { %v5427_v24 = vand.u32 4294901760, %v5415_v4 }
0x1630   :  { %v4835_v27 = vadd.f32 %v12977_v39, %v4833_v9  ;;  %v4844_v39 = vrot.slane %v13268_v26, 6  ;;  %v5416_v9 = vld [vmem:[#allocation10 + $0x8] sm:$0xff] }
0x1632   :  { %12468 = vtanh.f32 %v4835_v27  ;;  %v9934_v28 = vmul.f32 -1.442695, %v4835_v27  ;;  %v5430_v27 = vand.u32 4294901760, %v5416_v9 }
0x1634   :  { %12470 = vpow2.f32 %v9934_v28  ;;  %v5514_v28 = vsub.f32 %v5416_v9, %v5430_v27 }
0x163c   :  { %v12469_v13 = vpop.eup %12468 }
0x163d   :  { %4848 = vrot.lane.b32.xlu1 %v12469_v13, %s12669_s5  ;;  %v5507_v13 = vsub.f32 %v5415_v4, %v5427_v24 }
0x163e   :  { %v12471_v30 = vpop.eup %12470 }
0x163f   :  { %v4839_v43 = vadd.f32 1.0, %v12471_v30  ;;  %v5420_v30 = vld [vmem:[#allocation4 + $0x2] sm:$0x3] }
0x1641   :  { %12472 = vrcp.f32 %v4839_v43  ;;  %v5417_v43 = vld [vmem:[#allocation10 + $0x10] sm:$0xff] }
0x164b   :  { %v12473_v14 = vpop.eup %12472 }
0x164c   :  { %v4846_v48 = vmul.f32 %v12473_v14, %v4844_v39  ;;  %v5433_v39 = vand.u32 4294901760, %v5417_v43 }
0x16af   :  { %v4849_v46 = vpop.permute.xlu1 %4848 }
0x16b0   :  { %v4851_v47 = vmul.f32 %v12473_v14, %v4849_v46  ;;  %v5424_v46 = vsel %vm668_vm4, %v5420_v30, 0 }
0x16b2   :  { %4853 = vrot.lane.b32.xlu0 %v4851_v47, %s12660_s21  ;;  %v13370_v47 = vpack.c.bf16 %v5430_v27, %v5427_v24 }
0x16b4   :  { %11968 = vmatpush3.bf16.msra.mxu1 %v13370_v47 }
0x16b5   :  { %11969 = vmatprep.subr.bf16.mxu1 %v12666_v29 }
0x16b6   :  { %1711 = vrot.lane.b32.xlu0 %v13036_v45, %s12660_s21 }
0x16ba   :  { %2765 = vrot.lane.b32.xlu0 %v13134_v44, %s12660_s21  ;;  %v4870_v44 = vld [vmem:[%s13928_s6] sm:$0xff] }
0x16bb   :  { %v4888_v56 = vand.u32 4294901760, %v4870_v44 }
0x16bd   :  { %v4978_v61 = vsub.f32 %v4870_v44, %v4888_v56 }
0x16be   :  { %4338 = vrot.lane.b32.xlu0 %v4336_v33, %s12660_s21 }
0x16bf   :  { %v4979_v0 = vand.u32 4294901760, %v4978_v61  ;;  %v13354_v34 = vpack.c.bf16 %v4985_v62, %v4978_v61 }
0x16c1   :  { %v4980_v2 = vsub.f32 %v4978_v61, %v4979_v0  ;;  %v13365_v42 = vpack.c.bf16 %v4986_v1, %v4979_v0 }
0x16c3   :  { %v4981_v5 = vand.u32 4294901760, %v4980_v2  ;;  %v13389_v2 = vpack.c.bf16 %v5514_v28, %v5507_v13 }
0x16c5   :  { %v13343_v15 = vpack.c.bf16 %v4988_v6, %v4981_v5 }
0x1724   :  { %v4854_v49 = vpop.permute.xlu0 %4853 }
0x1725   :  { %v4856_v50 = vadd.f32 %v4854_v49, %v4846_v48  ;;  %v5508_v49 = vand.u32 4294901760, %v5507_v13 }
0x1727   :  { %12474 = vtanh.f32 %v4856_v50  ;;  %v5515_v50 = vand.u32 4294901760, %v5514_v28 }
0x1728   :  { %v1712_v51 = vpop.permute.xlu0 %1711 }
0x1729   :  { %1715 = vst.msk [vmem:[#allocation3] sm:$0xc] %vm1714_vm7, %v1712_v51  ;;  %v13372_v51 = vand.u32 4294901760, %v5424_v46  ;;  %v5516_v44 = vsub.f32 %v5514_v28, %v5515_v50 }
0x172b   :  { %v13377_v54 = vsub.f32 %v5424_v46, %v13372_v51 }
0x172c   :  { %v2766_v52 = vpop.permute.xlu0 %2765 }
0x172d   :  { %2769 = vst.msk [vmem:[#allocation3] sm:$0xc0] %vm2768_vm8, %v2766_v52  ;;  %v5509_v52 = vsub.f32 %v5507_v13, %v5508_v49 }
0x1730   :  { %v4339_v45 = vpop.permute.xlu0 %4338 }
0x1731   :  { %v12475_v53 = vpop.eup %12474  ;;  %4341 = vst.msk [vmem:[#allocation3 + $0x8] sm:$0x30] %vm2241_vm9, %v4339_v45  ;;  %v5521_v45 = vsub.f32 %v5417_v43, %v5433_v39 }
0x1732   :  { %4859 = vrot.lane.b32.xlu1 %v12475_v53, %s12669_s5 }
0x1736   :  { %2238 = vrot.lane.b32.xlu1 %v13085_v11, %s12660_s21  ;;  %v4873_v11 = vld [vmem:[%s13928_s6 + $0x18] sm:$0xff] }
0x1737   :  { %v4897_v59 = vand.u32 4294901760, %v4873_v11 }
0x1739   :  { %v13337_v63 = vpack.c.bf16 %v4897_v59, %v4894_v58  ;;  %v4999_v17 = vsub.f32 %v4873_v11, %v4897_v59  ;;  %v5517_v58 = vand.u32 4294901760, %v5516_v44  ;;  %v5497_v59 = vand.u32 4294901760, %v13377_v54 }
0x173a   :  { %3812 = vrot.lane.b32.xlu1 %v13230_v60, %s12660_s21  ;;  %v13335_v60 = vpack.c.bf16 %v4891_v57, %v4888_v56  ;;  %v5510_v56 = vand.u32 4294901760, %v5509_v52  ;;  %v5522_v57 = vand.u32 4294901760, %v5521_v45 }
0x173b   :  { %v5000_v20 = vand.u32 4294901760, %v4999_v17  ;;  %v13360_v37 = vpack.c.bf16 %v4999_v17, %v4992_v16  ;;  %v5498_v1 = vsub.f32 %v13377_v54, %v5497_v59  ;;  %v13400_v16 = vpack.c.bf16 %v5515_v50, %v5508_v49 }
0x173c   :  { %11919 = vmatprep.subr.bf16.mxu0 %v13335_v60  ;;  %v5523_v61 = vsub.f32 %v5521_v45, %v5522_v57  ;;  %v13383_v0 = vpack.c.bf16 %v5517_v58, %v5510_v56 }
0x173d   :  { %11921 = vmatpush3.bf16.msra.mxu0 %v13335_v60  ;;  %v5001_v7 = vsub.f32 %v4999_v17, %v5000_v20  ;;  %v13367_v41 = vpack.c.bf16 %v5000_v20, %v4993_v19  ;;  %v5499_v6 = vand.u32 4294901760, %v5498_v1 }
0x173e   :  { %11923 = vmatprep.subr.bf16.mxu0 %v13337_v63  ;;  %v5524_v3 = vand.u32 4294901760, %v5523_v61 }
0x173f   :  { %v5002_v25 = vand.u32 4294901760, %v5001_v7 }
0x1741   :  { %11925 = vmatpush3.bf16.msra.mxu0 %v13337_v63  ;;  %v13349_v26 = vpack.c.bf16 %v5002_v25, %v4995_v23 }
0x1742   :  { %11927 = vmatprep.subr.bf16.mxu0 %v13343_v15 }
0x17a4   :  { %v4860_v8 = vpop.permute.xlu1 %4859 }
0x17a5   :  { %v4862_v12 = vmul.f32 %v12473_v14, %v4860_v8  ;;  %v5418_v14 = vld [vmem:[#allocation10 + $0x18] sm:$0xff] }
0x17a6   :  { %v5436_v48 = vand.u32 4294901760, %v5418_v14 }
0x17a7   :  { %4864 = vrot.lane.b32.xlu1 %v4862_v12, %s12660_s21 }
0x17a8   :  { %v2239_v18 = vpop.permute.xlu1 %2238  ;;  %v5528_v53 = vsub.f32 %v5418_v14, %v5436_v48  ;;  %v13379_v55 = vpack.c.bf16 %v5436_v48, %v5433_v39 }
0x17a9   :  { %2242 = vst.msk [vmem:[#allocation3] sm:$0x30] %vm2241_vm9, %v2239_v18  ;;  %v5422_v18 = vld [vmem:[#allocation7 + $0x2] sm:$0x3] }
0x17aa   :  { %v5529_v11 = vand.u32 4294901760, %v5528_v53  ;;  %11971 = vmatpush3.bf16.msra.mxu1 %v13379_v55  ;;  %v13394_v12 = vpack.c.bf16 %v5528_v53, %v5521_v45 }
0x17ab   :  { %11978 = vmatprep.subr.bf16.mxu1 %v12666_v29  ;;  %5920 = vrot.lane.b32.xlu1 %v5422_v18, %s12660_s21 }
0x17ac   :  { %v3813_v22 = vpop.permute.xlu1 %3812  ;;  %v5530_v62 = vsub.f32 %v5528_v53, %v5529_v11  ;;  %v13405_v17 = vpack.c.bf16 %v5529_v11, %v5522_v57 }
0x17ad   :  { %3815 = vst.msk [vmem:[#allocation3 + $0x8] sm:$0xc] %vm1714_vm7, %v3813_v22  ;;  %11111 = vmatmul.mubr.f32.vlgmr.msra.gmra.mrb[12].mxu1 %v5499_v6 }
0x17ae   :  { %v5531_v5 = vand.u32 4294901760, %v5530_v62  ;;  %11980 = vmatpush3.bf16.msra.mxu1 %v13389_v2  ;;  %11132 = vmatprep.mubr.msk.f32.mxu1 %vm12667_vm5, %v12668_v10 }
0x17af   :  { %11981 = vmatprep.subr.bf16.mxu1 %v12666_v29 }
0x17b0   :  { %v4868_v31 = vld [vmem:[#allocation3] sm:$0xff]  ;;  %v13391_v8 = vpack.c.bf16 %v5531_v5, %v5524_v3 }
0x17b1   :  { %v4882_v32 = vsel %vm668_vm4, %v4868_v31, 0 }
0x17b2   :  { %v13352_v33 = vand.u32 4294901760, %v4882_v32  ;;  %11983 = vmatpush3.bf16.msra.mxu1 %v13394_v12 }
0x17b3   :  { %11990 = vmatprep.subr.bf16.mxu1 %v12666_v29 }
0x17b4   :  { %v13357_v35 = vsub.f32 %v4882_v32, %v13352_v33 }
0x17b5   :  { %11133 = vmatmul.mubr.f32.vlgmr.msra.gmra.mrb[14].mxu1 %v13377_v54 }
0x17b6   :  { %v4958_v36 = vand.u32 4294901760, %v13357_v35  ;;  %11992 = vmatpush3.bf16.msra.mxu1 %v13400_v16  ;;  %11154 = vmatprep.mubr.msk.f32.mxu1 %vm12667_vm5, %v12668_v10 }
0x17b7   :  { %11993 = vmatprep.subr.bf16.mxu1 %v12666_v29 }
0x17b8   :  { %v4959_v38 = vsub.f32 %v13357_v35, %v4958_v36 }
0x17ba   :  { %v4960_v40 = vand.u32 4294901760, %v4959_v38  ;;  %11995 = vmatpush3.bf16.msra.mxu1 %v13405_v17 }
0x17bb   :  { %12002 = vmatprep.subr.bf16.mxu1 %v12666_v29 }
0x17bc   :  { %11044 = vmatprep.mubr.f32.mxu0 %v4960_v40 }
0x17bd   :  { %11155 = vmatmul.mubr.f32.vlgmr.msra.gmra.mrb[16].mxu1 %v13372_v51 }
0x17be   :  { %12004 = vmatpush3.bf16.msra.mxu1 %v13370_v47  ;;  %11176 = vmatprep.mubr.msk.f32.mxu1 %vm12667_vm5, %v12668_v10 }
0x17bf   :  { %12005 = vmatprep.subr.bf16.mxu1 %v12666_v29 }
0x17c2   :  { %12007 = vmatpush3.bf16.msra.mxu1 %v13379_v55 }
0x17c3   :  { %12008 = vmatprep.subr.bf16.mxu1 %v12666_v29 }
0x1819   :  { %v4865_v19 = vpop.permute.xlu1 %4864 }
0x181a   :  { %4867 = vst.msk [vmem:[#allocation3 + $0x8] sm:$0xc0] %vm2768_vm8, %v4865_v19 }
0x181d   :  { %v5921_v45 = vpop.permute.xlu1 %5920 }
0x1821   :  { %v4869_v20 = vld [vmem:[#allocation3 + $0x8] sm:$0xff] }
0x1822   :  { %v4885_v21 = vsel %vm668_vm4, %v4869_v20, 0 }
0x1823   :  { %v4966_v7 = vand.u32 4294901760, %v4885_v21 }
0x1825   :  { %v4967_v22 = vsub.f32 %v4885_v21, %v4966_v7 }
0x1827   :  { %v4968_v23 = vand.u32 4294901760, %v4967_v22 }
0x1829   :  { %v4969_v25 = vsub.f32 %v4967_v22, %v4968_v23 }
0x182b   :  { %v4970_v31 = vand.u32 4294901760, %v4969_v25 }
0x182d   :  { %11045 = vmatmul.mubr.f32.vlgmr.msra.gmra.mrb[28].mxu0 %v4970_v31 }
0x182e   :  { %11929 = vmatpush3.bf16.msra.mxu0 %v13343_v15  ;;  %11055 = vmatprep.mubr.f32.mxu0 %v13352_v33 }
0x182f   :  { %11931 = vmatprep.subr.bf16.mxu0 %v13349_v26 }
0x1832   :  { %11933 = vmatpush3.bf16.msra.mxu0 %v13349_v26 }
0x1833   :  { %11935 = vmatprep.subr.bf16.mxu0 %v13354_v34 }
0x1835   :  { %11056 = vmatmul.mubr.f32.vlgmr.msra.gmra.mrb[28].mxu0 %v4966_v7 }
0x1836   :  { %11937 = vmatpush3.bf16.msra.mxu0 %v13354_v34  ;;  %11066 = vmatprep.mubr.f32.mxu0 %v13357_v35  ;;  %v9935_v34 = vld [vmem:[%s13930_s8] ss:$0 sm:$0xff]  ;;  %s12671_s8 = smov [#allocation12]  }
0x1837   :  { %11939 = vmatprep.subr.bf16.mxu0 %v13360_v37  ;;  %s9912_s17 = sshll.u32 %s12671_s8, 4  ;;  %s9913_s17 = int_to_ptr.vmem [resolvable:$true] %s9912_s17 }
0x1838   :  { %p12633_p5 = scmp.lt.s32.totalorder %s9913_s17, %s9913_s17 }
0x183a   :  { %11941 = vmatpush3.bf16.msra.mxu0 %v13360_v37 }
0x183b   :  { %11943 = vmatprep.subr.bf16.mxu0 %v13335_v60 }
0x183d   :  { %11067 = vmatmul.mubr.f32.vlgmr.msra.gmra.mrb[28].mxu0 %v4967_v22 }
0x183e   :  { %11945 = vmatpush3.bf16.msra.mxu0 %v13335_v60  ;;  %11077 = vmatprep.mubr.f32.mxu0 %v4958_v36 }
0x183f   :  { %11947 = vmatprep.subr.bf16.mxu0 %v13337_v63 }
0x1842   :  { %11949 = vmatpush3.bf16.msra.mxu0 %v13337_v63 }
0x1843   :  { %11951 = vmatprep.subr.bf16.mxu0 %v13365_v42 }
0x1845   :  { %11078 = vmatmul.mubr.f32.vlgmr.msra.gmra.mrb[28].mxu0 %v4968_v23 }
0x1846   :  { %11953 = vmatpush3.bf16.msra.mxu0 %v13365_v42  ;;  %11088 = vmatprep.mubr.f32.mxu0 %v13352_v33 }
0x1847   :  { %11955 = vmatprep.subr.bf16.mxu0 %v13367_v41 }
0x184a   :  { %11957 = vmatpush3.bf16.msra.mxu0 %v13367_v41 }
0x184b   :  { %11959 = vmatprep.subr.bf16.mxu0 %v13335_v60 }
0x184d   :  { %11089 = vmatmul.mubr.f32.vlgmr.msra.gmra.mrb[28].mxu0 %v4966_v7 }
0x184e   :  { %11961 = vmatpush3.bf16.msra.mxu0 %v13335_v60  ;;  %11099 = vmatprep.mubr.f32.mxu0 %v13352_v33 }
0x184f   :  { %11963 = vmatprep.subr.bf16.mxu0 %v13337_v63 }
0x1852   :  { %11965 = vmatpush3.bf16.msra.mxu0 %v13337_v63 }
0x1853   :  { %11972 = vmatprep.subr.bf16.mxu0 %v12666_v29 }
0x1855   :  { %11100 = vmatmul.mubr.f32.vlgmr.msra.gmra.mrb[28].mxu0 %v4966_v7 }
0x1856   :  { %11974 = vmatpush3.bf16.msra.mxu0 %v13383_v0  ;;  %11121 = vmatprep.mubr.msk.f32.mxu0 %vm12667_vm5, %v12668_v10 }
0x1857   :  { %11975 = vmatprep.subr.bf16.mxu0 %v12666_v29 }
0x185a   :  { %11977 = vmatpush3.bf16.msra.mxu0 %v13391_v8 }
0x185b   :  { %11984 = vmatprep.subr.bf16.mxu0 %v12666_v29 }
0x185d   :  { %11122 = vmatmul.mubr.f32.vlgmr.msra.gmra.mrb[30].mxu0 %v13372_v51 }
0x185e   :  { %11986 = vmatpush3.bf16.msra.mxu0 %v13370_v47  ;;  %11143 = vmatprep.mubr.msk.f32.mxu0 %vm12667_vm5, %v12668_v10 }
0x185f   :  { %11987 = vmatprep.subr.bf16.mxu0 %v12666_v29 }
0x1862   :  { %11989 = vmatpush3.bf16.msra.mxu0 %v13379_v55 }
0x1863   :  { %11996 = vmatprep.subr.bf16.mxu0 %v12666_v29 }
0x1865   :  { %11144 = vmatmul.mubr.f32.vlgmr.msra.gmra.mrb[32].mxu0 %v5497_v59 }
0x1866   :  { %11998 = vmatpush3.bf16.msra.mxu0 %v13370_v47  ;;  %11165 = vmatprep.mubr.msk.f32.mxu0 %vm12667_vm5, %v12668_v10 }
0x1867   :  { %11999 = vmatprep.subr.bf16.mxu0 %v12666_v29 }
0x186a   :  { %12001 = vmatpush3.bf16.msra.mxu0 %v13379_v55 }
0x186b   :  { %12038 = vmatprep.subr.bf16.mxu0 %v12666_v29 }
0x186d   :  { %11166 = vmatmul.mubr.f32.vlgmr.msra.gmra.mrb[34].mxu0 %v13372_v51 }
0x186e   :  { %12040 = vmatpush3.bf16.msra.mxu0 %v13370_v47  ;;  %11242 = vmatprep.mubr.msk.f32.mxu0 %vm12667_vm5, %v12668_v10 }
0x186f   :  { %12041 = vmatprep.subr.bf16.mxu0 %v12666_v29 }
0x1872   :  { %12043 = vmatpush3.bf16.msra.mxu0 %v13379_v55 }
0x1873   :  { %12044 = vmatprep.subr.bf16.mxu0 %v12666_v29 }
0x1880   :  { %v5501_v60 = vpop.f32.mrb[12].mxu1 }
0x1881   :  { %v11112_v63 = vpop.f32.mrb[13].mxu1 }
0x1888   :  { %v5672_v15 = vpop.f32.mrb[14].mxu1 }
0x1889   :  { %v11134_v26 = vpop.f32.mrb[15].mxu1 }
0x1890   :  { %v5832_v32 = vpop.f32.mrb[16].mxu1 }
0x1891   :  { %v11156_v33 = vpop.f32.mrb[17].mxu1 }
0x1928   :  { %v11101_v35 = vpop.f32.mrb[28].mxu0 }
0x1929   :  { %v13479_v36 = vadd.f32 %v11101_v35, %v9935_v34  ;;  %v5405_v37 = vpop.f32.mrb[29].mxu0 }
0x192a   :  { %v13481_v28 = vadd.f32 %v9935_v34, %v5405_v37 }
0x1930   :  { %v5592_v38 = vpop.f32.mrb[30].mxu0 }
0x1931   :  { %v5593_v40 = vadd.f32 %v5592_v38, %v5501_v60  ;;  %v11123_v42 = vpop.f32.mrb[31].mxu0 }
0x1933   :  { %v5673_v41 = vadd.f32 %v5672_v15, %v5593_v40 }
0x1938   :  { %v5749_v4 = vpop.f32.mrb[32].mxu0 }
0x1939   :  { %v5750_v9 = vadd.f32 %v5749_v4, %v5673_v41  ;;  %v11145_v24 = vpop.f32.mrb[33].mxu0 }
0x193b   :  { %v5833_v27 = vadd.f32 %v5832_v32, %v5750_v9 }
0x1940   :  { %v5907_v13 = vpop.f32.mrb[34].mxu0 }
0x1941   :  { %v5908_v30 = vadd.f32 %v5907_v13, %v5833_v27  ;;  %v11167_v43 = vpop.f32.mrb[35].mxu0 }
0x1943   :  { %v5911_v14 = vadd.f32 %v13481_v28, %v5908_v30 }
0x1945   :  { %12476 = vtanh.f32 %v5911_v14  ;;  %v9936_v39 = vmul.f32 -1.442695, %v5911_v14 }
0x1947   :  { %12478 = vpow2.f32 %v9936_v39 }
0x194f   :  { %v12477_v46 = vpop.eup %12476 }
0x1950   :  { %5925 = vrot.lane.b32.xlu0 %v12477_v46, %s12669_s5 }
0x1951   :  { %v12479_v48 = vpop.eup %12478 }
0x1952   :  { %v5915_v49 = vadd.f32 1.0, %v12479_v48 }
0x1954   :  { %12480 = vrcp.f32 %v5915_v49 }
0x195e   :  { %v12481_v50 = vpop.eup %12480 }
0x195f   :  { %v5923_v53 = vmul.f32 %v12481_v50, %v5921_v45 }
0x19c2   :  { %v5926_v51 = vpop.permute.xlu0 %5925 }
0x19c3   :  { %v5928_v52 = vmul.f32 %v12481_v50, %v5926_v51 }
0x19c5   :  { %5930 = vrot.lane.b32.xlu0 %v5928_v52, %s12660_s21 }
0x1a37   :  { %v5931_v44 = vpop.permute.xlu0 %5930 }
0x1a38   :  { %v13486_v54 = vadd.f32 %v5931_v44, %v5923_v53 }
0x1a3a   :  { %12482 = vtanh.f32 %v13486_v54  ;;  %v6481_v63 = vrot.slane %v13486_v54, 6 }
0x1a44   :  { %v12483_v56 = vpop.eup %12482 }
0x1a45   :  { %5936 = vrot.lane.b32.xlu1 %v12483_v56, %s12669_s5 }
0x1ab7   :  { %v5937_v57 = vpop.permute.xlu1 %5936 }
0x1ab8   :  { %v13490_v11 = vmul.f32 %v12481_v50, %v5937_v57 }
0x1aba   :  { %5980 = vrot.lane.b32.xlu0 %v13490_v11, %s12660_s21 }
0x1b2c   :  { %v5981_v58 = vpop.permute.xlu0 %5980 }
0x1b2d   :  { %v5982_v59 = vsel %vm668_vm4, %v5981_v58, 0 }
0x1b2e   :  { %v6053_v61 = vand.u32 4294901760, %v5982_v59 }
0x1b30   :  { %v6054_v62 = vsub.f32 %v5982_v59, %v6053_v61 }
0x1b32   :  { %v6055_v1 = vand.u32 4294901760, %v6054_v62 }
0x1b34   :  { %v6056_v3 = vsub.f32 %v6054_v62, %v6055_v1 }
0x1b36   :  { %v6057_v5 = vand.u32 4294901760, %v6056_v3 }
0x1b38   :  { %11177 = vmatmul.mubr.f32.vlgmr.msra.gmra.mrb[18].mxu1 %v6057_v5 }
0x1b39   :  { %12010 = vmatpush3.bf16.msra.mxu1 %v13383_v0  ;;  %11187 = vmatprep.mubr.msk.f32.mxu1 %vm12667_vm5, %v12668_v10 }
0x1b3a   :  { %12011 = vmatprep.subr.bf16.mxu1 %v12666_v29 }
0x1b3d   :  { %12013 = vmatpush3.bf16.msra.mxu1 %v13391_v8 }
0x1b3e   :  { %12014 = vmatprep.subr.bf16.mxu1 %v12666_v29 }
0x1b40   :  { %11188 = vmatmul.mubr.f32.vlgmr.msra.gmra.mrb[18].mxu1 %v6053_v61 }
0x1b41   :  { %12016 = vmatpush3.bf16.msra.mxu1 %v13389_v2  ;;  %11198 = vmatprep.mubr.msk.f32.mxu1 %vm12667_vm5, %v12668_v10 }
0x1b42   :  { %12017 = vmatprep.subr.bf16.mxu1 %v12666_v29 }
0x1b45   :  { %12019 = vmatpush3.bf16.msra.mxu1 %v13394_v12 }
0x1b46   :  { %12020 = vmatprep.subr.bf16.mxu1 %v12666_v29 }
0x1b48   :  { %11199 = vmatmul.mubr.f32.vlgmr.msra.gmra.mrb[18].mxu1 %v6054_v62 }
0x1b49   :  { %12022 = vmatpush3.bf16.msra.mxu1 %v13370_v47  ;;  %11209 = vmatprep.mubr.msk.f32.mxu1 %vm12667_vm5, %v12668_v10 }
0x1b4a   :  { %12023 = vmatprep.subr.bf16.mxu1 %v12666_v29 }
0x1b4d   :  { %12025 = vmatpush3.bf16.msra.mxu1 %v13379_v55 }
0x1b4e   :  { %12026 = vmatprep.subr.bf16.mxu1 %v12666_v29 }
0x1b50   :  { %11210 = vmatmul.mubr.f32.vlgmr.msra.gmra.mrb[18].mxu1 %v6055_v1 }
0x1b51   :  { %12028 = vmatpush3.bf16.msra.mxu1 %v13400_v16  ;;  %11220 = vmatprep.mubr.msk.f32.mxu1 %vm12667_vm5, %v12668_v10 }
0x1b52   :  { %12029 = vmatprep.subr.bf16.mxu1 %v12666_v29 }
0x1b55   :  { %12031 = vmatpush3.bf16.msra.mxu1 %v13405_v17 }
0x1b56   :  { %12032 = vmatprep.subr.bf16.mxu1 %v12666_v29 }
0x1b58   :  { %11221 = vmatmul.mubr.f32.vlgmr.msra.gmra.mrb[18].mxu1 %v6053_v61 }
0x1b59   :  { %12034 = vmatpush3.bf16.msra.mxu1 %v13370_v47  ;;  %11231 = vmatprep.mubr.msk.f32.mxu1 %vm12667_vm5, %v12668_v10 }
0x1b5a   :  { %12035 = vmatprep.subr.bf16.mxu1 %v12666_v29 }
0x1b5d   :  { %12037 = vmatpush3.bf16.msra.mxu1 %v13379_v55 }
0x1b5e   :  { %12074 = vmatprep.subr.bf16.mxu1 %v12666_v29 }
0x1b60   :  { %11232 = vmatmul.mubr.f32.vlgmr.msra.gmra.mrb[18].mxu1 %v6053_v61 }
0x1b61   :  { %12076 = vmatpush3.bf16.msra.mxu1 %v13370_v47  ;;  %11308 = vmatprep.mubr.msk.f32.mxu1 %vm12667_vm5, %v12668_v10 }
0x1b62   :  { %12077 = vmatprep.subr.bf16.mxu1 %v12666_v29 }
0x1b65   :  { %12079 = vmatpush3.bf16.msra.mxu1 %v13379_v55 }
0x1b66   :  { %12080 = vmatprep.subr.bf16.mxu1 %v12666_v29 }
0x1c33   :  { %v6465_v6 = vpop.f32.mrb[18].mxu1 }
0x1c34   :  { %v6470_v18 = vrot.slane %v6465_v6, 6  ;;  %v11233_v19 = vpop.f32.mrb[19].mxu1 }
0x1c36   :  { %v6472_v20 = vadd.f32 %v13481_v28, %v6470_v18 }
0x1c38   :  { %12484 = vtanh.f32 %v6472_v20  ;;  %v9937_v7 = vmul.f32 -1.442695, %v6472_v20 }
0x1c3a   :  { %12486 = vpow2.f32 %v9937_v7 }
0x1c42   :  { %v12485_v21 = vpop.eup %12484 }
0x1c43   :  { %6485 = vrot.lane.b32.xlu1 %v12485_v21, %s12669_s5 }
0x1c44   :  { %v12487_v22 = vpop.eup %12486 }
0x1c45   :  { %v6476_v23 = vadd.f32 1.0, %v12487_v22 }
0x1c47   :  { %12488 = vrcp.f32 %v6476_v23 }
0x1c51   :  { %v12489_v25 = vpop.eup %12488 }
0x1c52   :  { %v6483_v15 = vmul.f32 %v12489_v25, %v6481_v63 }
0x1cb5   :  { %v6486_v31 = vpop.permute.xlu1 %6485 }
0x1cb6   :  { %v6488_v60 = vmul.f32 %v12489_v25, %v6486_v31 }
0x1cb8   :  { %6490 = vrot.lane.b32.xlu0 %v6488_v60, %s12660_s21 }
0x1d2a   :  { %v6491_v26 = vpop.permute.xlu0 %6490 }
0x1d2b   :  { %v13535_v32 = vadd.f32 %v6491_v26, %v6483_v15 }
0x1d2d   :  { %12490 = vtanh.f32 %v13535_v32  ;;  %v7043_v52 = vrot.slane %v13535_v32, 6 }
0x1d37   :  { %v12491_v33 = vpop.eup %12490 }
0x1d38   :  { %6496 = vrot.lane.b32.xlu1 %v12491_v33, %s12669_s5 }
0x1daa   :  { %v6497_v34 = vpop.permute.xlu1 %6496 }
0x1dab   :  { %v13539_v35 = vmul.f32 %v12489_v25, %v6497_v34 }
0x1dad   :  { %v6541_v37 = vrot.slane %v13539_v35, 2 }
0x1daf   :  { %6542 = vrot.lane.b32.xlu0 %v6541_v37, %s12660_s21 }
0x1e21   :  { %v6543_v38 = vpop.permute.xlu0 %6542 }
0x1e22   :  { %v6544_v40 = vsel %vm668_vm4, %v6543_v38, 0 }
0x1e23   :  { %v6615_v42 = vand.u32 4294901760, %v6544_v40 }
0x1e25   :  { %v6616_v41 = vsub.f32 %v6544_v40, %v6615_v42 }
0x1e27   :  { %v6617_v4 = vand.u32 4294901760, %v6616_v41 }
0x1e29   :  { %v6618_v9 = vsub.f32 %v6616_v41, %v6617_v4 }
0x1e2b   :  { %v6619_v24 = vand.u32 4294901760, %v6618_v9 }
0x1e2d   :  { %11243 = vmatmul.mubr.f32.vlgmr.msra.gmra.mrb[36].mxu0 %v6619_v24 }
0x1e2e   :  { %12046 = vmatpush3.bf16.msra.mxu0 %v13383_v0  ;;  %11253 = vmatprep.mubr.msk.f32.mxu0 %vm12667_vm5, %v12668_v10 }
0x1e2f   :  { %12047 = vmatprep.subr.bf16.mxu0 %v12666_v29 }
0x1e32   :  { %12049 = vmatpush3.bf16.msra.mxu0 %v13391_v8 }
0x1e33   :  { %12050 = vmatprep.subr.bf16.mxu0 %v12666_v29 }
0x1e35   :  { %11254 = vmatmul.mubr.f32.vlgmr.msra.gmra.mrb[36].mxu0 %v6615_v42 }
0x1e36   :  { %12052 = vmatpush3.bf16.msra.mxu0 %v13389_v2  ;;  %11264 = vmatprep.mubr.msk.f32.mxu0 %vm12667_vm5, %v12668_v10 }
0x1e37   :  { %12053 = vmatprep.subr.bf16.mxu0 %v12666_v29 }
0x1e3a   :  { %12055 = vmatpush3.bf16.msra.mxu0 %v13394_v12 }
0x1e3b   :  { %12056 = vmatprep.subr.bf16.mxu0 %v12666_v29 }
0x1e3d   :  { %11265 = vmatmul.mubr.f32.vlgmr.msra.gmra.mrb[36].mxu0 %v6616_v41 }
0x1e3e   :  { %12058 = vmatpush3.bf16.msra.mxu0 %v13370_v47  ;;  %11275 = vmatprep.mubr.msk.f32.mxu0 %vm12667_vm5, %v12668_v10 }
0x1e3f   :  { %12059 = vmatprep.subr.bf16.mxu0 %v12666_v29 }
0x1e42   :  { %12061 = vmatpush3.bf16.msra.mxu0 %v13379_v55 }
0x1e43   :  { %12062 = vmatprep.subr.bf16.mxu0 %v12666_v29 }
0x1e45   :  { %11276 = vmatmul.mubr.f32.vlgmr.msra.gmra.mrb[36].mxu0 %v6617_v4 }
0x1e46   :  { %12064 = vmatpush3.bf16.msra.mxu0 %v13400_v16  ;;  %11286 = vmatprep.mubr.msk.f32.mxu0 %vm12667_vm5, %v12668_v10 }
0x1e47   :  { %12065 = vmatprep.subr.bf16.mxu0 %v12666_v29 }
0x1e4a   :  { %12067 = vmatpush3.bf16.msra.mxu0 %v13405_v17 }
0x1e4b   :  { %12068 = vmatprep.subr.bf16.mxu0 %v12666_v29 }
0x1e4d   :  { %11287 = vmatmul.mubr.f32.vlgmr.msra.gmra.mrb[36].mxu0 %v6615_v42 }
0x1e4e   :  { %12070 = vmatpush3.bf16.msra.mxu0 %v13370_v47  ;;  %11297 = vmatprep.mubr.msk.f32.mxu0 %vm12667_vm5, %v12668_v10 }
0x1e4f   :  { %12071 = vmatprep.subr.bf16.mxu0 %v12666_v29 }
0x1e52   :  { %12073 = vmatpush3.bf16.msra.mxu0 %v13379_v55 }
0x1e53   :  { %12110 = vmatprep.subr.bf16.mxu0 %v12666_v29 }
0x1e55   :  { %11298 = vmatmul.mubr.f32.vlgmr.msra.gmra.mrb[36].mxu0 %v6615_v42 }
0x1e56   :  { %12112 = vmatpush3.bf16.msra.mxu0 %v13370_v47  ;;  %11374 = vmatprep.mubr.msk.f32.mxu0 %vm12667_vm5, %v12668_v10 }
0x1e57   :  { %12113 = vmatprep.subr.bf16.mxu0 %v12666_v29 }
0x1e5a   :  { %12115 = vmatpush3.bf16.msra.mxu0 %v13379_v55 }
0x1e5b   :  { %12116 = vmatprep.subr.bf16.mxu0 %v12666_v29 }
0x1f28   :  { %v7027_v27 = vpop.f32.mrb[36].mxu0 }
0x1f29   :  { %v7032_v13 = vrot.slane %v7027_v27, 4  ;;  %v11299_v30 = vpop.f32.mrb[37].mxu0 }
0x1f2b   :  { %v7034_v43 = vadd.f32 %v13481_v28, %v7032_v13 }
0x1f2d   :  { %12492 = vtanh.f32 %v7034_v43  ;;  %v9938_v46 = vmul.f32 -1.442695, %v7034_v43 }
0x1f2f   :  { %12494 = vpow2.f32 %v9938_v46 }
0x1f37   :  { %v12493_v14 = vpop.eup %12492 }
0x1f38   :  { %7047 = vrot.lane.b32.xlu1 %v12493_v14, %s12669_s5 }
0x1f39   :  { %v12495_v39 = vpop.eup %12494 }
0x1f3a   :  { %v7038_v48 = vadd.f32 1.0, %v12495_v39 }
0x1f3c   :  { %12496 = vrcp.f32 %v7038_v48 }
0x1f46   :  { %v12497_v49 = vpop.eup %12496 }
0x1f47   :  { %v7045_v45 = vmul.f32 %v12497_v49, %v7043_v52 }
0x1faa   :  { %v7048_v50 = vpop.permute.xlu1 %7047 }
0x1fab   :  { %v7050_v51 = vmul.f32 %v12497_v49, %v7048_v50 }
0x1fad   :  { %7052 = vrot.lane.b32.xlu0 %v7050_v51, %s12660_s21 }
0x201f   :  { %v7053_v53 = vpop.permute.xlu0 %7052 }
0x2020   :  { %v13584_v44 = vadd.f32 %v7053_v53, %v7045_v45 }
0x2022   :  { %12498 = vtanh.f32 %v13584_v44  ;;  %v7604_v15 = vrot.slane %v13584_v44, 6 }
0x202c   :  { %v12499_v54 = vpop.eup %12498 }
0x202d   :  { %7058 = vrot.lane.b32.xlu1 %v12499_v54, %s12669_s5 }
0x209f   :  { %v7059_v56 = vpop.permute.xlu1 %7058 }
0x20a0   :  { %v13588_v57 = vmul.f32 %v12497_v49, %v7059_v56 }
0x20a2   :  { %v7102_v58 = vrot.slane %v13588_v57, 4 }
0x20a4   :  { %7103 = vrot.lane.b32.xlu0 %v7102_v58, %s12660_s21 }
0x2116   :  { %v7104_v59 = vpop.permute.xlu0 %7103 }
0x2117   :  { %v7105_v61 = vsel %vm668_vm4, %v7104_v59, 0 }
0x2118   :  { %v7176_v62 = vand.u32 4294901760, %v7105_v61 }
0x211a   :  { %v7177_v1 = vsub.f32 %v7105_v61, %v7176_v62 }
0x211c   :  { %v7178_v3 = vand.u32 4294901760, %v7177_v1 }
0x211e   :  { %v7179_v5 = vsub.f32 %v7177_v1, %v7178_v3 }
0x2120   :  { %v7180_v6 = vand.u32 4294901760, %v7179_v5 }
0x2122   :  { %11309 = vmatmul.mubr.f32.vlgmr.msra.gmra.mrb[20].mxu1 %v7180_v6 }
0x2123   :  { %12082 = vmatpush3.bf16.msra.mxu1 %v13383_v0  ;;  %11319 = vmatprep.mubr.msk.f32.mxu1 %vm12667_vm5, %v12668_v10 }
0x2124   :  { %12083 = vmatprep.subr.bf16.mxu1 %v12666_v29 }
0x2127   :  { %12085 = vmatpush3.bf16.msra.mxu1 %v13391_v8 }
0x2128   :  { %12086 = vmatprep.subr.bf16.mxu1 %v12666_v29 }
0x212a   :  { %11320 = vmatmul.mubr.f32.vlgmr.msra.gmra.mrb[20].mxu1 %v7176_v62 }
0x212b   :  { %12088 = vmatpush3.bf16.msra.mxu1 %v13389_v2  ;;  %11330 = vmatprep.mubr.msk.f32.mxu1 %vm12667_vm5, %v12668_v10 }
0x212c   :  { %12089 = vmatprep.subr.bf16.mxu1 %v12666_v29 }
0x212f   :  { %12091 = vmatpush3.bf16.msra.mxu1 %v13394_v12 }
0x2130   :  { %12092 = vmatprep.subr.bf16.mxu1 %v12666_v29 }
0x2132   :  { %11331 = vmatmul.mubr.f32.vlgmr.msra.gmra.mrb[20].mxu1 %v7177_v1 }
0x2133   :  { %12094 = vmatpush3.bf16.msra.mxu1 %v13370_v47  ;;  %11341 = vmatprep.mubr.msk.f32.mxu1 %vm12667_vm5, %v12668_v10 }
0x2134   :  { %12095 = vmatprep.subr.bf16.mxu1 %v12666_v29 }
0x2137   :  { %12097 = vmatpush3.bf16.msra.mxu1 %v13379_v55 }
0x2138   :  { %12098 = vmatprep.subr.bf16.mxu1 %v12666_v29 }
0x213a   :  { %11342 = vmatmul.mubr.f32.vlgmr.msra.gmra.mrb[20].mxu1 %v7178_v3 }
0x213b   :  { %12100 = vmatpush3.bf16.msra.mxu1 %v13400_v16  ;;  %11352 = vmatprep.mubr.msk.f32.mxu1 %vm12667_vm5, %v12668_v10 }
0x213c   :  { %12101 = vmatprep.subr.bf16.mxu1 %v12666_v29 }
0x213f   :  { %12103 = vmatpush3.bf16.msra.mxu1 %v13405_v17 }
0x2140   :  { %12104 = vmatprep.subr.bf16.mxu1 %v12666_v29 }
0x2142   :  { %11353 = vmatmul.mubr.f32.vlgmr.msra.gmra.mrb[20].mxu1 %v7176_v62 }
0x2143   :  { %12106 = vmatpush3.bf16.msra.mxu1 %v13370_v47  ;;  %11363 = vmatprep.mubr.msk.f32.mxu1 %vm12667_vm5, %v12668_v10 }
0x2144   :  { %12107 = vmatprep.subr.bf16.mxu1 %v12666_v29 }
0x2147   :  { %12109 = vmatpush3.bf16.msra.mxu1 %v13379_v55 }
0x2148   :  { %12146 = vmatprep.subr.bf16.mxu1 %v12666_v29 }
0x214a   :  { %11364 = vmatmul.mubr.f32.vlgmr.msra.gmra.mrb[20].mxu1 %v7176_v62 }
0x214b   :  { %12148 = vmatpush3.bf16.msra.mxu1 %v13370_v47  ;;  %11440 = vmatprep.mubr.msk.f32.mxu1 %vm12667_vm5, %v12668_v10 }
0x214c   :  { %12149 = vmatprep.subr.bf16.mxu1 %v12666_v29 }
0x214f   :  { %12151 = vmatpush3.bf16.msra.mxu1 %v13379_v55 }
0x2150   :  { %12152 = vmatprep.subr.bf16.mxu1 %v12666_v29 }
0x221d   :  { %v7588_v18 = vpop.f32.mrb[20].mxu1 }
0x221e   :  { %v7593_v19 = vrot.slane %v7588_v18, 2  ;;  %v11365_v20 = vpop.f32.mrb[21].mxu1 }
0x2220   :  { %v7595_v21 = vadd.f32 %v13481_v28, %v7593_v19 }
0x2222   :  { %12500 = vtanh.f32 %v7595_v21  ;;  %v9939_v22 = vmul.f32 -1.442695, %v7595_v21 }
0x2224   :  { %12502 = vpow2.f32 %v9939_v22 }
0x222c   :  { %v12501_v7 = vpop.eup %12500 }
0x222d   :  { %7608 = vrot.lane.b32.xlu1 %v12501_v7, %s12669_s5 }
0x222e   :  { %v12503_v23 = vpop.eup %12502 }
0x222f   :  { %v7599_v25 = vadd.f32 1.0, %v12503_v23 }
0x2231   :  { %12504 = vrcp.f32 %v7599_v25 }
0x223b   :  { %v12505_v31 = vpop.eup %12504 }
0x223c   :  { %v7606_v26 = vmul.f32 %v12505_v31, %v7604_v15 }
0x229f   :  { %v7609_v60 = vpop.permute.xlu1 %7608 }
0x22a0   :  { %v7611_v63 = vmul.f32 %v12505_v31, %v7609_v60 }
0x22a2   :  { %7613 = vrot.lane.b32.xlu0 %v7611_v63, %s12660_s21 }
0x2314   :  { %v7614_v32 = vpop.permute.xlu0 %7613 }
0x2315   :  { %v13633_v33 = vadd.f32 %v7614_v32, %v7606_v26 }
0x2317   :  { %12506 = vtanh.f32 %v13633_v33  ;;  %v8164_v19 = vrot.slane %v13633_v33, 6 }
0x2321   :  { %v12507_v28 = vpop.eup %12506 }
0x2322   :  { %7619 = vrot.lane.b32.xlu1 %v12507_v28, %s12669_s5 }
0x2394   :  { %v7620_v34 = vpop.permute.xlu1 %7619 }
0x2395   :  { %v13637_v37 = vmul.f32 %v12505_v31, %v7620_v34 }
0x2397   :  { %v7665_v38 = vrot.slane %v13637_v37, 6 }
0x2399   :  { %7666 = vrot.lane.b32.xlu0 %v7665_v38, %s12660_s21 }
0x240b   :  { %v7667_v40 = vpop.permute.xlu0 %7666 }
0x240c   :  { %v7668_v42 = vsel %vm668_vm4, %v7667_v40, 0 }
0x240d   :  { %v7739_v41 = vand.u32 4294901760, %v7668_v42 }
0x240f   :  { %v7740_v4 = vsub.f32 %v7668_v42, %v7739_v41 }
0x2411   :  { %v7741_v9 = vand.u32 4294901760, %v7740_v4 }
0x2413   :  { %v7742_v24 = vsub.f32 %v7740_v4, %v7741_v9 }
0x2415   :  { %v7743_v27 = vand.u32 4294901760, %v7742_v24 }
0x2417   :  { %11375 = vmatmul.mubr.f32.vlgmr.msra.gmra.mrb[38].mxu0 %v7743_v27 }
0x2418   :  { %12118 = vmatpush3.bf16.msra.mxu0 %v13383_v0  ;;  %11385 = vmatprep.mubr.msk.f32.mxu0 %vm12667_vm5, %v12668_v10 }
0x2419   :  { %12119 = vmatprep.subr.bf16.mxu0 %v12666_v29 }
0x241c   :  { %12121 = vmatpush3.bf16.msra.mxu0 %v13391_v8 }
0x241d   :  { %12122 = vmatprep.subr.bf16.mxu0 %v12666_v29 }
0x241f   :  { %11386 = vmatmul.mubr.f32.vlgmr.msra.gmra.mrb[40].mxu0 %v7739_v41 }
0x2420   :  { %12124 = vmatpush3.bf16.msra.mxu0 %v13389_v2  ;;  %11396 = vmatprep.mubr.msk.f32.mxu0 %vm12667_vm5, %v12668_v10 }
0x2421   :  { %12125 = vmatprep.subr.bf16.mxu0 %v12666_v29 }
0x2424   :  { %12127 = vmatpush3.bf16.msra.mxu0 %v13394_v12 }
0x2425   :  { %12128 = vmatprep.subr.bf16.mxu0 %v12666_v29 }
0x2427   :  { %11397 = vmatmul.mubr.f32.vlgmr.msra.gmra.mrb[42].mxu0 %v7740_v4 }
0x2428   :  { %12130 = vmatpush3.bf16.msra.mxu0 %v13370_v47  ;;  %11407 = vmatprep.mubr.msk.f32.mxu0 %vm12667_vm5, %v12668_v10 }
0x2429   :  { %12131 = vmatprep.subr.bf16.mxu0 %v12666_v29 }
0x242c   :  { %12133 = vmatpush3.bf16.msra.mxu0 %v13379_v55 }
0x242d   :  { %12134 = vmatprep.subr.bf16.mxu0 %v12666_v29 }
0x242f   :  { %11408 = vmatmul.mubr.f32.vlgmr.msra.gmra.mrb[44].mxu0 %v7741_v9 }
0x2430   :  { %12136 = vmatpush3.bf16.msra.mxu0 %v13400_v16  ;;  %11418 = vmatprep.mubr.msk.f32.mxu0 %vm12667_vm5, %v12668_v10 }
0x2431   :  { %12137 = vmatprep.subr.bf16.mxu0 %v12666_v29 }
0x2434   :  { %12139 = vmatpush3.bf16.msra.mxu0 %v13405_v17 }
0x2435   :  { %12140 = vmatprep.subr.bf16.mxu0 %v12666_v29 }
0x2437   :  { %11419 = vmatmul.mubr.f32.vlgmr.msra.gmra.mrb[46].mxu0 %v7739_v41 }
0x2438   :  { %12142 = vmatpush3.bf16.msra.mxu0 %v13370_v47  ;;  %11429 = vmatprep.mubr.msk.f32.mxu0 %vm12667_vm5, %v12668_v10 }
0x2439   :  { %12143 = vmatprep.subr.bf16.mxu0 %v12666_v29 }
0x243c   :  { %12145 = vmatpush3.bf16.msra.mxu0 %v13379_v55 }
0x243d   :  { %12182 = vmatprep.subr.bf16.mxu0 %v12666_v29 }
0x243f   :  { %11430 = vmatmul.mubr.f32.vlgmr.msra.gmra.mrb[48].mxu0 %v7739_v41 }
0x2440   :  { %12184 = vmatpush3.bf16.msra.mxu0 %v13370_v47  ;;  %11506 = vmatprep.mubr.msk.f32.mxu0 %vm12667_vm5, %v12668_v10 }
0x2441   :  { %12185 = vmatprep.subr.bf16.mxu0 %v12666_v29 }
0x2444   :  { %12187 = vmatpush3.bf16.msra.mxu0 %v13379_v55 }
0x2445   :  { %12188 = vmatprep.subr.bf16.mxu0 %v12666_v29 }
0x24ea   :  { %v7745_v13 = vpop.f32.mrb[38].mxu0 }
0x24eb   :  { %v11376_v30 = vpop.f32.mrb[39].mxu0 }
0x24f2   :  { %v7836_v43 = vpop.f32.mrb[40].mxu0 }
0x24f3   :  { %v7837_v14 = vadd.f32 %v7836_v43, %v7745_v13  ;;  %v11387_v46 = vpop.f32.mrb[41].mxu0 }
0x24fa   :  { %v7916_v39 = vpop.f32.mrb[42].mxu0 }
0x24fb   :  { %v7917_v48 = vadd.f32 %v7916_v39, %v7837_v14  ;;  %v11398_v49 = vpop.f32.mrb[43].mxu0 }
0x2502   :  { %v7993_v50 = vpop.f32.mrb[44].mxu0 }
0x2503   :  { %v7994_v51 = vadd.f32 %v7993_v50, %v7917_v48  ;;  %v11409_v52 = vpop.f32.mrb[45].mxu0 }
0x250a   :  { %v8076_v45 = vpop.f32.mrb[46].mxu0 }
0x250b   :  { %v8077_v53 = vadd.f32 %v8076_v45, %v7994_v51  ;;  %v11420_v44 = vpop.f32.mrb[47].mxu0 }
0x2512   :  { %v8151_v54 = vpop.f32.mrb[48].mxu0 }
0x2513   :  { %v8152_v56 = vadd.f32 %v8151_v54, %v8077_v53  ;;  %v11431_v58 = vpop.f32.mrb[49].mxu0 }
0x2515   :  { %v8155_v59 = vadd.f32 %v13479_v36, %v8152_v56 }
0x2517   :  { %12508 = vtanh.f32 %v8155_v59  ;;  %v9940_v62 = vmul.f32 -1.442695, %v8155_v59 }
0x2519   :  { %12510 = vpow2.f32 %v9940_v62 }
0x2521   :  { %v12509_v61 = vpop.eup %12508 }
0x2522   :  { %8168 = vrot.lane.b32.xlu1 %v12509_v61, %s12669_s5 }
0x2523   :  { %v12511_v1 = vpop.eup %12510 }
0x2524   :  { %v8159_v3 = vadd.f32 1.0, %v12511_v1 }
0x2526   :  { %12512 = vrcp.f32 %v8159_v3 }
0x2530   :  { %v12513_v5 = vpop.eup %12512 }
0x2531   :  { %v8166_v20 = vmul.f32 %v12513_v5, %v8164_v19 }
0x2594   :  { %v8169_v6 = vpop.permute.xlu1 %8168 }
0x2595   :  { %v8171_v18 = vmul.f32 %v12513_v5, %v8169_v6 }
0x2597   :  { %8173 = vrot.lane.b32.xlu0 %v8171_v18, %s12660_s21 }
0x2609   :  { %v8174_v21 = vpop.permute.xlu0 %8173 }
0x260a   :  { %v13682_v7 = vadd.f32 %v8174_v21, %v8166_v20 }
0x260c   :  { %12514 = vtanh.f32 %v13682_v7  ;;  %v8723_v30 = vrot.slane %v13682_v7, 6 }
0x2616   :  { %v12515_v22 = vpop.eup %12514 }
0x2617   :  { %8179 = vrot.lane.b32.xlu1 %v12515_v22, %s12669_s5 }
0x2689   :  { %v8180_v23 = vpop.permute.xlu1 %8179 }
0x268a   :  { %v13686_v25 = vmul.f32 %v12513_v5, %v8180_v23 }
0x268c   :  { %8222 = vrot.lane.b32.xlu0 %v13686_v25, %s12660_s21 }
0x26fe   :  { %v8223_v31 = vpop.permute.xlu0 %8222 }
0x26ff   :  { %v8224_v60 = vsel %vm668_vm4, %v8223_v31, 0 }
0x2700   :  { %v8295_v63 = vand.u32 4294901760, %v8224_v60 }
0x2702   :  { %v8296_v15 = vsub.f32 %v8224_v60, %v8295_v63 }
0x2704   :  { %v8297_v26 = vand.u32 4294901760, %v8296_v15 }
0x2706   :  { %v8298_v32 = vsub.f32 %v8296_v15, %v8297_v26 }
0x2708   :  { %v8299_v33 = vand.u32 4294901760, %v8298_v32 }
0x270a   :  { %11441 = vmatmul.mubr.f32.vlgmr.msra.gmra.mrb[22].mxu1 %v8299_v33 }
0x270b   :  { %12154 = vmatpush3.bf16.msra.mxu1 %v13383_v0  ;;  %11451 = vmatprep.mubr.msk.f32.mxu1 %vm12667_vm5, %v12668_v10 }
0x270c   :  { %12155 = vmatprep.subr.bf16.mxu1 %v12666_v29 }
0x270f   :  { %12157 = vmatpush3.bf16.msra.mxu1 %v13391_v8 }
0x2710   :  { %12158 = vmatprep.subr.bf16.mxu1 %v12666_v29 }
0x2712   :  { %11452 = vmatmul.mubr.f32.vlgmr.msra.gmra.mrb[22].mxu1 %v8295_v63 }
0x2713   :  { %12160 = vmatpush3.bf16.msra.mxu1 %v13389_v2  ;;  %11462 = vmatprep.mubr.msk.f32.mxu1 %vm12667_vm5, %v12668_v10 }
0x2714   :  { %12161 = vmatprep.subr.bf16.mxu1 %v12666_v29 }
0x2717   :  { %12163 = vmatpush3.bf16.msra.mxu1 %v13394_v12 }
0x2718   :  { %12164 = vmatprep.subr.bf16.mxu1 %v12666_v29 }
0x271a   :  { %11463 = vmatmul.mubr.f32.vlgmr.msra.gmra.mrb[22].mxu1 %v8296_v15 }
0x271b   :  { %12166 = vmatpush3.bf16.msra.mxu1 %v13370_v47  ;;  %11473 = vmatprep.mubr.msk.f32.mxu1 %vm12667_vm5, %v12668_v10 }
0x271c   :  { %12167 = vmatprep.subr.bf16.mxu1 %v12666_v29 }
0x271f   :  { %12169 = vmatpush3.bf16.msra.mxu1 %v13379_v55 }
0x2720   :  { %12170 = vmatprep.subr.bf16.mxu1 %v12666_v29 }
0x2722   :  { %11474 = vmatmul.mubr.f32.vlgmr.msra.gmra.mrb[22].mxu1 %v8297_v26 }
0x2723   :  { %12172 = vmatpush3.bf16.msra.mxu1 %v13400_v16  ;;  %11484 = vmatprep.mubr.msk.f32.mxu1 %vm12667_vm5, %v12668_v10 }
0x2724   :  { %12173 = vmatprep.subr.bf16.mxu1 %v12666_v29 }
0x2727   :  { %12175 = vmatpush3.bf16.msra.mxu1 %v13405_v17 }
0x2728   :  { %12176 = vmatprep.subr.bf16.mxu1 %v12666_v29 }
0x272a   :  { %11485 = vmatmul.mubr.f32.vlgmr.msra.gmra.mrb[22].mxu1 %v8295_v63 }
0x272b   :  { %12178 = vmatpush3.bf16.msra.mxu1 %v13370_v47  ;;  %11495 = vmatprep.mubr.msk.f32.mxu1 %vm12667_vm5, %v12668_v10 }
0x272c   :  { %12179 = vmatprep.subr.bf16.mxu1 %v12666_v29 }
0x272f   :  { %12181 = vmatpush3.bf16.msra.mxu1 %v13379_v55 }
0x2730   :  { %12218 = vmatprep.subr.bf16.mxu1 %v12666_v29 }
0x2732   :  { %11496 = vmatmul.mubr.f32.vlgmr.msra.gmra.mrb[22].mxu1 %v8295_v63 }
0x2733   :  { %12220 = vmatpush3.bf16.msra.mxu1 %v13370_v47  ;;  %11572 = vmatprep.mubr.msk.f32.mxu1 %vm12667_vm5, %v12668_v10 }
0x2734   :  { %12221 = vmatprep.subr.bf16.mxu1 %v12666_v29 }
0x2737   :  { %12223 = vmatpush3.bf16.msra.mxu1 %v13379_v55 }
0x2738   :  { %12224 = vmatprep.subr.bf16.mxu1 %v12666_v29 }
0x2805   :  { %v8707_v28 = vpop.f32.mrb[22].mxu1 }
0x2806   :  { %v8712_v34 = vrot.slane %v8707_v28, 6  ;;  %v11497_v38 = vpop.f32.mrb[23].mxu1 }
0x2808   :  { %v8714_v40 = vadd.f32 %v13479_v36, %v8712_v34 }
0x280a   :  { %12516 = vtanh.f32 %v8714_v40  ;;  %v9941_v41 = vmul.f32 -1.442695, %v8714_v40 }
0x280c   :  { %12518 = vpow2.f32 %v9941_v41 }
0x2814   :  { %v12517_v42 = vpop.eup %12516 }
0x2815   :  { %8727 = vrot.lane.b32.xlu1 %v12517_v42, %s12669_s5  ;;  %v12670_v42 = vmov 1966171168  }
0x2816   :  { %v12519_v4 = vpop.eup %12518  ;;  %v5942_v41 = vunpack.c.l.s4 %v12670_v42 }
0x2817   :  { %v8718_v9 = vadd.f32 1.0, %v12519_v4 }
0x2819   :  { %12520 = vrcp.f32 %v8718_v9 }
0x2823   :  { %v12521_v24 = vpop.eup %12520 }
0x2824   :  { %v8725_v43 = vmul.f32 %v12521_v24, %v8723_v30 }
0x2887   :  { %v8728_v27 = vpop.permute.xlu1 %8727 }
0x2888   :  { %v8730_v13 = vmul.f32 %v12521_v24, %v8728_v27 }
0x288a   :  { %8732 = vrot.lane.b32.xlu0 %v8730_v13, %s12660_s21 }
0x28fc   :  { %v8733_v14 = vpop.permute.xlu0 %8732 }
0x28fd   :  { %v13731_v46 = vadd.f32 %v8733_v14, %v8725_v43  ;;  %v7063_v14 = vcombine.high %v13588_v57, %v13588_v57 }
0x28ff   :  { %12522 = vtanh.f32 %v13731_v46  ;;  %v9285_v21 = vrot.slane %v13731_v46, 6  ;;  %v7624_v46 = vcombine.high %v13637_v37, %v13637_v37 }
0x2909   :  { %v12523_v39 = vpop.eup %12522 }
0x290a   :  { %8738 = vrot.lane.b32.xlu1 %v12523_v39, %s12669_s5 }
0x297c   :  { %v8739_v48 = vpop.permute.xlu1 %8738 }
0x297d   :  { %v13735_v49 = vmul.f32 %v12521_v24, %v8739_v48 }
0x297f   :  { %v8783_v50 = vrot.slane %v13735_v49, 2 }
0x2981   :  { %8784 = vrot.lane.b32.xlu0 %v8783_v50, %s12660_s21 }
0x29f3   :  { %v8785_v51 = vpop.permute.xlu0 %8784 }
0x29f4   :  { %v8786_v52 = vsel %vm668_vm4, %v8785_v51, 0 }
0x29f5   :  { %v8857_v45 = vand.u32 4294901760, %v8786_v52 }
0x29f7   :  { %v8858_v53 = vsub.f32 %v8786_v52, %v8857_v45 }
0x29f9   :  { %v8859_v44 = vand.u32 4294901760, %v8858_v53 }
0x29fb   :  { %v8860_v54 = vsub.f32 %v8858_v53, %v8859_v44 }
0x29fd   :  { %v8861_v56 = vand.u32 4294901760, %v8860_v54 }
0x29ff   :  { %11507 = vmatmul.mubr.f32.vlgmr.msra.gmra.mrb[50].mxu0 %v8861_v56 }
0x2a00   :  { %12190 = vmatpush3.bf16.msra.mxu0 %v13383_v0  ;;  %11517 = vmatprep.mubr.msk.f32.mxu0 %vm12667_vm5, %v12668_v10 }
0x2a01   :  { %12191 = vmatprep.subr.bf16.mxu0 %v12666_v29 }
0x2a04   :  { %12193 = vmatpush3.bf16.msra.mxu0 %v13391_v8 }
0x2a05   :  { %12194 = vmatprep.subr.bf16.mxu0 %v12666_v29 }
0x2a07   :  { %11518 = vmatmul.mubr.f32.vlgmr.msra.gmra.mrb[50].mxu0 %v8857_v45 }
0x2a08   :  { %12196 = vmatpush3.bf16.msra.mxu0 %v13389_v2  ;;  %11528 = vmatprep.mubr.msk.f32.mxu0 %vm12667_vm5, %v12668_v10 }
0x2a09   :  { %12197 = vmatprep.subr.bf16.mxu0 %v12666_v29 }
0x2a0c   :  { %12199 = vmatpush3.bf16.msra.mxu0 %v13394_v12 }
0x2a0d   :  { %12200 = vmatprep.subr.bf16.mxu0 %v12666_v29 }
0x2a0f   :  { %11529 = vmatmul.mubr.f32.vlgmr.msra.gmra.mrb[50].mxu0 %v8858_v53 }
0x2a10   :  { %12202 = vmatpush3.bf16.msra.mxu0 %v13370_v47  ;;  %11539 = vmatprep.mubr.msk.f32.mxu0 %vm12667_vm5, %v12668_v10 }
0x2a11   :  { %12203 = vmatprep.subr.bf16.mxu0 %v12666_v29 }
0x2a14   :  { %12205 = vmatpush3.bf16.msra.mxu0 %v13379_v55 }
0x2a15   :  { %12206 = vmatprep.subr.bf16.mxu0 %v12666_v29 }
0x2a17   :  { %11540 = vmatmul.mubr.f32.vlgmr.msra.gmra.mrb[50].mxu0 %v8859_v44 }
0x2a18   :  { %12208 = vmatpush3.bf16.msra.mxu0 %v13400_v16  ;;  %11550 = vmatprep.mubr.msk.f32.mxu0 %vm12667_vm5, %v12668_v10 }
0x2a19   :  { %12209 = vmatprep.subr.bf16.mxu0 %v12666_v29 }
0x2a1c   :  { %12211 = vmatpush3.bf16.msra.mxu0 %v13405_v17 }
0x2a1d   :  { %12212 = vmatprep.subr.bf16.mxu0 %v12666_v29 }
0x2a1f   :  { %11551 = vmatmul.mubr.f32.vlgmr.msra.gmra.mrb[50].mxu0 %v8857_v45 }
0x2a20   :  { %12214 = vmatpush3.bf16.msra.mxu0 %v13370_v47  ;;  %11561 = vmatprep.mubr.msk.f32.mxu0 %vm12667_vm5, %v12668_v10 }
0x2a21   :  { %12215 = vmatprep.subr.bf16.mxu0 %v12666_v29 }
0x2a24   :  { %12217 = vmatpush3.bf16.msra.mxu0 %v13379_v55 }
0x2a27   :  { %11562 = vmatmul.mubr.f32.vlgmr.msra.gmra.mrb[50].mxu0 %v8857_v45 }
0x2afa   :  { %v9269_v58 = vpop.f32.mrb[50].mxu0 }
0x2afb   :  { %v9274_v59 = vrot.slane %v9269_v58, 4  ;;  %v11563_v61 = vpop.f32.mrb[51].mxu0 }
0x2afd   :  { %v9276_v62 = vadd.f32 %v13479_v36, %v9274_v59 }
0x2aff   :  { %12524 = vtanh.f32 %v9276_v62  ;;  %v9942_v3 = vmul.f32 -1.442695, %v9276_v62 }
0x2b01   :  { %12526 = vpow2.f32 %v9942_v3 }
0x2b09   :  { %v12525_v1 = vpop.eup %12524 }
0x2b0a   :  { %9289 = vrot.lane.b32.xlu1 %v12525_v1, %s12669_s5 }
0x2b0b   :  { %v12527_v5 = vpop.eup %12526 }
0x2b0c   :  { %v9280_v6 = vadd.f32 1.0, %v12527_v5 }
0x2b0e   :  { %12528 = vrcp.f32 %v9280_v6 }
0x2b18   :  { %v12529_v18 = vpop.eup %12528 }
0x2b19   :  { %v9287_v7 = vmul.f32 %v12529_v18, %v9285_v21 }
0x2b7c   :  { %v9290_v19 = vpop.permute.xlu1 %9289 }
0x2b7d   :  { %v9292_v20 = vmul.f32 %v12529_v18, %v9290_v19 }
0x2b7f   :  { %9294 = vrot.lane.b32.xlu0 %v9292_v20, %s12660_s21 }
0x2bf1   :  { %v9295_v22 = vpop.permute.xlu0 %9294 }
0x2bf2   :  { %v13773_v23 = vadd.f32 %v9295_v22, %v9287_v7 }
0x2bf4   :  { %12530 = vtanh.f32 %v13773_v23  ;;  %v9846_v6 = vrot.slane %v13773_v23, 6 }
0x2bfe   :  { %v12531_v31 = vpop.eup %12530 }
0x2bff   :  { %9300 = vrot.lane.b32.xlu1 %v12531_v31, %s12669_s5 }
0x2c71   :  { %v9301_v60 = vpop.permute.xlu1 %9300 }
0x2c72   :  { %v13777_v63 = vmul.f32 %v12529_v18, %v9301_v60 }
0x2c74   :  { %v9344_v15 = vrot.slane %v13777_v63, 4  ;;  %v9305_v56 = vcombine.high %v13777_v63, %v13777_v63 }
0x2c76   :  { %9345 = vrot.lane.b32.xlu0 %v9344_v15, %s12660_s21 }
0x2ce8   :  { %v9346_v26 = vpop.permute.xlu0 %9345 }
0x2ce9   :  { %v9347_v32 = vsel %vm668_vm4, %v9346_v26, 0 }
0x2cea   :  { %v9418_v33 = vand.u32 4294901760, %v9347_v32 }
0x2cec   :  { %v9419_v28 = vsub.f32 %v9347_v32, %v9418_v33 }
0x2cee   :  { %v9420_v34 = vand.u32 4294901760, %v9419_v28 }
0x2cf0   :  { %v9421_v38 = vsub.f32 %v9419_v28, %v9420_v34 }
0x2cf2   :  { %v9422_v40 = vand.u32 4294901760, %v9421_v38 }
0x2cf4   :  { %11573 = vmatmul.mubr.f32.vlgmr.msra.gmra.mrb[24].mxu1 %v9422_v40 }
0x2cf5   :  { %12226 = vmatpush3.bf16.msra.mxu1 %v13383_v0  ;;  %11583 = vmatprep.mubr.msk.f32.mxu1 %vm12667_vm5, %v12668_v10 }
0x2cf6   :  { %12227 = vmatprep.subr.bf16.mxu1 %v12666_v29 }
0x2cf9   :  { %12229 = vmatpush3.bf16.msra.mxu1 %v13391_v8 }
0x2cfa   :  { %12230 = vmatprep.subr.bf16.mxu1 %v12666_v29 }
0x2cfc   :  { %11584 = vmatmul.mubr.f32.vlgmr.msra.gmra.mrb[24].mxu1 %v9418_v33 }
0x2cfd   :  { %12232 = vmatpush3.bf16.msra.mxu1 %v13389_v2  ;;  %11594 = vmatprep.mubr.msk.f32.mxu1 %vm12667_vm5, %v12668_v10 }
0x2cfe   :  { %12233 = vmatprep.subr.bf16.mxu1 %v12666_v29 }
0x2d01   :  { %12235 = vmatpush3.bf16.msra.mxu1 %v13394_v12 }
0x2d02   :  { %12236 = vmatprep.subr.bf16.mxu1 %v12666_v29 }
0x2d04   :  { %11595 = vmatmul.mubr.f32.vlgmr.msra.gmra.mrb[24].mxu1 %v9419_v28 }
0x2d05   :  { %12238 = vmatpush3.bf16.msra.mxu1 %v13370_v47  ;;  %11605 = vmatprep.mubr.msk.f32.mxu1 %vm12667_vm5, %v12668_v10 }
0x2d06   :  { %12239 = vmatprep.subr.bf16.mxu1 %v12666_v29 }
0x2d09   :  { %12241 = vmatpush3.bf16.msra.mxu1 %v13379_v55 }
0x2d0a   :  { %12242 = vmatprep.subr.bf16.mxu1 %v12666_v29 }
0x2d0c   :  { %11606 = vmatmul.mubr.f32.vlgmr.msra.gmra.mrb[24].mxu1 %v9420_v34 }
0x2d0d   :  { %12244 = vmatpush3.bf16.msra.mxu1 %v13400_v16  ;;  %11616 = vmatprep.mubr.msk.f32.mxu1 %vm12667_vm5, %v12668_v10 }
0x2d0e   :  { %12245 = vmatprep.subr.bf16.mxu1 %v12666_v29 }
0x2d11   :  { %12247 = vmatpush3.bf16.msra.mxu1 %v13405_v17 }
0x2d12   :  { %12248 = vmatprep.subr.bf16.mxu1 %v12666_v29 }
0x2d14   :  { %11617 = vmatmul.mubr.f32.vlgmr.msra.gmra.mrb[24].mxu1 %v9418_v33 }
0x2d15   :  { %12250 = vmatpush3.bf16.msra.mxu1 %v13370_v47  ;;  %11627 = vmatprep.mubr.msk.f32.mxu1 %vm12667_vm5, %v12668_v10  ;;  %v5944_v10 = vlaneseq }
0x2d16   :  { %12251 = vmatprep.subr.bf16.mxu1 %v12666_v29  ;;  %v5943_v29 = vunpack.c.0.s8 %v5942_v41 }
0x2d17   :  { %v5945_v9 = vshrl.u32 %v5944_v10, 7 }
0x2d19   :  { %12253 = vmatpush3.bf16.msra.mxu1 %v13379_v55  ;;  %v13813_v55 = vsub.s32 %v5943_v29, %v5945_v9  ;;  %v13822_v43 = vsub.s32 0, %v5945_v9 }
0x2d1b   :  { %v5947_v24 = vrot.slane %v13490_v11, %v13813_v55  ;;  %v7631_v48 = vrot.slane %v7624_v46, %v13813_v55  ;;  %v8190_v45 = vrot.slane %v13686_v25, %v13813_v55  ;;  %v8749_v53 = vrot.slane %v13735_v49, %v13813_v55 }
0x2d1c   :  { %11628 = vmatmul.mubr.f32.vlgmr.msra.gmra.mrb[24].mxu1 %v9418_v33  ;;  %v9312_v25 = vrot.slane %v9305_v56, %v13813_v55 }
0x2d1d   :  { %v5955_v30 = vrot.slane %v5947_v24, %v13813_v55  ;;  %v7639_v37 = vrot.slane %v7631_v48, %v13813_v55  ;;  %v8198_v59 = vrot.slane %v8190_v45, %v13813_v55  ;;  %v8757_v61 = vrot.slane %v8749_v53, %v13813_v55 }
0x2d1e   :  { %v9320_v3 = vrot.slane %v9312_v25, %v13813_v55  ;;  %v5948_v7 = vcombine.high %v5947_v24, %v5947_v24  ;;  %v7632_v34 = vcombine.high %v7631_v48, %v7631_v48  ;;  %v9313_v24 = vcombine.high %v9312_v25, %v9312_v25 }
0x2d1f   :  { %v5966_v50 = vrot.slane %v5955_v30, %v13822_v43  ;;  %v7647_v54 = vcombine.high %v7639_v37, %v7639_v37  ;;  %v8209_v49 = vrot.slane %v8198_v59, %v13822_v43  ;;  %v8765_v62 = vcombine.high %v8757_v61, %v8757_v61 }
0x2d20   :  { %v9331_v5 = vrot.slane %v9320_v3, %v13822_v43  ;;  %v5962_v63 = vrot.slane %v5948_v7, %v13813_v55 }
0x2d21   :  { %v7652_v58 = vrot.slane %v7647_v54, %v13822_v43  ;;  %v8770_v1 = vrot.slane %v8765_v62, %v13822_v43 }
0x2d22   :  { %v5970_v32 = vrot.slane %v5962_v63, %v13822_v43 }
0x2def   :  { %v9830_v0 = vpop.f32.mrb[24].mxu1 }
0x2df0   :  { %v9835_v2 = vrot.slane %v9830_v0, 2  ;;  %v11629_v8 = vpop.f32.mrb[25].mxu1 }
0x2df1   :  { %v8191_v8 = vcombine.high %v8190_v45, %v8190_v45 }
0x2df2   :  { %v9837_v12 = vadd.f32 %v13479_v36, %v9835_v2  ;;  %v6507_v36 = vrot.slane %v13539_v35, %v13813_v55  ;;  %v7070_v35 = vrot.slane %v7063_v14, %v13813_v55  ;;  %v7646_v2 = vrot.slane %v7632_v34, %v13813_v55 }
0x2df3   :  { %v8205_v10 = vrot.slane %v8191_v8, %v13813_v55 }
0x2df4   :  { %12532 = vtanh.f32 %v9837_v12  ;;  %v9943_v17 = vmul.f32 -1.442695, %v9837_v12  ;;  %v6515_v11 = vrot.slane %v6507_v36, %v13813_v55  ;;  %v7078_v52 = vrot.slane %v7070_v35, %v13813_v55 }
0x2df5   :  { %v6508_v22 = vcombine.high %v6507_v36, %v6507_v36  ;;  %v7071_v28 = vcombine.high %v7070_v35, %v7070_v35  ;;  %v8750_v12 = vcombine.high %v8749_v53, %v8749_v53  ;;  %v8213_v29 = vrot.slane %v8205_v10, %v13822_v43 }
0x2df6   :  { %12534 = vpow2.f32 %v9943_v17  ;;  %v6523_v51 = vcombine.high %v6515_v11, %v6515_v11  ;;  %v7089_v44 = vrot.slane %v7078_v52, %v13822_v43 }
0x2df7   :  { %v6522_v15 = vrot.slane %v6508_v22, %v13813_v55  ;;  %v7085_v0 = vrot.slane %v7071_v28, %v13813_v55 }
0x2df8   :  { %v6528_v57 = vrot.slane %v6523_v51, %v13822_v43 }
0x2df9   :  { %v6524_v33 = vcombine.high %v6522_v15, %v6522_v15  ;;  %v7093_v17 = vrot.slane %v7085_v0, %v13822_v43 }
0x2dfb   :  { %v6532_v40 = vrot.slane %v6524_v33, %v13822_v43 }
0x2dfe   :  { %v12533_v16 = vpop.eup %12532 }
0x2dff   :  { %9850 = vrot.lane.b32.xlu1 %v12533_v16, %s12669_s5 }
0x2e00   :  { %v12535_v47 = vpop.eup %12534 }
0x2e01   :  { %v9841_v4 = vadd.f32 1.0, %v12535_v47  ;;  %v7648_v47 = vcombine.high %v7646_v2, %v7646_v2 }
0x2e03   :  { %12536 = vrcp.f32 %v9841_v4  ;;  %v7656_v41 = vrot.slane %v7648_v47, %v13822_v43  ;;  %v8764_v4 = vrot.slane %v8750_v12, %v13813_v55 }
0x2e05   :  { %v8766_v9 = vcombine.high %v8764_v4, %v8764_v4 }
0x2e07   :  { %v8774_v36 = vrot.slane %v8766_v9, %v13822_v43 }
0x2e0d   :  { %v13819_v27 = vpop.eup %12536 }
0x2e0e   :  { %v9848_v18 = vmul.f32 %v13819_v27, %v9846_v6 }
0x2e71   :  { %v9851_v13 = vpop.permute.xlu1 %9850 }
0x2e72   :  { %v9853_v39 = vmul.f32 %v13819_v27, %v9851_v13  ;;  %v9327_v13 = vrot.slane %v9313_v24, %v13813_v55 }
0x2e74   :  { %9855 = vrot.lane.b32.xlu0 %v9853_v39, %s12660_s21  ;;  %v9335_v30 = vrot.slane %v9327_v13, %v13822_v43 }
0x2e78   :  { %5971 = vrot.lane.b32.xlu0 %v5966_v50, %s12660_s21 }
0x2e7c   :  { %6533 = vrot.lane.b32.xlu0 %v6528_v57, %s12660_s21 }
0x2e80   :  { %7094 = vrot.lane.b32.xlu0 %v7089_v44, %s12660_s21 }
0x2e84   :  { %7657 = vrot.lane.b32.xlu0 %v7652_v58, %s12660_s21 }
0x2e88   :  { %8214 = vrot.lane.b32.xlu0 %v8209_v49, %s12660_s21 }
0x2e8c   :  { %8775 = vrot.lane.b32.xlu0 %v8770_v1, %s12660_s21 }
0x2e90   :  { %9336 = vrot.lane.b32.xlu0 %v9331_v5, %s12660_s21 }
0x2ee6   :  { %v9856_v19 = vpop.permute.xlu0 %9855 }
0x2ee7   :  { %v9858_v20 = vadd.f32 %v9856_v19, %v9848_v18 }
0x2ee9   :  { %12538 = vtanh.f32 %v9858_v20 }
0x2eea   :  { %v5972_v21 = vpop.permute.xlu0 %5971 }
0x2eeb   :  { %5978 = vst.msk [vmem:[#allocation12 + $0x7] sm:$0x1] %vm5977_vm10, %v5972_v21 }
0x2eee   :  { %v6534_v31 = vpop.permute.xlu0 %6533 }
0x2eef   :  { %6539 = vst.msk [vmem:[#allocation12 + $0x6] sm:$0x1] %vm5977_vm10, %v6534_v31 }
0x2ef2   :  { %v7095_v60 = vpop.permute.xlu0 %7094 }
0x2ef3   :  { %v12539_v23 = vpop.eup %12538  ;;  %7100 = vst.msk [vmem:[#allocation12 + $0x5] sm:$0x1] %vm5977_vm10, %v7095_v60 }
0x2ef4   :  { %9861 = vrot.lane.b32.xlu1 %v12539_v23, %s12669_s5 }
0x2ef6   :  { %v7658_v26 = vpop.permute.xlu0 %7657 }
0x2ef7   :  { %7663 = vst.msk [vmem:[#allocation12 + $0x4] sm:$0x1] %vm5977_vm10, %v7658_v26 }
0x2ef8   :  { %5973 = vrot.lane.b32.xlu1 %v5970_v32, %s12660_s21 }
0x2efa   :  { %v8215_v38 = vpop.permute.xlu0 %8214 }
0x2efb   :  { %8220 = vst.msk [vmem:[#allocation12 + $0x3] sm:$0x1] %vm5977_vm10, %v8215_v38 }
0x2efc   :  { %6535 = vrot.lane.b32.xlu1 %v6532_v40, %s12660_s21 }
0x2efe   :  { %v8776_v16 = vpop.permute.xlu0 %8775 }
0x2eff   :  { %8781 = vst.msk [vmem:[#allocation12 + $0x2] sm:$0x1] %vm5977_vm10, %v8776_v16 }
0x2f00   :  { %7096 = vrot.lane.b32.xlu1 %v7093_v17, %s12660_s21 }
0x2f02   :  { %v9337_v42 = vpop.permute.xlu0 %9336 }
0x2f03   :  { %9342 = vst.msk [vmem:[#allocation12 + $0x1] sm:$0x1] %vm5977_vm10, %v9337_v42 }
0x2f04   :  { %7659 = vrot.lane.b32.xlu1 %v7656_v41, %s12660_s21 }
0x2f08   :  { %8216 = vrot.lane.b32.xlu1 %v8213_v29, %s12660_s21 }
0x2f0c   :  { %8777 = vrot.lane.b32.xlu1 %v8774_v36, %s12660_s21 }
0x2f10   :  { %9338 = vrot.lane.b32.xlu1 %v9335_v30, %s12660_s21 }
0x2f66   :  { %v9862_v14 = vpop.permute.xlu1 %9861 }
0x2f67   :  { %v9864_v46 = vmul.f32 %v13819_v27, %v9862_v14 }
0x2f69   :  { %v9866_v39 = vcombine.high %v9864_v46, %v9864_v46 }
0x2f6a   :  { %v5974_v11 = vpop.permute.xlu1 %5973 }
0x2f6b   :  { %v9873_v35 = vrot.slane %v9866_v39, %v13813_v55  ;;  %5979 = vst.msk [vmem:[#allocation12 + $0xf] sm:$0x1] %vm5977_vm10, %v5974_v11 }
0x2f6d   :  { %v9874_v48 = vcombine.high %v9873_v35, %v9873_v35  ;;  %v9881_v50 = vrot.slane %v9873_v35, %v13813_v55 }
0x2f6e   :  { %v6536_v51 = vpop.permute.xlu1 %6535 }
0x2f6f   :  { %6540 = vst.msk [vmem:[#allocation12 + $0xe] sm:$0x1] %vm5977_vm10, %v6536_v51  ;;  %v9889_v57 = vcombine.high %v9881_v50, %v9881_v50  ;;  %v9888_v52 = vrot.slane %v9874_v48, %v13813_v55 }
0x2f71   :  { %v9894_v37 = vrot.slane %v9889_v57, %v13822_v43  ;;  %v9890_v45 = vcombine.high %v9888_v52, %v9888_v52 }
0x2f72   :  { %v7097_v53 = vpop.permute.xlu1 %7096 }
0x2f73   :  { %7101 = vst.msk [vmem:[#allocation12 + $0xd] sm:$0x1] %vm5977_vm10, %v7097_v53  ;;  %9899 = vrot.lane.b32.xlu0 %v9894_v37, %s12660_s21  ;;  %v9898_v27 = vrot.slane %v9890_v45, %v13822_v43 }
0x2f75   :  { %9901 = vrot.lane.b32.xlu1 %v9898_v27, %s12660_s21  ;;  %s12628_s21 = scalar_lea.vmem %s9913_s17, 256 }
0x2f76   :  { %v7660_v44 = vpop.permute.xlu1 %7659  ;;  %p12629_p4 = scmp.ne.s32.totalorder %s9913_s17, %s12628_s21  ;;  %p12634_p6 = scmp.lt.s32.totalorder %s12628_s21, %s12628_s21 }
0x2f77   :  { %7664 = vst.msk [vmem:[#allocation12 + $0xc] sm:$0x1] %vm5977_vm10, %v7660_v44 }
0x2f78   :  { %p12635_p7 = por %p12634_p6, %p12633_p5 }
0x2f7a   :  { %v8217_v54 = vpop.permute.xlu1 %8216  ;;  %p12636_p8 = pnand %p12635_p7, %p12629_p4 }
0x2f7b   :  { %8221 = vst.msk [vmem:[#allocation12 + $0xb] sm:$0x1] %vm5977_vm10, %v8217_v54 }
0x2f7e   :  { %v8778_v56 = vpop.permute.xlu1 %8777 }
0x2f7f   :  { %8782 = vst.msk [vmem:[#allocation12 + $0xa] sm:$0x1] %vm5977_vm10, %v8778_v56 }
0x2f82   :  { %v9339_v55 = vpop.permute.xlu1 %9338 }
0x2f83   :  { %9343 = vst.msk [vmem:[#allocation12 + $0x9] sm:$0x1] %vm5977_vm10, %v9339_v55 }
0x2fe5   :  { %v9900_v58 = vpop.permute.xlu0 %9899 }
0x2fe6   :  { %9905 = vst.msk [vmem:[#allocation12] sm:$0x1] %vm5977_vm10, %v9900_v58 }
0x2fe7   :  { %v9902_v43 = vpop.permute.xlu1 %9901 }
0x2fe8   :  { %9906 = vst.msk [vmem:[#allocation12 + $0x8] sm:$0x1] %vm5977_vm10, %v9902_v43 }
0x2fe9   :  { %12639 = shalt.err (!%p12636_p8)
}
0x2fea   :  { %s12640_s26 = scalar_lea.hbm %s13931_s9, 256 }
0x2feb   :  { %p12641_p9 = scmp.ne.s32.totalorder %s13931_s9, %s12640_s26  ;;  %p12644_p10 = scmp.lt.u32.totalorder %s12640_s26, %s13931_s9 }
0x2fed   :  { %p12646_p11 = pnand %p12644_p10, %p12641_p9 }
0x2fef   :  { %12649 = shalt.err (!%p12646_p11)
}
0x2ff0   :  { %9918 = dma.vmem_to_hbm [thread:$0]  %s9913_s17, 256, %s13931_s9, [#allocation6], %s12664_s3, %s12664_s3, %s12665_s14  }
0x2ff1   :  { %12656 = dma.done.wait [#allocation6], 256  }
0x2ff2   :  { %12657 = vsyncadd [#allocation6], 4294967040 }
0x2ff3   :  { %9922 = vsyncpa [#allocation5], 1 }
0x2ff4   :  { %9923 = vsyncpa [#allocation8], 1 }
0x2ff5   :  { %9924 = vsyncpa [#allocation11], 1 }
0x2ff6   :  { %9925 = vsyncpa [#allocation6], 1 }

</bundles_post_ra>
